<compile_context>
chip_gen: v5e
topology: v5e:2x2
jax: 0.10.0
libtpu: 0.0.40
codegen_flags: <defaults>
</compile_context>

<pallas_src>
import functools

import numpy as np
import jax
import jax.numpy as jnp
from jax.experimental import pallas as pl
from jax.experimental.pallas import tpu as pltpu

F32 = jnp.float32
BF16 = jnp.bfloat16
LN_EPS = 1e-5
SLAB = 128          # lane-dense width of the fused k|v output slab
NEG_BIG = -1e30     # f32 softmax sentinel (kept in f32; never cast to bf16)
VMEM_LIMIT = 32 * 1024 * 1024


def _round_up(x, m):
    return ((x + m - 1) // m) * m


def _full_spec(arr):
    """BlockSpec covering the whole (small, resident) array every grid step."""
    nd = arr.ndim
    return pl.BlockSpec(arr.shape, lambda *_, nd=nd: (0,) * nd)


# ----------------------------------------------------------------------------
# MLP chain: Linear -> LayerNorm -> ReLU -> Linear  (bf16 MXU, f32 accumulate)
# ----------------------------------------------------------------------------
def _mlp_chain(x_bf16, w1_ref, b1_ref, g_ref, beta_ref, w2_ref, b2_ref):
    h = jnp.dot(x_bf16, w1_ref[...].astype(BF16),
                preferred_element_type=F32) + b1_ref[...]
    mu = jnp.mean(h, axis=-1, keepdims=True)
    var = jnp.mean((h - mu) ** 2, axis=-1, keepdims=True)
    hn = (h - mu) * jax.lax.rsqrt(var + LN_EPS)
    hn = hn * g_ref[...] + beta_ref[...]
    hn = jnp.maximum(hn, 0.0)
    return jnp.dot(hn.astype(BF16), w2_ref[...].astype(BF16),
                   preferred_element_type=F32) + b2_ref[...]


# ----------------------------------------------------------------------------
# Fused edge kernel: xk MLP + xv MLP + sigmoid(Linear(r_feat)) -> (E, 128) slab
# ----------------------------------------------------------------------------
def kv_mlp_kernel(x_ref,
                  w1k_ref, b1k_ref, gk_ref, bek_ref, w2k_ref, b2k_ref,
                  w1v_ref, b1v_ref, gv_ref, bev_ref, w2v_ref, b2v_ref,
                  eww_ref, ewb_ref, o_ref):
    x_bf = x_ref[...].astype(BF16)
    k = _mlp_chain(x_bf, w1k_ref, b1k_ref, gk_ref, bek_ref, w2k_ref, b2k_ref)
    v = _mlp_chain(x_bf, w1v_ref, b1v_ref, gv_ref, bev_ref, w2v_ref, b2v_ref)
    # edge-weight net: its weight was zero-padded to the full kv_input width
    # on the host, so no in-kernel column slicing of r_feat is needed.
    ew = jax.nn.sigmoid(jnp.dot(x_bf, eww_ref[...].astype(BF16),
                                preferred_element_type=F32) + ewb_ref[...])
    v = v * ew
    rows = x_ref.shape[0]
    pad = jnp.zeros((rows, SLAB - k.shape[-1] - v.shape[-1]), F32)
    o_ref[...] = jnp.concatenate([k, v, pad], axis=-1)


def kv_mlp_pallas(x, k_params, v_params, eww_full, ewb, *, tm=256):
    M, din = x.shape
    tm = min(tm, _round_up(M, 8))
    weights = list(k_params) + list(v_params) + [eww_full, ewb]
    in_specs = [pl.BlockSpec((tm, din), lambda i: (i, 0))]
    in_specs += [_full_spec(w) for w in weights]
    return pl.pallas_call(
        kv_mlp_kernel,
        out_shape=jax.ShapeDtypeStruct((M, SLAB), F32),
        grid=(pl.cdiv(M, tm),),
        in_specs=in_specs,
        out_specs=pl.BlockSpec((tm, SLAB), lambda i: (i, 0)),
        compiler_params=pltpu.CompilerParams(
            dimension_semantics=("parallel",),
            vmem_limit_bytes=VMEM_LIMIT),
    )(x, *weights)


# ----------------------------------------------------------------------------
# Node kernel: xq MLP
# ----------------------------------------------------------------------------
def q_mlp_kernel(x_ref, w1_ref, b1_ref, g_ref, be_ref, w2_ref, b2_ref, o_ref):
    out = _mlp_chain(x_ref[...].astype(BF16),
                     w1_ref, b1_ref, g_ref, be_ref, w2_ref, b2_ref)
    o_ref[...] = out.astype(o_ref.dtype)


def mlp_pallas(x, params, *, tm=256):
    w1, b1, g, beta, w2, b2 = params
    M, din = x.shape
    dout = w2.shape[1]
    tm = min(tm, _round_up(M, 8))
    weights = [w1, b1, g, beta, w2, b2]
    in_specs = [pl.BlockSpec((tm, din), lambda i: (i, 0))]
    in_specs += [_full_spec(w) for w in weights]
    return pl.pallas_call(
        q_mlp_kernel,
        out_shape=jax.ShapeDtypeStruct((M, dout), F32),
        grid=(pl.cdiv(M, tm),),
        in_specs=in_specs,
        out_specs=pl.BlockSpec((tm, dout), lambda i: (i, 0)),
        compiler_params=pltpu.CompilerParams(
            dimension_semantics=("parallel",),
            vmem_limit_bytes=VMEM_LIMIT),
    )(x, *weights)


# ----------------------------------------------------------------------------
# Attention / scatter kernel: flash-style online softmax over edge tiles.
# grid = (node tiles ["parallel"], edge tiles ["arbitrary" = reduction]).
# ----------------------------------------------------------------------------
def h2x_att_kernel(dst_ref, q_ref, kv_ref, rx_ref, o_ref,
                   m_sc, l_sc, acc_sc, *, n_heads, out_dim, n_edges):
    H, D = n_heads, out_dim
    dk = D // H
    ni = pl.program_id(0)
    ei = pl.program_id(1)
    tN = o_ref.shape[0]
    tE = q_ref.shape[0]

    @pl.when(ei == 0)
    def _init():
        m_sc[...] = jnp.full_like(m_sc, NEG_BIG)
        l_sc[...] = jnp.zeros_like(l_sc)
        acc_sc[...] = jnp.zeros_like(acc_sc)

    # validity of the (possibly ragged) last edge tile
    e_ids = ei * tE + jax.lax.broadcasted_iota(jnp.int32, (tE, 1), 0)
    valid = e_ids < n_edges                                        # (tE, 1)

    # one-hot dst mask for this (node tile, edge tile), built in-kernel
    node_ids = ni * tN + jax.lax.broadcasted_iota(jnp.int32, (tN, tE), 0)
    mask = (node_ids == dst_ref[...]).astype(BF16)                 # (tN, tE)

    kv = kv_ref[...]                                               # (tE, 128)
    k = kv[:, :D]                                                  # (tE, D)
    v = kv[:, D:D + H]                                             # (tE, H) already * e_w
    q = q_ref[...]                                                 # (tE, D)
    relx = jnp.where(valid, rx_ref[...], 0.0)                      # (tE, 3)

    # per-head score via block-diagonal head-pooling matrix (built from iota)
    d_iota = jax.lax.broadcasted_iota(jnp.int32, (D, H), 0) // dk
    h_iota = jax.lax.broadcasted_iota(jnp.int32, (D, H), 1)
    pool = (d_iota == h_iota).astype(BF16)                         # (D, H)
    scores = jnp.dot((q * k).astype(BF16), pool,
                     preferred_element_type=F32) * (1.0 / np.sqrt(dk))
    scores = jnp.where(valid, scores, NEG_BIG)                     # (tE, H)

    # online softmax across edge tiles.  The running max is shared by every
    # node of the tile — any upper bound is a valid stabilizer (it cancels in
    # alpha = exp(s-m) / sum exp(s-m)).
    t_max = jnp.max(scores, axis=0, keepdims=True)                 # (1, H)
    m_new = jnp.maximum(m_sc[...], t_max)                          # (1, H)
    rescale = jnp.exp(m_sc[...] - m_new)                           # (1, H)
    p = jnp.exp(scores - m_new)                                    # (tE, H)
    p = jnp.where(valid, p, 0.0)
    pw = jnp.where(valid, p * v, 0.0)                              # (tE, H)

    # pack [p | (p*v)*rel_x per head] -> ONE mask matmul does both segment sums
    parts = [p] + [pw[:, h:h + 1] * relx for h in range(H)]
    packed = jnp.concatenate(parts, axis=-1).astype(BF16)          # (tE, 4H)
    red = jnp.dot(mask, packed, preferred_element_type=F32)        # (tN, 4H)

    rescale3 = jnp.concatenate(
        [jnp.broadcast_to(rescale[:, h:h + 1], (1, 3)) for h in range(H)],
        axis=-1)                                                   # (1, 3H)
    l_sc[...] = rescale * l_sc[...] + red[:, :H]
    acc_sc[...] = rescale3 * acc_sc[...] + red[:, H:]
    m_sc[...] = m_new

    @pl.when(ei == pl.num_programs(1) - 1)
    def _finalize():
        l = l_sc[...]                                              # (tN, H)
        l_safe = jnp.where(l > 0.0, l, 1.0)
        inv = jnp.where(l > 0.0, 1.0 / l_safe, 0.0)                # 0 in-degree -> 0
        acc = acc_sc[...]                                          # (tN, 3H)
        out = jnp.zeros((tN, 3), F32)
        for h in range(H):
            out = out + acc[:, 3 * h:3 * h + 3] * inv[:, h:h + 1]
        o_ref[...] = out * (1.0 / H)


def attention_pallas(dst, q_dst, kv_slab, rel_x, *, n_nodes, n_heads, out_dim,
                     tile_n=32, tile_e=128):
    E, D = q_dst.shape
    N = n_nodes
    tN = min(tile_n, _round_up(N, 8))
    tE = tile_e if E >= tile_e else E
    grid = (pl.cdiv(N, tN), pl.cdiv(E, tE))

    dst2d = dst.reshape(1, E).astype(jnp.int32)
    kernel = functools.partial(h2x_att_kernel, n_heads=n_heads,
                               out_dim=out_dim, n_edges=E)

    # TODO(synk): output stays (N, 3) (semantics of the module); at N*3 floats
    # the sub-128-lane store is negligible, so no padded output slab is used.
    return pl.pallas_call(
        kernel,
        out_shape=jax.ShapeDtypeStruct((N, 3), F32),
        grid=grid,
        in_specs=[
            pl.BlockSpec((1, tE), lambda ni, ei: (0, ei)),      # dst ids
            pl.BlockSpec((tE, D), lambda ni, ei: (ei, 0)),      # q[dst]
            pl.BlockSpec((tE, SLAB), lambda ni, ei: (ei, 0)),   # k|v slab
            pl.BlockSpec((tE, 3), lambda ni, ei: (ei, 0)),      # rel_x
        ],
        out_specs=pl.BlockSpec((tN, 3), lambda ni, ei: (ni, 0)),
        scratch_shapes=[
            pltpu.VMEM((1, n_heads), F32),        # running max (per head)
            pltpu.VMEM((tN, n_heads), F32),       # running denominator
            pltpu.VMEM((tN, 3 * n_heads), F32),   # running numerator
        ],
        compiler_params=pltpu.CompilerParams(
            dimension_semantics=("parallel", "arbitrary"),
            vmem_limit_bytes=VMEM_LIMIT),
    )(dst2d, q_dst, kv_slab, rel_x)


# ----------------------------------------------------------------------------
# Parameter init (deterministic, synthetic) + full forward
# ----------------------------------------------------------------------------
def init_mlp(key, in_dim, out_dim, hidden_dim):
    k1, k2 = jax.random.split(key)
    w1 = 0.1 * jax.random.normal(k1, (in_dim, hidden_dim), F32)
    b1 = jnp.zeros((1, hidden_dim), F32)
    g = jnp.ones((1, hidden_dim), F32)
    beta = jnp.zeros((1, hidden_dim), F32)
    w2 = 0.1 * jax.random.normal(k2, (hidden_dim, out_dim), F32)
    b2 = jnp.zeros((1, out_dim), F32)
    return (w1, b1, g, beta, w2, b2)


def init_params(key, input_dim, hidden_dim, output_dim, n_heads,
                edge_feat_dim, r_feat_dim):
    kv_in = input_dim * 2 + edge_feat_dim + r_feat_dim
    kk, kv, kq, ke = jax.random.split(key, 4)
    ew_w = 0.1 * jax.random.normal(ke, (r_feat_dim, 1), F32)
    # zero-pad the edge-weight net weight to the full kv_input width so the
    # fused kv kernel can apply it without column slicing (r_feat occupies
    # columns [edge_feat_dim, edge_feat_dim + r_feat_dim) of kv_input).
    ew_w_full = jnp.zeros((kv_in, 1), F32).at[
        edge_feat_dim:edge_feat_dim + r_feat_dim].set(ew_w)
    return {
        'xk': init_mlp(kk, kv_in, output_dim, hidden_dim),
        'xv': init_mlp(kv, kv_in, n_heads, hidden_dim),
        'xq': init_mlp(kq, input_dim, output_dim, hidden_dim),
        'ew_w': ew_w,
        'ew_w_full': ew_w_full,
        'ew_b': jnp.zeros((1, 1), F32),
    }


def base_h2x_att_forward(params, h, rel_x, r_feat, edge_feat, edge_index,
                         n_heads):
    src, dst = edge_index[0], edge_index[1]
    # gathers + concat are index glue (XLA); hot-path compute is in Pallas.
    kv_input = jnp.concatenate([edge_feat, r_feat, h[dst], h[src]], axis=-1)

    kv_slab = kv_mlp_pallas(kv_input, params['xk'], params['xv'],
                            params['ew_w_full'], params['ew_b'])   # (E, 128)
    q = mlp_pallas(h, params['xq'])                                # (N, D)
    q_dst = q[dst]                                                 # (E, D)

    out_dim = params['xk'][4].shape[1]
    return attention_pallas(dst, q_dst, kv_slab, rel_x,
                            n_nodes=h.shape[0], n_heads=n_heads,
                            out_dim=out_dim)                       # (N, 3)


# ----------------------------------------------------------------------------
# Pure-JAX reference (f32, HIGHEST precision) for verification
# ----------------------------------------------------------------------------
def mlp_ref(x, p):
    w1, b1, g, beta, w2, b2 = p
    hh = jnp.dot(x, w1, precision=jax.lax.Precision.HIGHEST) + b1
    mu = hh.mean(-1, keepdims=True)
    var = ((hh - mu) ** 2).mean(-1, keepdims=True)
    hn = (hh - mu) / jnp.sqrt(var + LN_EPS) * g + beta
    hn = jnp.maximum(hn, 0.0)
    return jnp.dot(hn, w2, precision=jax.lax.Precision.HIGHEST) + b2


def ref_forward(params, h, rel_x, r_feat, edge_feat, edge_index, n_heads):
    src, dst = edge_index[0], edge_index[1]
    N = h.shape[0]
    kv_input = jnp.concatenate([edge_feat, r_feat, h[dst], h[src]], axis=-1)
    k = mlp_ref(kv_input, params['xk'])
    v = mlp_ref(kv_input, params['xv'])
    q = mlp_ref(h, params['xq'])
    E, D = k.shape
    dk = D // n_heads
    kh = k.reshape(E, n_heads, dk)
    qh = q[dst].reshape(E, n_heads, dk)
    scores = (qh * kh).sum(-1) / np.sqrt(dk)                       # (E, H)
    seg_max = jax.ops.segment_max(scores, dst, num_segments=N)
    seg_max = jnp.where(jnp.isfinite(seg_max), seg_max, 0.0)
    ex = jnp.exp(scores - seg_max[dst])
    denom = jax.ops.segment_sum(ex, dst, num_segments=N)
    alpha = ex / denom[dst]
    ew = jax.nn.sigmoid(jnp.dot(r_feat, params['ew_w'],
                                precision=jax.lax.Precision.HIGHEST)
                        + params['ew_b'])
    v = v * ew
    m = alpha[:, :, None] * (v[:, :, None] * rel_x[:, None, :])    # (E, H, 3)
    out = jax.ops.segment_sum(m, dst, num_segments=N)              # (N, H, 3)
    return out.mean(1)


# ----------------------------------------------------------------------------
if __name__ == "__main__":
    input_dim, hidden_dim, output_dim = 16, 32, 16
    n_heads, edge_feat_dim, r_feat_dim = 4, 4, 8
    N, E = 64, 512

    key = jax.random.PRNGKey(0)
    kp, khk, kx, kr, ke, ki = jax.random.split(key, 6)
    params = init_params(kp, input_dim, hidden_dim, output_dim, n_heads,
                         edge_feat_dim, r_feat_dim)

    h = jax.random.normal(khk, (N, input_dim), F32)
    rel_x = jax.random.normal(kx, (E, 3), F32)
    r_feat = jax.random.normal(kr, (E, r_feat_dim), F32)
    edge_feat = jax.random.normal(ke, (E, edge_feat_dim), F32)
    edge_index = jax.random.randint(ki, (2, E), 0, N, jnp.int32)

    out = base_h2x_att_forward(params, h, rel_x, r_feat, edge_feat,
                               edge_index, n_heads)
    out = jax.block_until_ready(out)

    ref = jax.block_until_ready(
        ref_forward(params, h, rel_x, r_feat, edge_feat, edge_index, n_heads))

    # bf16 MXU operands (f32 accumulation) vs. the all-f32 HIGHEST reference
    # widen the numerical gap; the tolerance reflects that (structural errors
    # are orders of magnitude larger than this).
    np.testing.assert_allclose(np.asarray(out), np.asarray(ref),
                               rtol=5e-2, atol=2e-2)
    print("KERNEL_OK")
</pallas_src>

<mosaic_0001>
module attributes {stable_mosaic.version = 11 : i64} {
  func.func @kv_mlp_kernel(%arg0: i32, %arg1: memref<256x44xf32, #tpu.memory_space<vmem>>, %arg2: memref<44x32xf32, #tpu.memory_space<vmem>>, %arg3: memref<1x32xf32, #tpu.memory_space<vmem>>, %arg4: memref<1x32xf32, #tpu.memory_space<vmem>>, %arg5: memref<1x32xf32, #tpu.memory_space<vmem>>, %arg6: memref<32x16xf32, #tpu.memory_space<vmem>>, %arg7: memref<1x16xf32, #tpu.memory_space<vmem>>, %arg8: memref<44x32xf32, #tpu.memory_space<vmem>>, %arg9: memref<1x32xf32, #tpu.memory_space<vmem>>, %arg10: memref<1x32xf32, #tpu.memory_space<vmem>>, %arg11: memref<1x32xf32, #tpu.memory_space<vmem>>, %arg12: memref<32x4xf32, #tpu.memory_space<vmem>>, %arg13: memref<1x4xf32, #tpu.memory_space<vmem>>, %arg14: memref<44x1xf32, #tpu.memory_space<vmem>>, %arg15: memref<1x1xf32, #tpu.memory_space<vmem>>, %arg16: memref<256x128xf32, #tpu.memory_space<vmem>>) attributes {dimension_semantics = [#tpu.dimension_semantics<parallel>], iteration_bounds = array<i64: 2>, scalar_prefetch = 0 : i64, scratch_operands = 0 : i64, tpu.core_type = #tpu.core_type<tc>, window_params = [{transform_indices = @transform_0, window_bounds = array<i64: 256, 44>}, {pipeline_mode = #tpu.pipeline_mode<synchronous>, transform_indices = @transform_1, window_bounds = array<i64: 44, 32>}, {pipeline_mode = #tpu.pipeline_mode<synchronous>, transform_indices = @transform_2, window_bounds = array<i64: 1, 32>}, {pipeline_mode = #tpu.pipeline_mode<synchronous>, transform_indices = @transform_3, window_bounds = array<i64: 1, 32>}, {pipeline_mode = #tpu.pipeline_mode<synchronous>, transform_indices = @transform_4, window_bounds = array<i64: 1, 32>}, {pipeline_mode = #tpu.pipeline_mode<synchronous>, transform_indices = @transform_5, window_bounds = array<i64: 32, 16>}, {pipeline_mode = #tpu.pipeline_mode<synchronous>, transform_indices = @transform_6, window_bounds = array<i64: 1, 16>}, {pipeline_mode = #tpu.pipeline_mode<synchronous>, transform_indices = @transform_7, window_bounds = array<i64: 44, 32>}, {pipeline_mode = #tpu.pipeline_mode<synchronous>, transform_indices = @transform_8, window_bounds = array<i64: 1, 32>}, {pipeline_mode = #tpu.pipeline_mode<synchronous>, transform_indices = @transform_9, window_bounds = array<i64: 1, 32>}, {pipeline_mode = #tpu.pipeline_mode<synchronous>, transform_indices = @transform_10, window_bounds = array<i64: 1, 32>}, {pipeline_mode = #tpu.pipeline_mode<synchronous>, transform_indices = @transform_11, window_bounds = array<i64: 32, 4>}, {pipeline_mode = #tpu.pipeline_mode<synchronous>, transform_indices = @transform_12, window_bounds = array<i64: 1, 4>}, {pipeline_mode = #tpu.pipeline_mode<synchronous>, transform_indices = @transform_13, window_bounds = array<i64: 44, 1>}, {pipeline_mode = #tpu.pipeline_mode<synchronous>, transform_indices = @transform_14, window_bounds = array<i64: 1, 1>}, {transform_indices = @transform_15, window_bounds = array<i64: 256, 128>}]} {
    %c0 = arith.constant 0 : index
    %c0_0 = arith.constant 0 : index
    %0 = vector.load %arg1[%c0, %c0_0] : memref<256x44xf32, #tpu.memory_space<vmem>>, vector<256x44xf32>
    %1 = arith.truncf %0 : vector<256x44xf32> to vector<256x44xbf16>
    %c0_1 = arith.constant 0 : index
    %c0_2 = arith.constant 0 : index
    %2 = vector.load %arg2[%c0_1, %c0_2] : memref<44x32xf32, #tpu.memory_space<vmem>>, vector<44x32xf32>
    %3 = arith.truncf %2 : vector<44x32xf32> to vector<44x32xbf16>
    %cst = arith.constant dense<0.000000e+00> : vector<256x32xf32>
    %4 = tpu.matmul %1, %3, %cst {dimension_numbers = #tpu.dot_dimension_numbers<[1], [0], [0], [1], [0, 0, 1, 1], [], []>} : vector<256x44xbf16>, vector<44x32xbf16>, vector<256x32xf32> -> vector<256x32xf32>
    %c0_3 = arith.constant 0 : index
    %c0_4 = arith.constant 0 : index
    %5 = vector.load %arg3[%c0_3, %c0_4] : memref<1x32xf32, #tpu.memory_space<vmem>>, vector<1x32xf32>
    %6 = vector.broadcast %5 : vector<1x32xf32> to vector<256x32xf32>
    %7 = arith.addf %4, %6 : vector<256x32xf32>
    %cst_5 = arith.constant dense<0.000000e+00> : vector<256xf32>
    %8 = vector.multi_reduction <add>, %7, %cst_5 [1] : vector<256x32xf32> to vector<256xf32>
    %9 = vector.shape_cast %8 : vector<256xf32> to vector<256x1xf32>
    %cst_6 = arith.constant 3.200000e+01 : f32
    %10 = vector.broadcast %cst_6 : f32 to vector<256x1xf32>
    %11 = arith.divf %9, %10 : vector<256x1xf32>
    %12 = vector.broadcast %11 : vector<256x1xf32> to vector<256x32xf32>
    %13 = arith.subf %7, %12 : vector<256x32xf32>
    %14 = arith.mulf %13, %13 : vector<256x32xf32>
    %cst_7 = arith.constant dense<0.000000e+00> : vector<256xf32>
    %15 = vector.multi_reduction <add>, %14, %cst_7 [1] : vector<256x32xf32> to vector<256xf32>
    %16 = vector.shape_cast %15 : vector<256xf32> to vector<256x1xf32>
    %cst_8 = arith.constant 3.200000e+01 : f32
    %17 = vector.broadcast %cst_8 : f32 to vector<256x1xf32>
    %18 = arith.divf %16, %17 : vector<256x1xf32>
    %19 = vector.broadcast %11 : vector<256x1xf32> to vector<256x32xf32>
    %20 = arith.subf %7, %19 : vector<256x32xf32>
    %cst_9 = arith.constant 9.99999974E-6 : f32
    %21 = vector.broadcast %cst_9 : f32 to vector<256x1xf32>
    %22 = arith.addf %18, %21 : vector<256x1xf32>
    %23 = math.rsqrt %22 : vector<256x1xf32>
    %24 = vector.broadcast %23 : vector<256x1xf32> to vector<256x32xf32>
    %25 = arith.mulf %20, %24 : vector<256x32xf32>
    %c0_10 = arith.constant 0 : index
    %c0_11 = arith.constant 0 : index
    %26 = vector.load %arg4[%c0_10, %c0_11] : memref<1x32xf32, #tpu.memory_space<vmem>>, vector<1x32xf32>
    %27 = vector.broadcast %26 : vector<1x32xf32> to vector<256x32xf32>
    %28 = arith.mulf %25, %27 : vector<256x32xf32>
    %c0_12 = arith.constant 0 : index
    %c0_13 = arith.constant 0 : index
    %29 = vector.load %arg5[%c0_12, %c0_13] : memref<1x32xf32, #tpu.memory_space<vmem>>, vector<1x32xf32>
    %30 = vector.broadcast %29 : vector<1x32xf32> to vector<256x32xf32>
    %31 = arith.addf %28, %30 : vector<256x32xf32>
    %cst_14 = arith.constant 0.000000e+00 : f32
    %32 = vector.broadcast %cst_14 : f32 to vector<256x32xf32>
    %33 = arith.maximumf %31, %32 : vector<256x32xf32>
    %34 = arith.truncf %33 : vector<256x32xf32> to vector<256x32xbf16>
    %c0_15 = arith.constant 0 : index
    %c0_16 = arith.constant 0 : index
    %35 = vector.load %arg6[%c0_15, %c0_16] : memref<32x16xf32, #tpu.memory_space<vmem>>, vector<32x16xf32>
    %36 = arith.truncf %35 : vector<32x16xf32> to vector<32x16xbf16>
    %cst_17 = arith.constant dense<0.000000e+00> : vector<256x16xf32>
    %37 = tpu.matmul %34, %36, %cst_17 {dimension_numbers = #tpu.dot_dimension_numbers<[1], [0], [0], [1], [0, 0, 1, 1], [], []>} : vector<256x32xbf16>, vector<32x16xbf16>, vector<256x16xf32> -> vector<256x16xf32>
    %c0_18 = arith.constant 0 : index
    %c0_19 = arith.constant 0 : index
    %38 = vector.load %arg7[%c0_18, %c0_19] : memref<1x16xf32, #tpu.memory_space<vmem>>, vector<1x16xf32>
    %39 = vector.broadcast %38 : vector<1x16xf32> to vector<256x16xf32>
    %40 = arith.addf %37, %39 : vector<256x16xf32>
    %c0_20 = arith.constant 0 : index
    %c0_21 = arith.constant 0 : index
    %41 = vector.load %arg8[%c0_20, %c0_21] : memref<44x32xf32, #tpu.memory_space<vmem>>, vector<44x32xf32>
    %42 = arith.truncf %41 : vector<44x32xf32> to vector<44x32xbf16>
    %cst_22 = arith.constant dense<0.000000e+00> : vector<256x32xf32>
    %43 = tpu.matmul %1, %42, %cst_22 {dimension_numbers = #tpu.dot_dimension_numbers<[1], [0], [0], [1], [0, 0, 1, 1], [], []>} : vector<256x44xbf16>, vector<44x32xbf16>, vector<256x32xf32> -> vector<256x32xf32>
    %c0_23 = arith.constant 0 : index
    %c0_24 = arith.constant 0 : index
    %44 = vector.load %arg9[%c0_23, %c0_24] : memref<1x32xf32, #tpu.memory_space<vmem>>, vector<1x32xf32>
    %45 = vector.broadcast %44 : vector<1x32xf32> to vector<256x32xf32>
    %46 = arith.addf %43, %45 : vector<256x32xf32>
    %cst_25 = arith.constant dense<0.000000e+00> : vector<256xf32>
    %47 = vector.multi_reduction <add>, %46, %cst_25 [1] : vector<256x32xf32> to vector<256xf32>
    %48 = vector.shape_cast %47 : vector<256xf32> to vector<256x1xf32>
    %cst_26 = arith.constant 3.200000e+01 : f32
    %49 = vector.broadcast %cst_26 : f32 to vector<256x1xf32>
    %50 = arith.divf %48, %49 : vector<256x1xf32>
    %51 = vector.broadcast %50 : vector<256x1xf32> to vector<256x32xf32>
    %52 = arith.subf %46, %51 : vector<256x32xf32>
    %53 = arith.mulf %52, %52 : vector<256x32xf32>
    %cst_27 = arith.constant dense<0.000000e+00> : vector<256xf32>
    %54 = vector.multi_reduction <add>, %53, %cst_27 [1] : vector<256x32xf32> to vector<256xf32>
    %55 = vector.shape_cast %54 : vector<256xf32> to vector<256x1xf32>
    %cst_28 = arith.constant 3.200000e+01 : f32
    %56 = vector.broadcast %cst_28 : f32 to vector<256x1xf32>
    %57 = arith.divf %55, %56 : vector<256x1xf32>
    %58 = vector.broadcast %50 : vector<256x1xf32> to vector<256x32xf32>
    %59 = arith.subf %46, %58 : vector<256x32xf32>
    %cst_29 = arith.constant 9.99999974E-6 : f32
    %60 = vector.broadcast %cst_29 : f32 to vector<256x1xf32>
    %61 = arith.addf %57, %60 : vector<256x1xf32>
    %62 = math.rsqrt %61 : vector<256x1xf32>
    %63 = vector.broadcast %62 : vector<256x1xf32> to vector<256x32xf32>
    %64 = arith.mulf %59, %63 : vector<256x32xf32>
    %c0_30 = arith.constant 0 : index
    %c0_31 = arith.constant 0 : index
    %65 = vector.load %arg10[%c0_30, %c0_31] : memref<1x32xf32, #tpu.memory_space<vmem>>, vector<1x32xf32>
    %66 = vector.broadcast %65 : vector<1x32xf32> to vector<256x32xf32>
    %67 = arith.mulf %64, %66 : vector<256x32xf32>
    %c0_32 = arith.constant 0 : index
    %c0_33 = arith.constant 0 : index
    %68 = vector.load %arg11[%c0_32, %c0_33] : memref<1x32xf32, #tpu.memory_space<vmem>>, vector<1x32xf32>
    %69 = vector.broadcast %68 : vector<1x32xf32> to vector<256x32xf32>
    %70 = arith.addf %67, %69 : vector<256x32xf32>
    %cst_34 = arith.constant 0.000000e+00 : f32
    %71 = vector.broadcast %cst_34 : f32 to vector<256x32xf32>
    %72 = arith.maximumf %70, %71 : vector<256x32xf32>
    %73 = arith.truncf %72 : vector<256x32xf32> to vector<256x32xbf16>
    %c0_35 = arith.constant 0 : index
    %c0_36 = arith.constant 0 : index
    %74 = vector.load %arg12[%c0_35, %c0_36] : memref<32x4xf32, #tpu.memory_space<vmem>>, vector<32x4xf32>
    %75 = arith.truncf %74 : vector<32x4xf32> to vector<32x4xbf16>
    %cst_37 = arith.constant dense<0.000000e+00> : vector<256x4xf32>
    %76 = tpu.matmul %73, %75, %cst_37 {dimension_numbers = #tpu.dot_dimension_numbers<[1], [0], [0], [1], [0, 0, 1, 1], [], []>} : vector<256x32xbf16>, vector<32x4xbf16>, vector<256x4xf32> -> vector<256x4xf32>
    %c0_38 = arith.constant 0 : index
    %c0_39 = arith.constant 0 : index
    %77 = vector.load %arg13[%c0_38, %c0_39] : memref<1x4xf32, #tpu.memory_space<vmem>>, vector<1x4xf32>
    %78 = vector.broadcast %77 : vector<1x4xf32> to vector<256x4xf32>
    %79 = arith.addf %76, %78 : vector<256x4xf32>
    %c0_40 = arith.constant 0 : index
    %c0_41 = arith.constant 0 : index
    %80 = vector.load %arg14[%c0_40, %c0_41] : memref<44x1xf32, #tpu.memory_space<vmem>>, vector<44x1xf32>
    %81 = arith.truncf %80 : vector<44x1xf32> to vector<44x1xbf16>
    %cst_42 = arith.constant dense<0.000000e+00> : vector<256x1xf32>
    %82 = tpu.matmul %1, %81, %cst_42 {dimension_numbers = #tpu.dot_dimension_numbers<[1], [0], [0], [1], [0, 0, 1, 1], [], []>} : vector<256x44xbf16>, vector<44x1xbf16>, vector<256x1xf32> -> vector<256x1xf32>
    %c0_43 = arith.constant 0 : index
    %c0_44 = arith.constant 0 : index
    %83 = vector.load %arg15[%c0_43, %c0_44] : memref<1x1xf32, #tpu.memory_space<vmem>>, vector<1x1xf32>
    %84 = vector.broadcast %83 : vector<1x1xf32> to vector<256x1xf32>
    %85 = arith.addf %82, %84 : vector<256x1xf32>
    %86 = arith.negf %85 : vector<256x1xf32>
    %87 = math.exp %86 : vector<256x1xf32>
    %cst_45 = arith.constant 1.000000e+00 : f32
    %88 = vector.broadcast %cst_45 : f32 to vector<256x1xf32>
    %89 = arith.addf %88, %87 : vector<256x1xf32>
    %90 = arith.divf %88, %89 : vector<256x1xf32>
    %91 = vector.broadcast %90 : vector<256x1xf32> to vector<256x4xf32>
    %92 = arith.mulf %79, %91 : vector<256x4xf32>
    %cst_46 = arith.constant 0.000000e+00 : f32
    %93 = vector.broadcast %cst_46 : f32 to vector<256x108xf32>
    %94 = tpu.concatenate %40, %92, %93 in 1 : vector<256x16xf32>, vector<256x4xf32>, vector<256x108xf32> -> vector<256x128xf32>
    %c0_47 = arith.constant 0 : index
    %c0_48 = arith.constant 0 : index
    %95 = vector.load %arg16[%c0_47, %c0_48] : memref<256x128xf32, #tpu.memory_space<vmem>>, vector<256x128xf32>
    tpu.vector_store %arg16[%c0_47, %c0_48], %94 {strides = array<i32>} : memref<256x128xf32, #tpu.memory_space<vmem>>, vector<256x128xf32>,
    return
  }
  func.func @transform_0(%arg0: i32) -> (i32, i32) {
    %c0_i32 = arith.constant 0 : i32
    %c0_i32_0 = arith.constant 0 : i32
    return %arg0, %c0_i32 : i32, i32
  }
  func.func @transform_1(%arg0: i32) -> (i32, i32) {
    %c0_i32 = arith.constant 0 : i32
    %c0_i32_0 = arith.constant 0 : i32
    %c0_i32_1 = arith.constant 0 : i32
    return %c0_i32, %c0_i32_0 : i32, i32
  }
  func.func @transform_2(%arg0: i32) -> (i32, i32) {
    %c0_i32 = arith.constant 0 : i32
    %c0_i32_0 = arith.constant 0 : i32
    %c0_i32_1 = arith.constant 0 : i32
    return %c0_i32, %c0_i32_0 : i32, i32
  }
  func.func @transform_3(%arg0: i32) -> (i32, i32) {
    %c0_i32 = arith.constant 0 : i32
    %c0_i32_0 = arith.constant 0 : i32
    %c0_i32_1 = arith.constant 0 : i32
    return %c0_i32, %c0_i32_0 : i32, i32
  }
  func.func @transform_4(%arg0: i32) -> (i32, i32) {
    %c0_i32 = arith.constant 0 : i32
    %c0_i32_0 = arith.constant 0 : i32
    %c0_i32_1 = arith.constant 0 : i32
    return %c0_i32, %c0_i32_0 : i32, i32
  }
  func.func @transform_5(%arg0: i32) -> (i32, i32) {
    %c0_i32 = arith.constant 0 : i32
    %c0_i32_0 = arith.constant 0 : i32
    %c0_i32_1 = arith.constant 0 : i32
    return %c0_i32, %c0_i32_0 : i32, i32
  }
  func.func @transform_6(%arg0: i32) -> (i32, i32) {
    %c0_i32 = arith.constant 0 : i32
    %c0_i32_0 = arith.constant 0 : i32
    %c0_i32_1 = arith.constant 0 : i32
    return %c0_i32, %c0_i32_0 : i32, i32
  }
  func.func @transform_7(%arg0: i32) -> (i32, i32) {
    %c0_i32 = arith.constant 0 : i32
    %c0_i32_0 = arith.constant 0 : i32
    %c0_i32_1 = arith.constant 0 : i32
    return %c0_i32, %c0_i32_0 : i32, i32
  }
  func.func @transform_8(%arg0: i32) -> (i32, i32) {
    %c0_i32 = arith.constant 0 : i32
    %c0_i32_0 = arith.constant 0 : i32
    %c0_i32_1 = arith.constant 0 : i32
    return %c0_i32, %c0_i32_0 : i32, i32
  }
  func.func @transform_9(%arg0: i32) -> (i32, i32) {
    %c0_i32 = arith.constant 0 : i32
    %c0_i32_0 = arith.constant 0 : i32
    %c0_i32_1 = arith.constant 0 : i32
    return %c0_i32, %c0_i32_0 : i32, i32
  }
  func.func @transform_10(%arg0: i32) -> (i32, i32) {
    %c0_i32 = arith.constant 0 : i32
    %c0_i32_0 = arith.constant 0 : i32
    %c0_i32_1 = arith.constant 0 : i32
    return %c0_i32, %c0_i32_0 : i32, i32
  }
  func.func @transform_11(%arg0: i32) -> (i32, i32) {
    %c0_i32 = arith.constant 0 : i32
    %c0_i32_0 = arith.constant 0 : i32
    %c0_i32_1 = arith.constant 0 : i32
    return %c0_i32, %c0_i32_0 : i32, i32
  }
  func.func @transform_12(%arg0: i32) -> (i32, i32) {
    %c0_i32 = arith.constant 0 : i32
    %c0_i32_0 = arith.constant 0 : i32
    %c0_i32_1 = arith.constant 0 : i32
    return %c0_i32, %c0_i32_0 : i32, i32
  }
  func.func @transform_13(%arg0: i32) -> (i32, i32) {
    %c0_i32 = arith.constant 0 : i32
    %c0_i32_0 = arith.constant 0 : i32
    %c0_i32_1 = arith.constant 0 : i32
    return %c0_i32, %c0_i32_0 : i32, i32
  }
  func.func @transform_14(%arg0: i32) -> (i32, i32) {
    %c0_i32 = arith.constant 0 : i32
    %c0_i32_0 = arith.constant 0 : i32
    %c0_i32_1 = arith.constant 0 : i32
    return %c0_i32, %c0_i32_0 : i32, i32
  }
  func.func @transform_15(%arg0: i32) -> (i32, i32) {
    %c0_i32 = arith.constant 0 : i32
    %c0_i32_0 = arith.constant 0 : i32
    return %arg0, %c0_i32 : i32, i32
  }
}

</mosaic_0001>

<bundles_post_ra>
// kernel: tpu_custom_call.1
= control target key start
LH: loop header
LB: loop body
LE: loop exit
PB: predicated region body
PF: predicated region fallthrough
CT: control target
= control target key end

     0   :  { %s8092_s0 = inlined_call_operand.vmem [shape: f32[512,44], index: 0, kind: input, shape index: {}]   ;;  %s8093_s1 = inlined_call_operand.vmem [shape: f32[44,32], index: 1, kind: input, shape index: {}]   ;;  %s8094_s2 = inlined_call_operand.vmem [shape: f32[1,32], index: 2, kind: input, shape index: {}]   ;;  %s8095_s3 = inlined_call_operand.vmem [shape: f32[1,32], index: 3, kind: input, shape index: {}]   ;;  %s8096_s4 = inlined_call_operand.vmem [shape: f32[1,32], index: 4, kind: input, shape index: {}]   ;;  %s8097_s5 = inlined_call_operand.vmem [shape: f32[32,16], index: 5, kind: input, shape index: {}]   ;;  %s8098_s6 = inlined_call_operand.vmem [shape: f32[1,16], index: 6, kind: input, shape index: {}]   ;;  %s8099_s7 = inlined_call_operand.vmem [shape: f32[44,32], index: 7, kind: input, shape index: {}]   ;;  %s8100_s8 = inlined_call_operand.vmem [shape: f32[1,32], index: 8, kind: input, shape index: {}]   ;;  %s8101_s9 = inlined_call_operand.vmem [shape: f32[1,32], index: 9, kind: input, shape index: {}]   ;;  %s8102_s10 = inlined_call_operand.vmem [shape: f32[1,32], index: 10, kind: input, shape index: {}]   ;;  %s8103_s11 = inlined_call_operand.vmem [shape: f32[32,4], index: 11, kind: input, shape index: {}]   ;;  %s8104_s12 = inlined_call_operand.vmem [shape: f32[1,4], index: 12, kind: input, shape index: {}]   ;;  %s8105_s13 = inlined_call_operand.vmem [shape: f32[44,1], index: 13, kind: input, shape index: {}]   ;;  %s8106_s14 = inlined_call_operand.<no memory space> [shape: f32[1,1], index: 14, kind: input, shape index: {}]   ;;  %s8107_s15 = inlined_call_operand.hbm [shape: f32[512,128], index: 15, kind: output, shape index: {}]  }
   0x1   :  { %8131 = sst [smem:[#allocation32_spill]] %s8092_s0  ;;  %v20_v0 = vstv %s8106_s14 }
   0x2   :  { %21 = vst [vmem:[#allocation2] sm:$0x1] %v20_v0 }
   0x3   :  { %22 = vsyncpa [#allocation4], 0 }
   0x4   :  { %24 = vsyncpa [#allocation4 + $0x1], 0  ;;  %s4576_s20 = smov 0   ;;  %s4578_s21 = smov 0  }
   0x5   :  { %s4580_s22 = smov 0   ;;  %s4582_s23 = smov 0  }
   0x6 LB: > { %8132 = sst [smem:[#allocation6_spill]] %s4482_s22  ;;  %s4597_s14 = sadd.s32 4294967295, %s4486_s23   ;;  %s4486_s23 = sphi %s4582_s23, %s8351_s23   ;;  %s4482_s22 = sphi %s4580_s22, %s8353_s22   ;;  %s4478_s21 = sphi %s4578_s21, %s8355_s21   ;;  %s4474_s20 = sphi %s4576_s20, %s8354_s20  }
   0x7   : > { %s3966_s24 = sadd.s32 4294967294, %s4486_s23   ;;  %s4601_s25 = sadd.s32 1, %s4486_s23  }
   0x8   : > { %8133 = sst [smem:[#allocation7_spill]] %s4601_s25  ;;  %s357_s26 = sadd.s32 1, %s4482_s22 }
   0x9   : > { %s354_s27 = ssub.s32 %s4486_s23, %s4601_s25  ;;  %p367_p0 = scmp.ne.s32.totalorder %s4482_s22, %s4478_s21 }
   0xa   : > { %p355_p1 = scmp.eq.s32.totalorder %s354_s27, 0  ;;  %p368_p2 = scmp.eq.s32.totalorder %s4597_s14, 1 }
   0xb   : > { %p373_p3 = scmp.ne.s32.totalorder %s4478_s21, %s4474_s20  ;;  %p374_p4 = scmp.eq.s32.totalorder %s3966_s24, 1 }
   0xc   : > { %s4612_s28 = scalar_select %p355_p1, %s4482_s22, %s357_s26  }
   0xd   : > { %p4614_p5 = por %p368_p2, %p367_p0  ;;  %p4618_p6 = por %p374_p4, %p373_p3 }
   0xe   : > { %8134 = sst [smem:[#allocation8_spill]] %s4612_s28  ;;  %p3969_p7 = scmp.ge.s32.totalorder %s4486_s23, 1 }
   0xf   : > { %p443_p8 = scmp.lt.s32.totalorder %s4486_s23, 3 }
  0x11   : > { %p444_p9 = pnand %p3969_p7, %p443_p8 }
  0x13   : > { %447 = sbr.rel (%p444_p9) target bundleno = 1641 (0x669), region = 80 }
  0x18   : > { %v551_v1 = vld [vmem:[%s8093_s1 + $0x20] sm:$0xff]  ;;  %v552_v2 = vld [vmem:[%s8093_s1 + $0x28] sm:$0xf]  ;;  %vm609_vm0 = vcmask 1045504   ;;  %s3971_s24 = sshll.u32 %s4597_s14, 5  ;;  %v549_v4 = vld [vmem:[%s8093_s1 + $0x10] sm:$0xff] }
  0x19   : > { %v555_v3 = vpack.c.bf16 %v552_v2, %v551_v1  ;;  %v550_v5 = vld [vmem:[%s8093_s1 + $0x18] sm:$0xff]  ;;  %p492_p10 = scmp.lt.s32.totalorder %s3971_s24, 63  ;;  %v547_v8 = vld [vmem:[%s8093_s1] sm:$0xff]  ;;  %v548_v9 = vld [vmem:[%s8093_s1 + $0x8] sm:$0xff]  ;;  %s8137_s0 = sld [smem:[#allocation32_spill]]  ;;  %vm560_vm1 = vcmask 359424  }
  0x1a   : > { %v554_v7 = vpack.c.bf16 %v550_v5, %v549_v4  ;;  %v553_v10 = vpack.c.bf16 %v548_v9, %v547_v8  ;;  %v4702_v37 = vld [vmem:[%s8094_s2] ss:$0 sm:$0xff]  ;;  %vm702_vm2 = vcmask 261120   ;;  %s4490_s17 = smov 16   ;;  %s488_s18 = sand.u32 1, %s4478_s21  }
  0x1b   : > { %v611_v6 = vsel %vm609_vm0, %v555_v3, 0  ;;  %s8357_s24 = smov (!%p492_p10, %s3971_s24), 63  ;;  %s3970_s27 = sshll.u32 %s488_s18, 8 }
  0x1c   : > { %618 = vmatpush.bf16.msra.mxu0 %v611_v6  ;;  %4091 = vmatpush.bf16.msra.mxu2 %v611_v6  ;;  %s3972_s26 = sshll.u32 %s8357_s24, 3  ;;  %s4090_s24 = sshll.u32 %s4597_s14, 8 }
  0x1d   : > { %s3900_s19 = scalar_lea.hbm %s8107_s15, %s4090_s24  ;;  %s3889_s14 = scalar_lea.sflag [#allocation4], %s488_s18 }
  0x1f   : > { %s4647_s22 = scalar_lea.vmem %s8137_s0, %s3972_s26 }
  0x20   : > { %619 = vmatpush.bf16.msra.mxu0 %v554_v7  ;;  %v499_v11 = vld [vmem:[%s4647_s22] sm:$0xff]  ;;  %v500_v12 = vld [vmem:[%s4647_s22 + $0x8] sm:$0xff]  ;;  %4092 = vmatpush.bf16.msra.mxu2 %v554_v7  ;;  %v501_v14 = vld [vmem:[%s4647_s22 + $0x10] sm:$0xff] }
  0x21   : > { %v4651_v13 = vpack.c.bf16 %v500_v12, %v499_v11  ;;  %v502_v15 = vld [vmem:[%s4647_s22 + $0x18] sm:$0xff]  ;;  %v503_v17 = vld [vmem:[%s4647_s22 + $0x20] sm:$0xff]  ;;  %v504_v18 = vld [vmem:[%s4647_s22 + $0x28] sm:$0xff] }
  0x22   : > { %v4657_v16 = vpack.c.bf16 %v502_v15, %v501_v14  ;;  %v4663_v19 = vpack.c.bf16 %v504_v18, %v503_v17  ;;  %v505_v20 = vld [vmem:[%s4647_s22 + $0x30] sm:$0xff]  ;;  %v506_v21 = vld [vmem:[%s4647_s22 + $0x38] sm:$0xff]  ;;  %v507_v23 = vld [vmem:[%s4647_s22 + $0x40] sm:$0xff] }
  0x23   : > { %8138 = vst [vmem:[#allocation9_spill] sm:$0xff] %v4651_v13  ;;  %v4669_v22 = vpack.c.bf16 %v506_v21, %v505_v20  ;;  %v508_v24 = vld [vmem:[%s4647_s22 + $0x48] sm:$0xff]  ;;  %v509_v26 = vld [vmem:[%s4647_s22 + $0x50] sm:$0xff]  ;;  %v510_v27 = vld [vmem:[%s4647_s22 + $0x58] sm:$0xff] }
  0x24   : > { %620 = vmatpush.bf16.msra.mxu0 %v553_v10  ;;  %4093 = vmatpush.bf16.msra.mxu2 %v553_v10  ;;  %8139 = vst [vmem:[#allocation10_spill] sm:$0xff] %v4657_v16  ;;  %v4675_v25 = vpack.c.bf16 %v508_v24, %v507_v23  ;;  %v4681_v28 = vpack.c.bf16 %v510_v27, %v509_v26  ;;  %v511_v29 = vld [vmem:[%s4647_s22 + $0x60] sm:$0xff]  ;;  %v512_v30 = vld [vmem:[%s4647_s22 + $0x68] sm:$0xff]  ;;  %v513_v32 = vld [vmem:[%s4647_s22 + $0x70] sm:$0xff] }
  0x25   : > { %8140 = vst [vmem:[#allocation11_spill] sm:$0xff] %v4663_v19  ;;  %v4687_v31 = vpack.c.bf16 %v512_v30, %v511_v29  ;;  %v514_v33 = vld [vmem:[%s4647_s22 + $0x78] sm:$0xff]  ;;  %v515_v35 = vld [vmem:[%s4647_s22 + $0x80] sm:$0xff]  ;;  %v516_v36 = vld [vmem:[%s4647_s22 + $0x88] sm:$0xff] }
  0x26   : > { %8141 = vst [vmem:[#allocation12_spill] sm:$0xff] %v4669_v22  ;;  %v4693_v34 = vpack.c.bf16 %v514_v33, %v513_v32  ;;  %v4704_v38 = vpack.c.bf16 %v516_v36, %v515_v35  ;;  %v517_v45 = vld [vmem:[%s4647_s22 + $0x90] sm:$0xff]  ;;  %v518_v46 = vld [vmem:[%s4647_s22 + $0x98] sm:$0xff]  ;;  %v519_v52 = vld [vmem:[%s4647_s22 + $0xa0] sm:$0xff] }
  0x27   : > { %3973 = vmatmul.msk.bf16.vlgmr.msra.gmra.mxu0 %vm560_vm1, %v4651_v13  ;;  %8142 = vst [vmem:[#allocation13_spill] sm:$0xff] %v4675_v25  ;;  %v4720_v47 = vpack.c.bf16 %v518_v46, %v517_v45  ;;  %v520_v53 = vld [vmem:[%s4647_s22 + $0xa8] sm:$0xff]  ;;  %v521_v57 = vld [vmem:[%s4647_s22 + $0xb0] sm:$0xff]  ;;  %v522_v58 = vld [vmem:[%s4647_s22 + $0xb8] sm:$0xff] }
  0x28   : > { %8143 = vst [vmem:[#allocation14_spill] sm:$0xff] %v4681_v28  ;;  %v4731_v54 = vpack.c.bf16 %v520_v53, %v519_v52  ;;  %v4737_v59 = vpack.c.bf16 %v522_v58, %v521_v57  ;;  %v523_v1 = vld [vmem:[%s4647_s22 + $0xc0] sm:$0xff]  ;;  %v524_v2 = vld [vmem:[%s4647_s22 + $0xc8] sm:$0xff]  ;;  %v525_v8 = vld [vmem:[%s4647_s22 + $0xd0] sm:$0xff] }
  0x29   : > { %8144 = vst [vmem:[#allocation15_spill] sm:$0xff] %v4687_v31  ;;  %v4749_v3 = vpack.c.bf16 %v524_v2, %v523_v1  ;;  %v526_v9 = vld [vmem:[%s4647_s22 + $0xd8] sm:$0xff]  ;;  %v527_v23 = vld [vmem:[%s4647_s22 + $0xe0] sm:$0xff]  ;;  %v528_v24 = vld [vmem:[%s4647_s22 + $0xe8] sm:$0xff] }
  0x2a   : > { %8145 = vst [vmem:[#allocation16_spill] sm:$0xff] %v4693_v34  ;;  %v4762_v10 = vpack.c.bf16 %v526_v9, %v525_v8  ;;  %v4783_v26 = vpack.c.bf16 %v528_v24, %v527_v23  ;;  %v1685_v23 = vld [vmem:[%s8099_s7 + $0x20] sm:$0xff]  ;;  %v1686_v24 = vld [vmem:[%s8099_s7 + $0x28] sm:$0xf] }
  0x2b   : > { %8146 = vst [vmem:[#allocation17_spill] sm:$0xff] %v4704_v38 }
  0x2c   : > { %8147 = vst [vmem:[#allocation18_spill] sm:$0xff] %v4720_v47  ;;  %3987 = vmatmul.msk.bf16.vlgmr.msra.gmra.mxu2 %vm560_vm1, %v4783_v26 }
  0x2d   : > { %8148 = vst [vmem:[#allocation19_spill] sm:$0xff] %v4731_v54 }
  0x2e   : > { %8149 = vst [vmem:[#allocation20_spill] sm:$0xff] %v4749_v3 }
  0x2f   : > { %8150 = vst [vmem:[#allocation21_spill] sm:$0xff] %v4762_v10 }
  0x30   : > { %8151 = vst [vmem:[#allocation22_spill] sm:$0xff] %v4783_v26 }
  0x37   : > { %3974 = vmatmul.msk.bf16.gmra.mxu0 %vm560_vm1, %v4657_v16 }
  0x47   : > { %3975 = vmatmul.msk.bf16.gmra.mxu0 %vm560_vm1, %v4663_v19 }
  0x57   : > { %3976 = vmatmul.msk.bf16.gmra.mxu0 %vm560_vm1, %v4669_v22 }
  0x67   : > { %3977 = vmatmul.msk.bf16.gmra.mxu0 %vm560_vm1, %v4675_v25 }
  0x77   : > { %3978 = vmatmul.msk.bf16.gmra.mxu0 %vm560_vm1, %v4681_v28 }
  0x87   : > { %3979 = vmatmul.msk.bf16.gmra.mxu0 %vm560_vm1, %v4687_v31 }
  0x97   : > { %3980 = vmatmul.msk.bf16.gmra.mxu0 %vm560_vm1, %v4693_v34 }
  0xa4   : > { %v622_v39 = vpop.f32.mrf.mxu0 }
  0xa5   : > { %v4707_v40 = vadd.f32 %v4702_v37, %v622_v39 }
  0xa7   : > { %3981 = vmatmul.msk.bf16.gmra.mxu0 %vm560_vm1, %v4704_v38  ;;  %v703_v41 = vsel %vm702_vm2, %v4707_v40, 0.0 }
  0xa8   : > { %704 = vadd.xlane.f32.xlu1 %v703_v41 }
  0xac   : > { %v624_v42 = vpop.f32.mrf.mxu0 }
  0xad   : > { %v4714_v43 = vadd.f32 %v4702_v37, %v624_v42 }
  0xaf   : > { %v706_v44 = vsel %vm702_vm2, %v4714_v43, 0.0 }
  0xb0   : > { %707 = vadd.xlane.f32.xlu1 %v706_v44 }
  0xb4   : > { %v627_v48 = vpop.f32.mrf.mxu0 }
  0xb5   : > { %v4772_v15 = vadd.f32 %v4702_v37, %v627_v48 }
  0xb7   : > { %3982 = vmatmul.msk.bf16.gmra.mxu0 %vm560_vm1, %v4720_v47  ;;  %v709_v21 = vsel %vm702_vm2, %v4772_v15, 0.0 }
  0xbc   : > { %v629_v49 = vpop.f32.mrf.mxu0 }
  0xbd   : > { %v4725_v50 = vadd.f32 %v4702_v37, %v629_v49 }
  0xbf   : > { %v712_v51 = vsel %vm702_vm2, %v4725_v50, 0.0 }
  0xc0   : > { %713 = vadd.xlane.f32.xlu1 %v712_v51 }
  0xc4   : > { %v632_v55 = vpop.f32.mrf.mxu0 }
  0xc5   : > { %v4798_v35 = vadd.f32 %v4702_v37, %v632_v55 }
  0xc7   : > { %3983 = vmatmul.msk.bf16.gmra.mxu0 %vm560_vm1, %v4731_v54  ;;  %v715_v41 = vsel %vm702_vm2, %v4798_v35, 0.0 }
  0xcc   : > { %v634_v56 = vpop.f32.mrf.mxu0 }
  0xcd   : > { %v4808_v44 = vadd.f32 %v4702_v37, %v634_v56 }
  0xcf   : > { %8153 = vst [vmem:[#allocation24_spill] sm:$0xff] %v4808_v44  ;;  %v718_v48 = vsel %vm702_vm2, %v4808_v44, 0.0 }
  0xd4   : > { %v637_v60 = vpop.f32.mrf.mxu0 }
  0xd5   : > { %v4786_v27 = vadd.f32 %v4702_v37, %v637_v60 }
  0xd7   : > { %3984 = vmatmul.msk.bf16.gmra.mxu0 %vm560_vm1, %v4737_v59  ;;  %8152 = vst [vmem:[#allocation23_spill] sm:$0xff] %v4786_v27  ;;  %v721_v33 = vsel %vm702_vm2, %v4786_v27, 0.0 }
  0xdc   : > { %v639_v61 = vpop.f32.mrf.mxu0 }
  0xdd   : > { %v4818_v51 = vadd.f32 %v4702_v37, %v639_v61 }
  0xdf   : > { %8154 = vst [vmem:[#allocation25_spill] sm:$0xff] %v4818_v51  ;;  %v724_v53 = vsel %vm702_vm2, %v4818_v51, 0.0 }
  0xe4   : > { %v4741_v62 = vpop.f32.mrf.mxu0 }
  0xe7   : > { %3985 = vmatmul.msk.bf16.gmra.mxu0 %vm560_vm1, %v4749_v3 }
  0xec   : > { %v4743_v63 = vpop.f32.mrf.mxu0 }
  0xf4   : > { %v4745_v0 = vpop.f32.mrf.mxu0 }
  0xf7   : > { %3986 = vmatmul.msk.bf16.gmra.mxu0 %vm560_vm1, %v4762_v10 }
  0xfc   : > { %v4753_v4 = vpop.f32.mrf.mxu0 }
 0x104   : > { %v652_v5 = vpop.f32.mrf.mxu0 }
 0x105   : > { %v4756_v6 = vadd.f32 %v4702_v37, %v652_v5  ;;  %v4488_v5 = vmov 32.0  }
 0x106   : > { %4154 = vrcp.f32 %v4488_v5 }
 0x107   : > { %v739_v7 = vsel %vm702_vm2, %v4756_v6, 0.0 }
 0x108   : > { %740 = vadd.xlane.f32.xlu0 %v739_v7 }
 0x10c   : > { %v654_v11 = vpop.f32.mrf.mxu0  ;;  %v4155_v7 = vpop.eup %4154 }
 0x10d   : > { %v4767_v12 = vadd.f32 %v4702_v37, %v654_v11  ;;  %v800_v8 = vmul.f32 32.0, %v4155_v7  ;;  %vm804_vm3 = vweird.f32 %v4155_v7 }
 0x10f   : > { %v742_v14 = vsel %vm702_vm2, %v4767_v12, 0.0  ;;  %v801_v9 = vsub.f32 1.0, %v800_v8 }
 0x110   : > { %743 = vadd.xlane.f32.xlu0 %v742_v14  ;;  %v529_v14 = vld [vmem:[%s4647_s22 + $0xf0] sm:$0xff] }
 0x111   : > { %v802_v11 = vmul.f32 %v4155_v7, %v801_v9 }
 0x114   : > { %v657_v17 = vpop.f32.mrf.mxu0 }
 0x115   : > { %v4775_v18 = vadd.f32 %v4702_v37, %v657_v17  ;;  %v530_v17 = vld [vmem:[%s4647_s22 + $0xf8] sm:$0xff]  ;;  %s7860_s22 = scalar_lea.vmem [#allocation3], %s3970_s27  ;;  %s3903_s27 = sshll.u32 %s3900_s19, 4  ;;  %s3904_s27 = int_to_ptr.hbm [resolvable:$true] %s3903_s27 }
 0x116   : > { %s3901_s26 = sshll.u32 %s7860_s22, 4  ;;  %s4438_s25 = sshra.s32 %s3904_s27, 4  ;;  %s3902_s26 = int_to_ptr.vmem [resolvable:$true] %s3901_s26  ;;  %s4439_s25 = int_to_ptr.hbm [resolvable:$true] %s4438_s25 }
 0x117   : > { %v745_v20 = vsel %vm702_vm2, %v4775_v18, 0.0  ;;  %s4440_s28 = scalar_lea.hbm %s4439_s25, 256  ;;  %p4445_p0 = scmp.lt.s32.totalorder %s4439_s25, %s8107_s15 }
 0x118   : > { %746 = vadd.xlane.f32.xlu2 %v745_v20  ;;  %710 = vadd.xlane.f32.xlu0 %v709_v21  ;;  %v4838_v20 = vpack.c.bf16 %v530_v17, %v529_v14  ;;  %v803_v21 = vadd.f32 %v4155_v7, %v802_v11  ;;  %p4441_p11 = scmp.ne.s32.totalorder %s4439_s25, %s4440_s28 }
 0x11a   : > { %8155 = vst [vmem:[#allocation26_spill] sm:$0xff] %v4838_v20  ;;  %3988 = vmatmul.msk.bf16.gmra.mxu2 %vm560_vm1, %v4838_v20  ;;  %p4442_p12 = pnand %p4441_p11, %p4614_p5 }
 0x11b   : > { %v4877_v11 = vpop.xlane.xlu1 %704 }
 0x11c   : > { %v659_v29 = vpop.f32.mrf.mxu0  ;;  %p4443_p13 = pneg %p4442_p12 }
 0x11d   : > { %v4791_v30 = vadd.f32 %v4702_v37, %v659_v29  ;;  %v1689_v29 = vpack.c.bf16 %v1686_v24, %v1685_v23 }
 0x11f   : > { %v748_v32 = vsel %vm702_vm2, %v4791_v30, 0.0 }
 0x120   : > { %749 = vadd.xlane.f32.xlu2 %v748_v32  ;;  %722 = vadd.xlane.f32.xlu0 %v721_v33  ;;  %v4848_v32 = vsel %vm804_vm3, %v4155_v7, %v803_v21 }
 0x124   : > { %v662_v36 = vpop.f32.mrf.mxu0 }
 0x125   : > { %v4801_v39 = vadd.f32 %v4702_v37, %v662_v36 }
 0x127   : > { %v751_v42 = vsel %vm702_vm2, %v4801_v39, 0.0 }
 0x128   : > { %716 = vadd.xlane.f32.xlu2 %v715_v41  ;;  %752 = vadd.xlane.f32.xlu0 %v751_v42  ;;  %v1695_v41 = vsel %vm609_vm0, %v1689_v29, 0  ;;  %v4893_v29 = vadd.f32 %v4702_v37, %v4741_v62 }
 0x129   : > { %1702 = vmatpush.bf16.msrb.mxu2 %v1695_v41  ;;  %v4898_v41 = vpop.xlane.xlu1 %707 }
 0x12a   : > { %8156 = vst [vmem:[#allocation27_spill] sm:$0xff] %v4893_v29 }
 0x12c   : > { %v664_v45 = vpop.f32.mrf.mxu0 }
 0x12d   : > { %v4811_v46 = vadd.f32 %v4702_v37, %v664_v45  ;;  %v1683_v45 = vld [vmem:[%s8099_s7 + $0x10] sm:$0xff] }
 0x12f   : > { %v754_v49 = vsel %vm702_vm2, %v4811_v46, 0.0 }
 0x130   : > { %719 = vadd.xlane.f32.xlu2 %v718_v48  ;;  %755 = vadd.xlane.f32.xlu1 %v754_v49  ;;  %v1684_v48 = vld [vmem:[%s8099_s7 + $0x18] sm:$0xff] }
 0x131   : > { %v1688_v49 = vpack.c.bf16 %v1684_v48, %v1683_v45  ;;  %v727_v48 = vsel %vm702_vm2, %v4893_v29, 0.0 }
 0x133   : > { %1703 = vmatpush.bf16.msrb.mxu2 %v1688_v49 }
 0x134   : > { %v667_v52 = vpop.f32.mrf.mxu0 }
 0x135   : > { %v4823_v55 = vadd.f32 %v4702_v37, %v667_v52 }
 0x137   : > { %v757_v57 = vsel %vm702_vm2, %v4823_v55, 0.0 }
 0x138   : > { %725 = vadd.xlane.f32.xlu1 %v724_v53 }
 0x13c   : > { %v669_v56 = vpop.f32.mrf.mxu0 }
 0x13d   : > { %v4872_v8 = vadd.f32 %v4702_v37, %v669_v56 }
 0x13f   : > { %v760_v17 = vsel %vm702_vm2, %v4872_v8, 0.0 }
 0x140   : > { %758 = vadd.xlane.f32.xlu1 %v757_v57 }
 0x144   : > { %v4827_v58 = vpop.f32.mrf.mxu0 }
 0x14c   : > { %v4829_v60 = vpop.f32.mrf.mxu0 }
 0x154   : > { %v677_v61 = vpop.f32.mrf.mxu0 }
 0x155   : > { %v4832_v1 = vadd.f32 %v4702_v37, %v677_v61  ;;  %v1682_v61 = vld [vmem:[%s8099_s7 + $0x8] sm:$0xff] }
 0x157   : > { %v769_v2 = vsel %vm702_vm2, %v4832_v1, 0.0 }
 0x158   : > { %770 = vadd.xlane.f32.xlu1 %v769_v2 }
 0x15c   : > { %v679_v53 = vpop.f32.mrf.mxu0 }
 0x164   : > { %v682_v23 = vpop.f32.mrf.mxu0 }
 0x17b   : > { %v741_v33 = vpop.xlane.xlu0 %740 }
 0x17c   : > { %v818_v36 = vmul.f32 %v4848_v32, %v741_v33 }
 0x17e   : > { %v4853_v42 = vsub.f32 %v4756_v6, %v818_v36  ;;  %v1681_v6 = vld [vmem:[%s8099_s7] sm:$0xff] }
 0x17f   : > { %v1687_v5 = vpack.c.bf16 %v1682_v61, %v1681_v6 }
 0x180   : > { %v882_v52 = vmul.f32 %v4853_v42, %v4853_v42 }
 0x181   : > { %1704 = vmatpush.bf16.msrb.mxu2 %v1687_v5 }
 0x182   : > { %v938_v57 = vsel %vm702_vm2, %v882_v52, 0.0 }
 0x183   : > { %v744_v2 = vpop.xlane.xlu0 %743  ;;  %939 = vadd.xlane.f32.xlu2 %v938_v57  ;;  %v4910_v57 = vadd.f32 %v4702_v37, %v4827_v58 }
 0x184   : > { %v819_v7 = vmul.f32 %v4848_v32, %v744_v2  ;;  %4005 = vmatmul.msk.bf16.vlgmr.msrb.gmra.mxu2 %vm560_vm1, %v4651_v13 }
 0x185   : > { %v763_v2 = vsel %vm702_vm2, %v4910_v57, 0.0 }
 0x186   : > { %v4875_v9 = vsub.f32 %v4767_v12, %v819_v7  ;;  %v4889_v12 = vadd.f32 %v4702_v37, %v679_v53  ;;  %v684_v53 = vpop.f32.mrf.mxu0  ;;  %v4925_v7 = vpop.xlane.xlu1 %713 }
 0x188   : > { %v883_v14 = vmul.f32 %v4875_v9, %v4875_v9  ;;  %v772_v36 = vsel %vm702_vm2, %v4889_v12, 0.0 }
 0x18a   : > { %v941_v21 = vsel %vm702_vm2, %v883_v14, 0.0  ;;  %v4928_v14 = vadd.f32 %v4702_v37, %v684_v53 }
 0x18b   : > { %v747_v24 = vpop.xlane.xlu2 %746  ;;  %761 = vadd.xlane.f32.xlu2 %v760_v17  ;;  %942 = vadd.xlane.f32.xlu0 %v941_v21  ;;  %v4886_v56 = vpop.xlane.xlu0 %710  ;;  %v4931_v17 = vadd.f32 %v4702_v37, %v682_v23  ;;  %v4935_v21 = vadd.f32 %v4702_v37, %v4829_v60 }
 0x18c   : > { %v820_v33 = vmul.f32 %v4848_v32, %v747_v24 }
 0x18d   : > { %v766_v23 = vsel %vm702_vm2, %v4935_v21, 0.0 }
 0x18e   : > { %v4901_v45 = vsub.f32 %v4775_v18, %v820_v33  ;;  %v687_v33 = vpop.f32.mrf.mxu0 }
 0x18f   : > { %v4949_v53 = vadd.f32 %v4702_v37, %v687_v33 }
 0x190   : > { %v884_v18 = vmul.f32 %v4901_v45, %v4901_v45 }
 0x192   : > { %v944_v5 = vsel %vm702_vm2, %v884_v18, 0.0 }
 0x193   : > { %v750_v49 = vpop.xlane.xlu2 %749  ;;  %773 = vadd.xlane.f32.xlu2 %v772_v36  ;;  %728 = vadd.xlane.f32.xlu0 %v727_v48  ;;  %v4905_v52 = vpop.xlane.xlu0 %722  ;;  %v778_v36 = vsel %vm702_vm2, %v4928_v14, 0.0  ;;  %v775_v48 = vsel %vm702_vm2, %v4931_v17, 0.0 }
 0x194   : > { %8157 = vst [vmem:[#allocation28_spill] sm:$0xff] %v4905_v52  ;;  %v821_v62 = vmul.f32 %v4848_v32, %v750_v49  ;;  %4006 = vmatmul.msk.bf16.gmra.mxu2 %vm560_vm1, %v4657_v16 }
 0x196   : > { %v4913_v6 = vsub.f32 %v4791_v30, %v821_v62 }
 0x198   : > { %v885_v61 = vmul.f32 %v4913_v6, %v4913_v6 }
 0x19a   : > { %v947_v58 = vsel %vm702_vm2, %v885_v61, 0.0 }
 0x19b   : > { %764 = vadd.xlane.f32.xlu2 %v763_v2  ;;  %945 = vadd.xlane.f32.xlu0 %v944_v5  ;;  %v753_v30 = vpop.xlane.xlu0 %752  ;;  %v689_v5 = vpop.f32.mrf.mxu0 }
 0x19c   : > { %948 = vadd.xlane.f32.xlu1 %v947_v58  ;;  %v822_v24 = vmul.f32 %v4848_v32, %v753_v30 }
 0x19e   : > { %v4943_v49 = vsub.f32 %v4801_v39, %v822_v24  ;;  %v781_v39 = vsel %vm702_vm2, %v4949_v53, 0.0  ;;  %v4967_v24 = vadd.f32 %v4702_v37, %v689_v5 }
 0x1a0   : > { %v886_v61 = vmul.f32 %v4943_v49, %v4943_v49  ;;  %v784_v33 = vsel %vm702_vm2, %v4967_v24, 0.0 }
 0x1a2   : > { %v950_v58 = vsel %vm702_vm2, %v886_v61, 0.0  ;;  %v692_v61 = vpop.f32.mrf.mxu2 }
 0x1a3   : > { %779 = vadd.xlane.f32.xlu2 %v778_v36  ;;  %767 = vadd.xlane.f32.xlu0 %v766_v23  ;;  %v756_v62 = vpop.xlane.xlu1 %755  ;;  %v4974_v23 = vadd.f32 %v4702_v37, %v4743_v63  ;;  %v4987_v63 = vadd.f32 %v4702_v37, %v692_v61 }
 0x1a4   : > { %776 = vadd.xlane.f32.xlu1 %v775_v48  ;;  %v823_v60 = vmul.f32 %v4848_v32, %v756_v62  ;;  %4007 = vmatmul.msk.bf16.gmra.mxu2 %vm560_vm1, %v4663_v19 }
 0x1a5   : > { %8159 = vst [vmem:[#allocation30_spill] sm:$0xff] %v4974_v23 }
 0x1a6   : > { %v4952_v18 = vsub.f32 %v4811_v46, %v823_v60 }
 0x1a8   : > { %v887_v2 = vmul.f32 %v4952_v18, %v4952_v18 }
 0x1aa   : > { %v953_v30 = vsel %vm702_vm2, %v887_v2, 0.0 }
 0x1ab   : > { %782 = vadd.xlane.f32.xlu2 %v781_v39  ;;  %951 = vadd.xlane.f32.xlu0 %v950_v58  ;;  %v4964_v46 = vpop.xlane.xlu1 %725  ;;  %v730_v39 = vsel %vm702_vm2, %v4974_v23, 0.0 }
 0x1ac   : > { %8158 = vst [vmem:[#allocation29_spill] sm:$0xff] %v4964_v46  ;;  %954 = vadd.xlane.f32.xlu1 %v953_v30 }
 0x1b3   : > { %785 = vadd.xlane.f32.xlu0 %v784_v33  ;;  %v759_v36 = vpop.xlane.xlu1 %758 }
 0x1b4   : > { %v824_v48 = vmul.f32 %v4848_v32, %v759_v36  ;;  %4008 = vmatmul.msk.bf16.gmra.mxu2 %vm560_vm1, %v4669_v22  ;;  %v694_v36 = vpop.f32.mrf.mxu2 }
 0x1b6   : > { %v4977_v62 = vsub.f32 %v4823_v55, %v824_v48  ;;  %v787_v55 = vsel %vm702_vm2, %v4987_v63, 0.0 }
 0x1b8   : > { %v888_v60 = vmul.f32 %v4977_v62, %v4977_v62 }
 0x1ba   : > { %v956_v2 = vsel %vm702_vm2, %v888_v60, 0.0  ;;  %v5001_v60 = vadd.f32 %v4702_v37, %v694_v36 }
 0x1bb   : > { %731 = vadd.xlane.f32.xlu0 %v730_v39  ;;  %957 = vadd.xlane.f32.xlu1 %v956_v2  ;;  %v5007_v39 = vpop.xlane.xlu2 %716 }
 0x1bc   : > { %v790_v61 = vsel %vm702_vm2, %v5001_v60, 0.0 }
 0x1c3   : > { %788 = vadd.xlane.f32.xlu0 %v787_v55  ;;  %v1536_v55 = vld [vmem:[%s8097_s5 + $0x10] sm:$0xff] }
 0x1c4   : > { %4009 = vmatmul.msk.bf16.gmra.mxu2 %vm560_vm1, %v4675_v25 }
 0x1cb   : > { %v771_v5 = vpop.xlane.xlu1 %770 }
 0x1cc   : > { %v828_v58 = vmul.f32 %v4848_v32, %v771_v5  ;;  %v1537_v5 = vld [vmem:[%s8097_s5 + $0x18] sm:$0xff] }
 0x1ce   : > { %v4995_v30 = vsub.f32 %v4832_v1, %v828_v58  ;;  %v5011_v1 = vpop.xlane.xlu2 %719 }
 0x1d0   : > { %v892_v33 = vmul.f32 %v4995_v30, %v4995_v30 }
 0x1d2   : > { %v968_v48 = vsel %vm702_vm2, %v892_v33, 0.0  ;;  %v1539_v33 = vpack.c.bf16 %v1537_v5, %v1536_v55 }
 0x1d3   : > { %969 = vadd.xlane.f32.xlu1 %v968_v48  ;;  %v1534_v48 = vld [vmem:[%s8097_s5] sm:$0xff] }
 0x1d4   : > { %4010 = vmatmul.msk.bf16.gmra.mxu2 %vm560_vm1, %v4681_v28  ;;  %4094 = vmatpush.bf16.msra.mxu1 %v1539_v33 }
 0x1d5   : > { %4095 = vmatpush.bf16.msra.mxu3 %v1539_v33  ;;  %1598 = vmatpush.bf16.msrb.mxu0 %v1539_v33 }
 0x1db   : > { %791 = vadd.xlane.f32.xlu1 %v790_v61  ;;  %v1535_v61 = vld [vmem:[%s8097_s5 + $0x8] sm:$0xff] }
 0x1e4   : > { %4011 = vmatmul.msk.bf16.gmra.mxu2 %vm560_vm1, %v4687_v31  ;;  %v1538_v31 = vpack.c.bf16 %v1535_v61, %v1534_v48 }
 0x1e6   : > { %4096 = vmatpush.bf16.msra.mxu1 %v1538_v31  ;;  %4097 = vmatpush.bf16.msra.mxu3 %v1538_v31 }
 0x1e7   : > { %1599 = vmatpush.bf16.msrb.mxu0 %v1538_v31 }
 0x1f4   : > { %4012 = vmatmul.msk.bf16.gmra.mxu2 %vm560_vm1, %v4693_v34 }
 0x1f6   : > { %v940_v2 = vpop.xlane.xlu2 %939 }
 0x1f7   : > { %v1010_v58 = vmul.f32 %v940_v2, %v4848_v32 }
 0x1f9   : > { %v1042_v36 = vadd.f32 1e-05, %v1010_v58 }
 0x1fb   : > { %4156 = vrsqrt.f32 %v1042_v36  ;;  %vm1188_vm5 = vweird.f32 %v1042_v36 }
 0x1fe   : > { %v762_v2 = vpop.xlane.xlu2 %761  ;;  %v943_v55 = vpop.xlane.xlu0 %942 }
 0x1ff   : > { %v825_v5 = vmul.f32 %v4848_v32, %v762_v2  ;;  %v1011_v58 = vmul.f32 %v943_v55, %v4848_v32 }
 0x201   : > { %v4157_v34 = vpop.eup %4156  ;;  %v5031_v28 = vsub.f32 %v4872_v8, %v825_v5  ;;  %v1043_v25 = vadd.f32 1e-05, %v1011_v58  ;;  %v5044_v58 = vpop.f32.mrf.mxu2 }
 0x202   : > { %v1183_v22 = vmul.f32 %v4157_v34, %v1042_v36  ;;  %vm1189_vm4 = vweird.f32 %v4157_v34 }
 0x203   : > { %4158 = vrsqrt.f32 %v1043_v25  ;;  %v889_v33 = vmul.f32 %v5031_v28, %v5031_v28  ;;  %vm1190_vm6 = vmor %vm1188_vm5, %vm1189_vm4  ;;  %vm1198_vm8 = vweird.f32 %v1043_v25 }
 0x204   : > { %v1184_v48 = vmul.f32 %v4157_v34, %v1183_v22  ;;  %4013 = vmatmul.msk.bf16.gmra.mxu2 %vm560_vm1, %v4704_v38 }
 0x205   : > { %v959_v61 = vsel %vm702_vm2, %v889_v33, 0.0 }
 0x206   : > { %v1185_v19 = vmul.f32 0.5, %v1184_v48  ;;  %960 = vadd.xlane.f32.xlu2 %v959_v61  ;;  %v774_v31 = vpop.xlane.xlu2 %773  ;;  %v5036_v16 = vpop.xlane.xlu0 %728 }
 0x207   : > { %8160 = vst [vmem:[#allocation31_spill] sm:$0xff] %v5036_v16  ;;  %v829_v2 = vmul.f32 %v4848_v32, %v774_v31 }
 0x208   : > { %v1186_v55 = vsub.f32 1.5, %v1185_v19 }
 0x209   : > { %v4159_v8 = vpop.eup %4158  ;;  %v5042_v5 = vsub.f32 %v4889_v12, %v829_v2 }
 0x20a   : > { %v1187_v22 = vmul.f32 %v4157_v34, %v1186_v55  ;;  %v1193_v33 = vmul.f32 %v4159_v8, %v1043_v25  ;;  %vm1199_vm7 = vweird.f32 %v4159_v8 }
 0x20b   : > { %v893_v48 = vmul.f32 %v5042_v5, %v5042_v5  ;;  %vm1200_vm9 = vmor %vm1198_vm8, %vm1199_vm7 }
 0x20c   : > { %v1194_v61 = vmul.f32 %v4159_v8, %v1193_v33  ;;  %v1191_v31 = vsel %vm1190_vm6, %v4157_v34, %v1187_v22  ;;  %v5056_v34 = vld [vmem:[%s8095_s3] ss:$0 sm:$0xff] }
 0x20d   : > { %v971_v19 = vsel %vm702_vm2, %v893_v48, 0.0  ;;  %v1394_v16 = vmul.f32 %v1191_v31, %v4853_v42  ;;  %v699_v42 = vpop.f32.mrf.mxu2 }
 0x20e   : > { %v1195_v13 = vmul.f32 0.5, %v1194_v61  ;;  %972 = vadd.xlane.f32.xlu2 %v971_v19  ;;  %v765_v38 = vpop.xlane.xlu2 %764  ;;  %v946_v23 = vpop.xlane.xlu0 %945 }
 0x20f   : > { %v826_v12 = vmul.f32 %v4848_v32, %v765_v38  ;;  %v1012_v2 = vmul.f32 %v946_v23, %v4848_v32  ;;  %v949_v29 = vpop.xlane.xlu1 %948  ;;  %v1430_v48 = vmul.f32 %v5056_v34, %v1394_v16 }
 0x210   : > { %v1196_v55 = vsub.f32 1.5, %v1195_v13  ;;  %v1013_v36 = vmul.f32 %v949_v29, %v4848_v32 }
 0x211   : > { %v5059_v22 = vsub.f32 %v4910_v57, %v826_v12  ;;  %v5061_v33 = vadd.f32 1e-05, %v1012_v2  ;;  %v5073_v57 = vld [vmem:[%s8096_s4] ss:$0 sm:$0xff] }
 0x212   : > { %v1197_v38 = vmul.f32 %v4159_v8, %v1196_v55  ;;  %v5063_v23 = vadd.f32 1e-05, %v1013_v36  ;;  %v1466_v36 = vadd.f32 %v5073_v57, %v1430_v48 }
 0x213   : > { %4160 = vrsqrt.f32 %v5061_v33  ;;  %v890_v13 = vmul.f32 %v5059_v22, %v5059_v22  ;;  %vm1208_vm12 = vweird.f32 %v5061_v33 }
 0x214   : > { %v1201_v29 = vsel %vm1200_vm9, %v4159_v8, %v1197_v38  ;;  %4162 = vrsqrt.f32 %v5063_v23  ;;  %4014 = vmatmul.msk.bf16.gmra.mxu2 %vm560_vm1, %v4720_v47  ;;  %vm1218_vm14 = vweird.f32 %v5063_v23 }
 0x215   : > { %v962_v25 = vsel %vm702_vm2, %v890_v13, 0.0  ;;  %v1395_v61 = vmul.f32 %v1201_v29, %v4875_v9 }
 0x216   : > { %963 = vadd.xlane.f32.xlu2 %v962_v25  ;;  %v780_v31 = vpop.xlane.xlu2 %779  ;;  %v768_v19 = vpop.xlane.xlu0 %767 }
 0x217   : > { %v831_v12 = vmul.f32 %v4848_v32, %v780_v31  ;;  %v827_v8 = vmul.f32 %v4848_v32, %v768_v19  ;;  %v777_v2 = vpop.xlane.xlu1 %776  ;;  %v1431_v55 = vmul.f32 %v5056_v34, %v1395_v61 }
 0x218   : > { %v830_v16 = vmul.f32 %v4848_v32, %v777_v2 }
 0x219   : > { %v4161_v38 = vpop.eup %4160  ;;  %v5085_v9 = vsub.f32 %v4928_v14, %v831_v12  ;;  %v5088_v13 = vsub.f32 %v4935_v21, %v827_v8  ;;  %v1467_v29 = vadd.f32 %v5073_v57, %v1431_v55  ;;  %v1498_v8 = vmax.f32 %v1466_v36, 0.0 }
 0x21a   : > { %v4163_v25 = vpop.eup %4162  ;;  %v1203_v31 = vmul.f32 %v4161_v38, %v5061_v33  ;;  %v5093_v61 = vsub.f32 %v4931_v17, %v830_v16  ;;  %v1706_v16 = vpop.f32.mrf.mxu2  ;;  %vm1209_vm10 = vweird.f32 %v4161_v38 }
 0x21b   : > { %v1213_v48 = vmul.f32 %v4163_v25, %v5063_v23  ;;  %v895_v19 = vmul.f32 %v5085_v9, %v5085_v9  ;;  %v891_v14 = vmul.f32 %v5088_v13, %v5088_v13  ;;  %v1499_v2 = vmax.f32 %v1467_v29, 0.0  ;;  %vm1210_vm13 = vmor %vm1208_vm12, %vm1209_vm10 }
 0x21c   : > { %v1204_v12 = vmul.f32 %v4161_v38, %v1203_v31  ;;  %v894_v21 = vmul.f32 %v5093_v61, %v5093_v61  ;;  %v5107_v31 = vadd.f32 %v4702_v37, %v4745_v0  ;;  %v5111_v29 = vadd.f32 %v4702_v37, %v5044_v58 }
 0x21d   : > { %v1214_v55 = vmul.f32 %v4163_v25, %v1213_v48  ;;  %v977_v47 = vsel %vm702_vm2, %v895_v19, 0.0  ;;  %v965_v17 = vsel %vm702_vm2, %v891_v14, 0.0  ;;  %v1524_v44 = vpack.c.bf16 %v1499_v2, %v1498_v8 }
 0x21e   : > { %v1205_v51 = vmul.f32 0.5, %v1204_v12  ;;  %978 = vadd.xlane.f32.xlu2 %v977_v47  ;;  %v783_v46 = vpop.xlane.xlu2 %782  ;;  %966 = vadd.xlane.f32.xlu0 %v965_v17  ;;  %v952_v27 = vpop.xlane.xlu0 %951  ;;  %v974_v52 = vsel %vm702_vm2, %v894_v21, 0.0  ;;  %v5117_v12 = vadd.f32 %v4702_v37, %v699_v42  ;;  %vm1219_vm11 = vweird.f32 %v4163_v25 }
 0x21f   : > { %v1215_v36 = vmul.f32 0.5, %v1214_v55  ;;  %v1014_v48 = vmul.f32 %v952_v27, %v4848_v32  ;;  %975 = vadd.xlane.f32.xlu1 %v974_v52  ;;  %v955_v19 = vpop.xlane.xlu1 %954  ;;  %3995 = vmatmul.msk.bf16.vlgmr.msra.gmra.mxu1 %vm702_vm2, %v1524_v44  ;;  %v832_v21 = vmul.f32 %v4848_v32, %v783_v46  ;;  %v793_v44 = vsel %vm702_vm2, %v5111_v29, 0.0  ;;  %v5129_v52 = vld [vmem:[%s8100_s8] ss:$0 sm:$0xff]  ;;  %vm1220_vm15 = vmor %vm1218_vm14, %vm1219_vm11 }
 0x220   : > { %v1206_v47 = vsub.f32 1.5, %v1205_v51  ;;  %v1015_v14 = vmul.f32 %v955_v19, %v4848_v32  ;;  %v796_v33 = vsel %vm702_vm2, %v5117_v12, 0.0  ;;  %v733_v23 = vsel %vm702_vm2, %v5107_v31, 0.0 }
 0x221   : > { %v1216_v0 = vsub.f32 1.5, %v1215_v36  ;;  %v1046_v8 = vadd.f32 1e-05, %v1014_v48  ;;  %v5135_v2 = vsub.f32 %v4949_v53, %v832_v21  ;;  %v5143_v48 = vadd.f32 %v5129_v52, %v1706_v16 }
 0x222   : > { %v1207_v58 = vmul.f32 %v4161_v38, %v1206_v47  ;;  %v5121_v27 = vadd.f32 1e-05, %v1015_v14  ;;  %v1708_v53 = vpop.f32.mrf.mxu2 }
 0x223   : > { %v1217_v51 = vmul.f32 %v4163_v25, %v1216_v0  ;;  %4164 = vrsqrt.f32 %v1046_v8  ;;  %vm1228_vm5 = vweird.f32 %v1046_v8 }
 0x224   : > { %v1211_v46 = vsel %vm1210_vm13, %v4161_v38, %v1207_v58  ;;  %4166 = vrsqrt.f32 %v5121_v27  ;;  %4015 = vmatmul.msk.bf16.gmra.mxu2 %vm560_vm1, %v4731_v54  ;;  %vm1238_vm7 = vweird.f32 %v5121_v27 }
 0x225   : > { %v1221_v42 = vsel %vm1220_vm15, %v4163_v25, %v1217_v51  ;;  %v1396_v55 = vmul.f32 %v1211_v46, %v4901_v45  ;;  %v1786_v51 = vsel %vm702_vm2, %v5143_v48, 0.0 }
 0x226   : > { %734 = vadd.xlane.f32.xlu2 %v733_v23  ;;  %794 = vadd.xlane.f32.xlu0 %v793_v44  ;;  %v786_v17 = vpop.xlane.xlu0 %785  ;;  %v1397_v38 = vmul.f32 %v1221_v42, %v4913_v6  ;;  %v896_v6 = vmul.f32 %v5135_v2, %v5135_v2 }
 0x227   : > { %v833_v36 = vmul.f32 %v4848_v32, %v786_v17  ;;  %797 = vadd.xlane.f32.xlu1 %v796_v33  ;;  %v1432_v25 = vmul.f32 %v5056_v34, %v1396_v55 }
 0x228   : > { %v1433_v19 = vmul.f32 %v5056_v34, %v1397_v38  ;;  %v980_v23 = vsel %vm702_vm2, %v896_v6, 0.0 }
 0x229   : > { %v4165_v45 = vpop.eup %4164  ;;  %v5150_v47 = vsub.f32 %v4967_v24, %v833_v36  ;;  %v1468_v14 = vadd.f32 %v5073_v57, %v1432_v25 }
 0x22a   : > { %v4167_v0 = vpop.eup %4166  ;;  %v1223_v16 = vmul.f32 %v4165_v45, %v1046_v8  ;;  %v1469_v21 = vadd.f32 %v5073_v57, %v1433_v19  ;;  %v5166_v19 = vadd.f32 %v5129_v52, %v1708_v53  ;;  %vm1229_vm3 = vweird.f32 %v4165_v45  ;;  %v1711_v6 = vpop.f32.mrf.mxu2 }
 0x22b   : > { %v1233_v58 = vmul.f32 %v4167_v0, %v5121_v27  ;;  %v897_v44 = vmul.f32 %v5150_v47, %v5150_v47  ;;  %v1500_v46 = vmax.f32 %v1468_v14, 0.0  ;;  %vm1239_vm4 = vweird.f32 %v4167_v0  ;;  %vm1230_vm6 = vmor %vm1228_vm5, %vm1229_vm3 }
 0x22c   : > { %v1224_v24 = vmul.f32 %v4165_v45, %v1223_v16  ;;  %v1501_v33 = vmax.f32 %v1469_v21, 0.0  ;;  %v5171_v16 = vadd.f32 %v4702_v37, %v4753_v4  ;;  %v1789_v53 = vsel %vm702_vm2, %v5166_v19, 0.0  ;;  %vm1240_vm8 = vmor %vm1238_vm7, %vm1239_vm4 }
 0x22d   : > { %v1234_v42 = vmul.f32 %v4167_v0, %v1233_v58  ;;  %v983_v55 = vsel %vm702_vm2, %v897_v44, 0.0  ;;  %v5183_v27 = vadd.f32 %v5129_v52, %v1711_v6 }
 0x22e   : > { %v1225_v17 = vmul.f32 0.5, %v1224_v24  ;;  %1787 = vadd.xlane.f32.xlu2 %v1786_v51  ;;  %981 = vadd.xlane.f32.xlu0 %v980_v23  ;;  %v5163_v38 = vpop.xlane.xlu0 %731  ;;  %v1525_v36 = vpack.c.bf16 %v1501_v33, %v1500_v46  ;;  %v736_v37 = vsel %vm702_vm2, %v5171_v16, 0.0 }
 0x22f   : > { %v1235_v25 = vmul.f32 0.5, %v1234_v42  ;;  %984 = vadd.xlane.f32.xlu1 %v983_v55 }
 0x230   : > { %v1226_v54 = vsub.f32 1.5, %v1225_v17  ;;  %3996 = vmatmul.msk.bf16.gmra.mxu1 %vm702_vm2, %v1525_v36  ;;  %v1792_v17 = vsel %vm702_vm2, %v5183_v27, 0.0 }
 0x231   : > { %v1236_v14 = vsub.f32 1.5, %v1235_v25 }
 0x232   : > { %v1227_v21 = vmul.f32 %v4165_v45, %v1226_v54  ;;  %v1713_v55 = vpop.f32.mrf.mxu2 }
 0x233   : > { %v1237_v58 = vmul.f32 %v4167_v0, %v1236_v14  ;;  %v958_v14 = vpop.xlane.xlu1 %957 }
 0x234   : > { %v1231_v51 = vsel %vm1230_vm6, %v4165_v45, %v1227_v21  ;;  %4016 = vmatmul.msk.bf16.gmra.mxu2 %vm560_vm1, %v4737_v59 }
 0x235   : > { %v1241_v44 = vsel %vm1240_vm8, %v4167_v0, %v1237_v58  ;;  %v1398_v46 = vmul.f32 %v1231_v51, %v4943_v49 }
 0x236   : > { %1790 = vadd.xlane.f32.xlu0 %v1789_v53  ;;  %v789_v24 = vpop.xlane.xlu0 %788  ;;  %v1399_v54 = vmul.f32 %v1241_v44, %v4952_v18  ;;  %v807_v18 = vmul.f32 %v4848_v32, %v4898_v41  ;;  %v5204_v41 = vadd.f32 %v5129_v52, %v1713_v55 }
 0x237   : > { %v834_v4 = vmul.f32 %v4848_v32, %v789_v24  ;;  %737 = vadd.xlane.f32.xlu1 %v736_v37  ;;  %v1434_v8 = vmul.f32 %v5056_v34, %v1398_v46 }
 0x238   : > { %v1435_v45 = vmul.f32 %v5056_v34, %v1399_v54  ;;  %v1795_v58 = vsel %vm702_vm2, %v5204_v41, 0.0  ;;  %v806_v54 = vmul.f32 %v4848_v32, %v4877_v11 }
 0x239   : > { %v5189_v49 = vsub.f32 %v4987_v63, %v834_v4  ;;  %v1470_v0 = vadd.f32 %v5073_v57, %v1434_v8  ;;  %v5201_v63 = vsub.f32 %v4714_v43, %v807_v18 }
 0x23a   : > { %v1471_v33 = vadd.f32 %v5073_v57, %v1435_v45  ;;  %v1716_v53 = vpop.f32.mrf.mxu2  ;;  %v5228_v45 = vsub.f32 %v4707_v40, %v806_v54 }
 0x23b   : > { %v898_v42 = vmul.f32 %v5189_v49, %v5189_v49  ;;  %v1502_v23 = vmax.f32 %v1470_v0, 0.0  ;;  %v871_v21 = vmul.f32 %v5201_v63, %v5201_v63  ;;  %v5213_v44 = vadd.f32 %v5129_v52, %v1716_v53 }
 0x23c   : > { %v1503_v36 = vmax.f32 %v1471_v33, 0.0  ;;  %v870_v18 = vmul.f32 %v5228_v45, %v5228_v45 }
 0x23d   : > { %v986_v25 = vsel %vm702_vm2, %v898_v42, 0.0  ;;  %v905_v43 = vsel %vm702_vm2, %v871_v21, 0.0  ;;  %v1798_v46 = vsel %vm702_vm2, %v5213_v44, 0.0 }
 0x23e   : > { %987 = vadd.xlane.f32.xlu2 %v986_v25  ;;  %v1526_v6 = vpack.c.bf16 %v1503_v36, %v1502_v23  ;;  %v902_v11 = vsel %vm702_vm2, %v870_v18, 0.0 }
 0x23f   : > { %1793 = vadd.xlane.f32.xlu1 %v1792_v17 }
 0x240   : > { %3997 = vmatmul.msk.bf16.gmra.mxu1 %vm702_vm2, %v1526_v6 }
 0x244   : > { %4017 = vmatmul.msk.bf16.gmra.mxu2 %vm560_vm1, %v4749_v3 }
 0x246   : > { %1796 = vadd.xlane.f32.xlu2 %v1795_v58  ;;  %v970_v51 = vpop.xlane.xlu1 %969 }
 0x247   : > { %906 = vadd.xlane.f32.xlu1 %v905_v43  ;;  %v1020_v42 = vmul.f32 %v970_v51, %v4848_v32 }
 0x249   : > { %v1052_v40 = vadd.f32 1e-05, %v1020_v42 }
 0x24b   : > { %vm1288_vm14 = vweird.f32 %v1052_v40 }
 0x24e   : > { %v792_v24 = vpop.xlane.xlu1 %791 }
 0x24f   : > { %1799 = vadd.xlane.f32.xlu1 %v1798_v46  ;;  %v835_v37 = vmul.f32 %v4848_v32, %v792_v24 }
 0x251   : > { %v5223_v4 = vsub.f32 %v5001_v60, %v835_v37  ;;  %v1016_v60 = vmul.f32 %v958_v14, %v4848_v32  ;;  %v5239_v14 = vpop.f32.mrf.mxu2 }
 0x253   : > { %v899_v8 = vmul.f32 %v5223_v4, %v5223_v4  ;;  %v1048_v33 = vadd.f32 1e-05, %v1016_v60 }
 0x254   : > { %4018 = vmatmul.msk.bf16.gmra.mxu2 %vm560_vm1, %v4762_v10 }
 0x255   : > { %v989_v0 = vsel %vm702_vm2, %v899_v8, 0.0  ;;  %4168 = vrsqrt.f32 %v1048_v33  ;;  %vm1248_vm10 = vweird.f32 %v1048_v33 }
 0x256   : > { %990 = vadd.xlane.f32.xlu0 %v989_v0  ;;  %4170 = vrsqrt.f32 %v1052_v40 }
 0x25b   : > { %v4169_v23 = vpop.eup %4168 }
 0x25c   : > { %v1243_v55 = vmul.f32 %v4169_v23, %v1048_v33  ;;  %v4171_v36 = vpop.eup %4170  ;;  %vm1249_vm9 = vweird.f32 %v4169_v23 }
 0x25d   : > { %v1283_v58 = vmul.f32 %v4171_v36, %v1052_v40  ;;  %vm1250_vm11 = vmor %vm1248_vm10, %vm1249_vm9  ;;  %vm1289_vm12 = vweird.f32 %v4171_v36 }
 0x25e   : > { %903 = vadd.xlane.f32.xlu0 %v902_v11  ;;  %v1244_v17 = vmul.f32 %v4169_v23, %v1243_v55  ;;  %v5244_v55 = vpop.f32.mrf.mxu2  ;;  %vm5250_vm15 = vmor %vm1288_vm14, %vm1289_vm12 }
 0x25f   : > { %v1284_v46 = vmul.f32 %v4171_v36, %v1283_v58 }
 0x260   : > { %v1245_v6 = vmul.f32 0.5, %v1244_v17 }
 0x261   : > { %v1285_v54 = vmul.f32 0.5, %v1284_v46 }
 0x262   : > { %v1246_v43 = vsub.f32 1.5, %v1245_v6 }
 0x263   : > { %v1286_v60 = vsub.f32 1.5, %v1285_v54 }
 0x264   : > { %4019 = vmatmul.msk.bf16.gmra.mxu2 %vm560_vm1, %v4783_v26  ;;  %v1247_v24 = vmul.f32 %v4169_v23, %v1246_v43 }
 0x265   : > { %v1287_v58 = vmul.f32 %v4171_v36, %v1286_v60 }
 0x266   : > { %v1251_v11 = vsel %vm1250_vm11, %v4169_v23, %v1247_v24  ;;  %v808_v23 = vmul.f32 %v4848_v32, %v4886_v56 }
 0x267   : > { %v1400_v6 = vmul.f32 %v1251_v11, %v4977_v62  ;;  %v1291_v62 = vsel %vm5250_vm15, %v4171_v36, %v1287_v58  ;;  %v5259_v11 = vpop.f32.mrf.mxu2 }
 0x274   : > { %4020 = vmatmul.msk.bf16.gmra.mxu2 %vm560_vm1, %v4838_v20 }
 0x279   : > { %v961_v25 = vpop.xlane.xlu2 %960 }
 0x27a   : > { %v1017_v21 = vmul.f32 %v961_v25, %v4848_v32 }
 0x27c   : > { %v1049_v53 = vadd.f32 1e-05, %v1017_v21 }
 0x27e   : > { %4172 = vrsqrt.f32 %v1049_v53  ;;  %vm1258_vm3 = vweird.f32 %v1049_v53 }
 0x281   : > { %v973_v51 = vpop.xlane.xlu2 %972 }
 0x282   : > { %v1021_v37 = vmul.f32 %v973_v51, %v4848_v32 }
 0x284   : > { %v4173_v8 = vpop.eup %4172  ;;  %v1053_v0 = vadd.f32 1e-05, %v1021_v37  ;;  %v1436_v37 = vmul.f32 %v5056_v34, %v1400_v6 }
 0x285   : > { %v1253_v18 = vmul.f32 %v4173_v8, %v1049_v53  ;;  %vm1259_vm13 = vweird.f32 %v4173_v8 }
 0x286   : > { %4174 = vrsqrt.f32 %v1053_v0  ;;  %vm1260_vm4 = vmor %vm1258_vm3, %vm1259_vm13  ;;  %vm1298_vm6 = vweird.f32 %v1053_v0 }
 0x287   : > { %v1254_v42 = vmul.f32 %v4173_v8, %v1253_v18 }
 0x289   : > { %v1255_v17 = vmul.f32 0.5, %v1254_v42  ;;  %v964_v25 = vpop.xlane.xlu2 %963 }
 0x28a   : > { %v1018_v21 = vmul.f32 %v964_v25, %v4848_v32 }
 0x28b   : > { %v1256_v43 = vsub.f32 1.5, %v1255_v17  ;;  %v1472_v17 = vadd.f32 %v5073_v57, %v1436_v37 }
 0x28c   : > { %v4175_v33 = vpop.eup %4174  ;;  %v5248_v46 = vadd.f32 1e-05, %v1018_v21 }
 0x28d   : > { %v1257_v51 = vmul.f32 %v4173_v8, %v1256_v43  ;;  %v1293_v24 = vmul.f32 %v4175_v33, %v1053_v0  ;;  %vm1299_vm5 = vweird.f32 %v4175_v33 }
 0x28e   : > { %4176 = vrsqrt.f32 %v5248_v46  ;;  %vm1300_vm7 = vmor %vm1298_vm6, %vm1299_vm5  ;;  %vm1268_vm9 = vweird.f32 %v5248_v46 }
 0x28f   : > { %v1261_v54 = vsel %vm1260_vm4, %v4173_v8, %v1257_v51  ;;  %v1294_v18 = vmul.f32 %v4175_v33, %v1293_v24  ;;  %v1404_v8 = vmul.f32 %v1291_v62, %v4995_v30  ;;  %v1504_v30 = vmax.f32 %v1472_v17, 0.0 }
 0x290   : > { %v1401_v40 = vmul.f32 %v1261_v54, %v5031_v28 }
 0x291   : > { %v1295_v60 = vmul.f32 0.5, %v1294_v18  ;;  %v979_v53 = vpop.xlane.xlu2 %978  ;;  %v967_v42 = vpop.xlane.xlu0 %966 }
 0x292   : > { %v1023_v25 = vmul.f32 %v979_v53, %v4848_v32  ;;  %v1019_v6 = vmul.f32 %v967_v42, %v4848_v32  ;;  %v976_v21 = vpop.xlane.xlu1 %975  ;;  %v1437_v36 = vmul.f32 %v5056_v34, %v1401_v40  ;;  %v5283_v42 = vsub.f32 %v4772_v15, %v808_v23 }
 0x293   : > { %v1296_v28 = vsub.f32 1.5, %v1295_v60  ;;  %v1022_v58 = vmul.f32 %v976_v21, %v4848_v32  ;;  %v1440_v60 = vmul.f32 %v5056_v34, %v1404_v8 }
 0x294   : > { %v4177_v43 = vpop.eup %4176  ;;  %v5271_v51 = vadd.f32 1e-05, %v1023_v25  ;;  %v5273_v24 = vadd.f32 1e-05, %v1019_v6  ;;  %v1473_v37 = vadd.f32 %v5073_v57, %v1437_v36 }
 0x295   : > { %v1297_v54 = vmul.f32 %v4175_v33, %v1296_v28  ;;  %v1263_v18 = vmul.f32 %v4177_v43, %v5248_v46  ;;  %v5277_v40 = vadd.f32 1e-05, %v1022_v58  ;;  %v1476_v8 = vadd.f32 %v5073_v57, %v1440_v60 }
 0x296   : > { %4178 = vrsqrt.f32 %v5271_v51  ;;  %v1505_v62 = vmax.f32 %v1473_v37, 0.0  ;;  %vm1269_vm8 = vweird.f32 %v4177_v43  ;;  %vm1318_vm11 = vweird.f32 %v5271_v51 }
 0x297   : > { %v1301_v56 = vsel %vm1300_vm7, %v4175_v33, %v1297_v54  ;;  %v1264_v53 = vmul.f32 %v4177_v43, %v1263_v18  ;;  %4180 = vrsqrt.f32 %v5273_v24  ;;  %v5302_v54 = vmul.f32 %v5283_v42, %v5283_v42  ;;  %vm5314_vm10 = vmor %vm1268_vm9, %vm1269_vm8 }
 0x298   : > { %4182 = vrsqrt.f32 %v5277_v40  ;;  %v1527_v0 = vpack.c.bf16 %v1505_v62, %v1504_v30  ;;  %v1405_v25 = vmul.f32 %v1301_v56, %v5042_v5  ;;  %vm1278_vm3 = vweird.f32 %v5273_v24 }
 0x299   : > { %v1265_v6 = vmul.f32 0.5, %v1264_v53  ;;  %v5287_v21 = vpop.xlane.xlu2 %734  ;;  %v795_v36 = vpop.xlane.xlu0 %794  ;;  %vm1308_vm5 = vweird.f32 %v5277_v40 }
 0x29a   : > { %v836_v17 = vmul.f32 %v4848_v32, %v795_v36  ;;  %v798_v28 = vpop.xlane.xlu1 %797  ;;  %3998 = vmatmul.msk.bf16.gmra.mxu1 %vm702_vm2, %v1527_v0  ;;  %v1441_v33 = vmul.f32 %v5056_v34, %v1405_v25  ;;  %v5322_v0 = vadd.f32 %v5129_v52, %v5239_v14  ;;  %v1508_v25 = vmax.f32 %v1476_v8, 0.0 }
 0x29b   : > { %v1266_v15 = vsub.f32 1.5, %v1265_v6  ;;  %v837_v58 = vmul.f32 %v4848_v32, %v798_v28 }
 0x29c   : > { %v5294_v23 = vpop.eup %4178  ;;  %v5297_v5 = vsub.f32 %v5111_v29, %v836_v17  ;;  %v1477_v37 = vadd.f32 %v5073_v57, %v1441_v33 }
 0x29d   : > { %v5304_v18 = vpop.eup %4180  ;;  %v1267_v30 = vmul.f32 %v4177_v43, %v1266_v15  ;;  %v1313_v62 = vmul.f32 %v5294_v23, %v5271_v51  ;;  %v5310_v60 = vsub.f32 %v5117_v12, %v837_v58  ;;  %vm1319_vm12 = vweird.f32 %v5294_v23 }
 0x29e   : > { %v5312_v56 = vpop.eup %4182  ;;  %v1273_v53 = vmul.f32 %v5304_v18, %v5273_v24  ;;  %v900_v46 = vmul.f32 %v5297_v5, %v5297_v5  ;;  %v1509_v33 = vmax.f32 %v1477_v37, 0.0  ;;  %vm1279_vm13 = vweird.f32 %v5304_v18  ;;  %vm1320_vm15 = vmor %vm1318_vm11, %vm1319_vm12 }
 0x29f   : > { %v1271_v12 = vsel %vm5314_vm10, %v4177_v43, %v1267_v30  ;;  %v1314_v6 = vmul.f32 %v5294_v23, %v1313_v62  ;;  %v1303_v36 = vmul.f32 %v5312_v56, %v5277_v40  ;;  %v901_v14 = vmul.f32 %v5310_v60, %v5310_v60  ;;  %vm1280_vm4 = vmor %vm1278_vm3, %vm1279_vm13 }
 0x2a0   : > { %v1274_v17 = vmul.f32 %v5304_v18, %v1273_v53  ;;  %v992_v28 = vsel %vm702_vm2, %v900_v46, 0.0  ;;  %v1402_v30 = vmul.f32 %v1271_v12, %v5059_v22  ;;  %v1529_v10 = vpack.c.bf16 %v1509_v33, %v1508_v25 }
 0x2a1   : > { %v1315_v15 = vmul.f32 0.5, %v1314_v6  ;;  %v1304_v43 = vmul.f32 %v5312_v56, %v1303_v36  ;;  %v1788_v8 = vpop.xlane.xlu2 %1787  ;;  %993 = vadd.xlane.f32.xlu2 %v992_v28  ;;  %v982_v58 = vpop.xlane.xlu0 %981  ;;  %v995_v46 = vsel %vm702_vm2, %v901_v14, 0.0  ;;  %vm1309_vm14 = vweird.f32 %v5312_v56 }
 0x2a2   : > { %v1275_v62 = vmul.f32 0.5, %v1274_v17  ;;  %v1882_v29 = vmul.f32 %v1788_v8, %v4848_v32  ;;  %v1024_v53 = vmul.f32 %v982_v58, %v4848_v32  ;;  %v985_v20 = vpop.xlane.xlu1 %984  ;;  %996 = vadd.xlane.f32.xlu0 %v995_v46  ;;  %4000 = vmatmul.msk.bf16.vlgmr.msra.gmra.mxu3 %vm702_vm2, %v1529_v10  ;;  %vm1310_vm6 = vmor %vm1308_vm5, %vm1309_vm14  ;;  %v1801_v51 = vsel %vm702_vm2, %v5322_v0, 0.0 }
 0x2a3   : > { %v1316_v26 = vsub.f32 1.5, %v1315_v15  ;;  %v1305_v37 = vmul.f32 0.5, %v1304_v43  ;;  %v1025_v6 = vmul.f32 %v985_v20, %v4848_v32  ;;  %v908_v43 = vsel %vm702_vm2, %v5302_v54, 0.0 }
 0x2a4   : > { %v1276_v36 = vsub.f32 1.5, %v1275_v62  ;;  %v5345_v28 = vsub.f32 %v5143_v48, %v1882_v29  ;;  %v5347_v22 = vadd.f32 1e-05, %v1024_v53  ;;  %v1726_v29 = vpop.f32.mrf.mxu2  ;;  %v5395_v46 = vadd.f32 %v5129_v52, %v5259_v11 }
 0x2a5   : > { %v1317_v12 = vmul.f32 %v5294_v23, %v1316_v26  ;;  %v1306_v17 = vsub.f32 1.5, %v1305_v37  ;;  %v5351_v14 = vadd.f32 1e-05, %v1025_v6  ;;  %v1438_v26 = vmul.f32 %v5056_v34, %v1402_v30 }
 0x2a6   : > { %v1277_v20 = vmul.f32 %v5304_v18, %v1276_v36  ;;  %4184 = vrsqrt.f32 %v5347_v22  ;;  %v1946_v24 = vmul.f32 %v5345_v28, %v5345_v28  ;;  %vm1328_vm9 = vweird.f32 %v5347_v22 }
 0x2a7   : > { %v1321_v48 = vsel %vm1320_vm15, %v5294_v23, %v1317_v12  ;;  %v1307_v25 = vmul.f32 %v5312_v56, %v1306_v17  ;;  %4186 = vrsqrt.f32 %v5351_v14  ;;  %v809_v23 = vmul.f32 %v4848_v32, %v4925_v7 }
 0x2a8   : > { %v1281_v10 = vsel %vm1280_vm4, %v5304_v18, %v1277_v20  ;;  %v1407_v33 = vmul.f32 %v1321_v48, %v5085_v9  ;;  %v1978_v58 = vsel %vm702_vm2, %v1946_v24, 0.0  ;;  %v1474_v9 = vadd.f32 %v5073_v57, %v1438_v26 }
 0x2a9   : > { %v1311_v15 = vsel %vm1310_vm6, %v5312_v56, %v1307_v25  ;;  %1802 = vadd.xlane.f32.xlu2 %v1801_v51  ;;  %v1791_v40 = vpop.xlane.xlu0 %1790  ;;  %v1403_v18 = vmul.f32 %v1281_v10, %v5088_v13  ;;  %1979 = vadd.xlane.f32.xlu1 %v1978_v58  ;;  %v5388_v13 = vadd.f32 %v5129_v52, %v5244_v55  ;;  %v1807_v51 = vsel %vm702_vm2, %v5395_v46, 0.0 }
 0x2aa   : > { %v1883_v8 = vmul.f32 %v1791_v40, %v4848_v32  ;;  %v5380_v30 = vpop.xlane.xlu1 %737  ;;  %v1406_v62 = vmul.f32 %v1311_v15, %v5093_v61  ;;  %909 = vadd.xlane.f32.xlu0 %v908_v43  ;;  %v1443_v56 = vmul.f32 %v5056_v34, %v1407_v33  ;;  %v5401_v12 = vsub.f32 %v4725_v50, %v809_v23 }
 0x2ab   : > { %v1439_v7 = vmul.f32 %v5056_v34, %v1403_v18  ;;  %v1506_v17 = vmax.f32 %v1474_v9, 0.0  ;;  %v1804_v50 = vsel %vm702_vm2, %v5388_v13, 0.0  ;;  %vm1338_vm11 = vweird.f32 %v5351_v14 }
 0x2ac   : > { %v4185_v54 = vpop.eup %4184  ;;  %v5391_v53 = vsub.f32 %v5166_v19, %v1883_v8  ;;  %v1442_v61 = vmul.f32 %v5056_v34, %v1406_v62  ;;  %v1479_v48 = vadd.f32 %v5073_v57, %v1443_v56  ;;  %v873_v56 = vmul.f32 %v5401_v12, %v5401_v12 }
 0x2ad   : > { %v4187_v37 = vpop.eup %4186  ;;  %v1323_v6 = vmul.f32 %v4185_v54, %v5347_v22  ;;  %v1475_v36 = vadd.f32 %v5073_v57, %v1439_v7  ;;  %vm1329_vm7 = vweird.f32 %v4185_v54 }
 0x2ae   : > { %v1333_v55 = vmul.f32 %v4187_v37, %v5351_v14  ;;  %v1947_v19 = vmul.f32 %v5391_v53, %v5391_v53  ;;  %v1478_v11 = vadd.f32 %v5073_v57, %v1442_v61  ;;  %v1511_v40 = vmax.f32 %v1479_v48, 0.0  ;;  %vm1330_vm10 = vmor %vm1328_vm9, %vm1329_vm7 }
 0x2af   : > { %v1324_v20 = vmul.f32 %v4185_v54, %v1323_v6  ;;  %v1507_v26 = vmax.f32 %v1475_v36, 0.0  ;;  %vm1339_vm8 = vweird.f32 %v4187_v37  ;;  %v1728_v36 = vpop.f32.mrf.mxu2  ;;  %v5434_v14 = vadd.f32 %v5129_v52, %v1726_v29 }
 0x2b0   : > { %v1334_v25 = vmul.f32 %v4187_v37, %v1333_v55  ;;  %v1981_v10 = vsel %vm702_vm2, %v1947_v19, 0.0  ;;  %v1510_v15 = vmax.f32 %v1478_v11, 0.0  ;;  %vm1340_vm12 = vmor %vm1338_vm11, %vm1339_vm8  ;;  %v5448_v29 = vadd.f32 %v5129_v52, %v1728_v36 }
 0x2b1   : > { %v1325_v24 = vmul.f32 0.5, %v1324_v20  ;;  %v988_v33 = vpop.xlane.xlu2 %987  ;;  %1982 = vadd.xlane.f32.xlu2 %v1981_v10  ;;  %v1528_v23 = vpack.c.bf16 %v1507_v26, %v1506_v17  ;;  %1808 = vadd.xlane.f32.xlu1 %v1807_v51 }
 0x2b2   : > { %v1335_v43 = vmul.f32 0.5, %v1334_v25  ;;  %v1026_v18 = vmul.f32 %v988_v33, %v4848_v32  ;;  %v1794_v8 = vpop.xlane.xlu1 %1793  ;;  %1805 = vadd.xlane.f32.xlu0 %v1804_v50  ;;  %v1530_v62 = vpack.c.bf16 %v1511_v40, %v1510_v15  ;;  %v811_v50 = vmul.f32 %v4848_v32, %v5011_v1 }
 0x2b3   : > { %v1326_v58 = vsub.f32 1.5, %v1325_v24  ;;  %v1884_v9 = vmul.f32 %v1794_v8, %v4848_v32  ;;  %3999 = vmatmul.msk.bf16.gmra.mxu1 %vm702_vm2, %v1528_v23  ;;  %v8165_v8 = vld [vmem:[#allocation24_spill] sm:$0xff] }
 0x2b4   : > { %v1336_v7 = vsub.f32 1.5, %v1335_v43  ;;  %4001 = vmatmul.msk.bf16.gmra.mxu3 %vm702_vm2, %v1530_v62  ;;  %v5424_v19 = vadd.f32 1e-05, %v1026_v18  ;;  %v1813_v62 = vsel %vm702_vm2, %v5448_v29, 0.0 }
 0x2b5   : > { %v1327_v61 = vmul.f32 %v4185_v54, %v1326_v58  ;;  %v5420_v6 = vsub.f32 %v5183_v27, %v1884_v9  ;;  %v911_v27 = vsel %vm702_vm2, %v873_v56, 0.0  ;;  %v5462_v58 = vsub.f32 %v8165_v8, %v811_v50 }
 0x2b6   : > { %v1337_v55 = vmul.f32 %v4187_v37, %v1336_v7  ;;  %4188 = vrsqrt.f32 %v5424_v19  ;;  %vm1348_vm14 = vweird.f32 %v5424_v19 }
 0x2b7   : > { %v1331_v17 = vsel %vm1330_vm10, %v4185_v54, %v1327_v61  ;;  %v1948_v20 = vmul.f32 %v5420_v6, %v5420_v6  ;;  %v1731_v43 = vpop.f32.mrf.mxu2  ;;  %v875_v36 = vmul.f32 %v5462_v58, %v5462_v58 }
 0x2b8   : > { %v1408_v26 = vmul.f32 %v1331_v17, %v5135_v2  ;;  %v1341_v22 = vsel %vm1340_vm12, %v4187_v37, %v1337_v55  ;;  %v810_v2 = vmul.f32 %v4848_v32, %v5007_v39  ;;  %v1810_v39 = vsel %vm702_vm2, %v5434_v14, 0.0 }
 0x2b9   : > { %v1409_v11 = vmul.f32 %v1341_v22, %v5150_v47  ;;  %v1797_v48 = vpop.xlane.xlu2 %1796  ;;  %912 = vadd.xlane.f32.xlu2 %v911_v27  ;;  %v1984_v25 = vsel %vm702_vm2, %v1948_v20, 0.0  ;;  %v917_v27 = vsel %vm702_vm2, %v875_v36, 0.0 }
 0x2ba   : > { %v1885_v54 = vmul.f32 %v1797_v48, %v4848_v32  ;;  %v907_v10 = vpop.xlane.xlu1 %906  ;;  %v1444_v51 = vmul.f32 %v5056_v34, %v1408_v26  ;;  %1985 = vadd.xlane.f32.xlu0 %v1984_v25  ;;  %v5459_v18 = vsub.f32 %v4798_v35, %v810_v2 }
 0x2bb   : > { %v999_v47 = vmul.f32 %v907_v10, %v4848_v32  ;;  %v1445_v37 = vmul.f32 %v5056_v34, %v1409_v11 }
 0x2bc   : > { %v5445_v24 = vsub.f32 %v5204_v41, %v1885_v54  ;;  %v1480_v33 = vadd.f32 %v5073_v57, %v1444_v51  ;;  %v4189_v41 = vpop.eup %4188  ;;  %v874_v55 = vmul.f32 %v5459_v18, %v5459_v18 }
 0x2bd   : > { %v1481_v23 = vadd.f32 %v5073_v57, %v1445_v37  ;;  %v5452_v15 = vadd.f32 1e-05, %v999_v47  ;;  %v1343_v61 = vmul.f32 %v4189_v41, %v5424_v19  ;;  %vm1349_vm13 = vweird.f32 %v4189_v41 }
 0x2be   : > { %v1949_v34 = vmul.f32 %v5445_v24, %v5445_v24  ;;  %v1512_v40 = vmax.f32 %v1480_v33, 0.0  ;;  %v914_v11 = vsel %vm702_vm2, %v874_v55, 0.0  ;;  %vm1350_vm15 = vmor %vm1348_vm14, %vm1349_vm13 }
 0x2bf   : > { %v1513_v1 = vmax.f32 %v1481_v23, 0.0  ;;  %4190 = vrsqrt.f32 %v5452_v15  ;;  %v1344_v20 = vmul.f32 %v4189_v41, %v1343_v61  ;;  %v1733_v54 = vpop.f32.mrf.mxu2  ;;  %vm1078_vm5 = vweird.f32 %v5452_v15 }
 0x2c0   : > { %v1987_v9 = vsel %vm702_vm2, %v1949_v34, 0.0  ;;  %v5489_v37 = vadd.f32 %v5129_v52, %v1733_v54 }
 0x2c1   : > { %1811 = vadd.xlane.f32.xlu2 %v1810_v39  ;;  %1988 = vadd.xlane.f32.xlu1 %v1987_v9  ;;  %v1531_v7 = vpack.c.bf16 %v1513_v1, %v1512_v40  ;;  %v1345_v51 = vmul.f32 0.5, %v1344_v20 }
 0x2c2   : > { %v1800_v56 = vpop.xlane.xlu1 %1799  ;;  %1814 = vadd.xlane.f32.xlu0 %v1813_v62  ;;  %v1819_v39 = vsel %vm702_vm2, %v5489_v37, 0.0 }
 0x2c3   : > { %v1886_v35 = vmul.f32 %v1800_v56, %v4848_v32  ;;  %v1346_v33 = vsub.f32 1.5, %v1345_v51 }
 0x2c4   : > { %4002 = vmatmul.msk.bf16.gmra.mxu3 %vm702_vm2, %v1531_v7 }
 0x2c5   : > { %v5475_v17 = vsub.f32 %v5213_v44, %v1886_v35  ;;  %v4191_v22 = vpop.eup %4190  ;;  %v5484_v44 = vadd.f32 %v5129_v52, %v1731_v43  ;;  %v1347_v1 = vmul.f32 %v4189_v41, %v1346_v33 }
 0x2c6   : > { %v1073_v2 = vmul.f32 %v4191_v22, %v5452_v15  ;;  %vm1079_vm3 = vweird.f32 %v4191_v22 }
 0x2c7   : > { %v1950_v26 = vmul.f32 %v5475_v17, %v5475_v17  ;;  %v1816_v50 = vsel %vm702_vm2, %v5484_v44, 0.0  ;;  %v1351_v62 = vsel %vm1350_vm15, %v4189_v41, %v1347_v1  ;;  %vm1080_vm6 = vmor %vm1078_vm5, %vm1079_vm3  ;;  %v5502_v41 = vld [vmem:[%s8095_s3] ss:$0 sm:$0xff] }
 0x2c8   : > { %v1074_v23 = vmul.f32 %v4191_v22, %v1073_v2  ;;  %v1410_v35 = vmul.f32 %v1351_v62, %v5189_v49 }
 0x2c9   : > { %918 = vadd.xlane.f32.xlu2 %v917_v27  ;;  %915 = vadd.xlane.f32.xlu1 %v914_v11  ;;  %v991_v48 = vpop.xlane.xlu0 %990  ;;  %v1990_v25 = vsel %vm702_vm2, %v1950_v26, 0.0 }
 0x2ca   : > { %v1027_v10 = vmul.f32 %v991_v48, %v4848_v32  ;;  %1991 = vadd.xlane.f32.xlu0 %v1990_v25  ;;  %v1075_v43 = vmul.f32 0.5, %v1074_v23  ;;  %v1446_v27 = vmul.f32 %v5502_v41, %v1410_v35 }
 0x2cc   : > { %v1059_v47 = vadd.f32 1e-05, %v1027_v10  ;;  %v1076_v7 = vsub.f32 1.5, %v1075_v43  ;;  %v1482_v51 = vadd.f32 %v5073_v57, %v1446_v27 }
 0x2ce   : > { %4192 = vrsqrt.f32 %v1059_v47  ;;  %v1077_v36 = vmul.f32 %v4191_v22, %v1076_v7  ;;  %vm1358_vm7 = vweird.f32 %v1059_v47  ;;  %v1514_v33 = vmax.f32 %v1482_v51, 0.0 }
 0x2d0   : > { %v1081_v49 = vsel %vm1080_vm6, %v4191_v22, %v1077_v36 }
 0x2d1   : > { %1817 = vadd.xlane.f32.xlu2 %v1816_v50  ;;  %v904_v34 = vpop.xlane.xlu0 %903  ;;  %v1383_v15 = vmul.f32 %v1081_v49, %v5201_v63 }
 0x2d2   : > { %v998_v40 = vmul.f32 %v904_v34, %v4848_v32  ;;  %1820 = vadd.xlane.f32.xlu0 %v1819_v39 }
 0x2d4   : > { %v4193_v8 = vpop.eup %4192  ;;  %v1030_v52 = vadd.f32 1e-05, %v998_v40 }
 0x2d5   : > { %v1353_v9 = vmul.f32 %v4193_v8, %v1059_v47  ;;  %vm1359_vm4 = vweird.f32 %v4193_v8  ;;  %v5512_v47 = vld [vmem:[%s8096_s4] ss:$0 sm:$0xff] }
 0x2d6   : > { %4194 = vrsqrt.f32 %v1030_v52  ;;  %vm1360_vm8 = vmor %vm1358_vm7, %vm1359_vm4  ;;  %vm1068_vm10 = vweird.f32 %v1030_v52 }
 0x2d7   : > { %v1354_v56 = vmul.f32 %v4193_v8, %v1353_v9 }
 0x2d9   : > { %v1355_v61 = vmul.f32 0.5, %v1354_v56 }
 0x2db   : > { %v1356_v55 = vsub.f32 1.5, %v1355_v61  ;;  %v8166_v61 = vld [vmem:[#allocation28_spill] sm:$0xff] }
 0x2dc   : > { %v4195_v20 = vpop.eup %4194  ;;  %v812_v35 = vmul.f32 %v4848_v32, %v8166_v61 }
 0x2dd   : > { %v1357_v26 = vmul.f32 %v4193_v8, %v1356_v55  ;;  %v1063_v19 = vmul.f32 %v4195_v20, %v1030_v52  ;;  %vm1069_vm9 = vweird.f32 %v4195_v20  ;;  %v5528_v55 = vpop.f32.mrf.mxu2 }
 0x2de   : > { %vm1070_vm11 = vmor %vm1068_vm10, %vm1069_vm9 }
 0x2df   : > { %v1361_v11 = vsel %vm1360_vm8, %v4193_v8, %v1357_v26  ;;  %v1064_v48 = vmul.f32 %v4195_v20, %v1063_v19 }
 0x2e0   : > { %v1411_v25 = vmul.f32 %v1361_v11, %v5223_v4  ;;  %v1419_v4 = vmul.f32 %v5502_v41, %v1383_v15 }
 0x2e1   : > { %v1065_v54 = vmul.f32 0.5, %v1064_v48 }
 0x2e2   : > { %v1447_v10 = vmul.f32 %v5502_v41, %v1411_v25  ;;  %v1455_v34 = vadd.f32 %v5512_v47, %v1419_v4 }
 0x2e3   : > { %v1066_v2 = vsub.f32 1.5, %v1065_v54 }
 0x2e4   : > { %v1483_v22 = vadd.f32 %v5512_v47, %v1447_v10  ;;  %v1487_v8 = vmax.f32 %v1455_v34, 0.0  ;;  %v2612_v34 = vld [vmem:[%s8103_s11 + $0x10] sm:$0xff] }
 0x2e5   : > { %v1067_v50 = vmul.f32 %v4195_v20, %v1066_v2 }
 0x2e6   : > { %v1515_v63 = vmax.f32 %v1483_v22, 0.0  ;;  %v8168_v22 = vld [vmem:[#allocation29_spill] sm:$0xff] }
 0x2e7   : > { %v1071_v23 = vsel %vm1070_vm11, %v4195_v20, %v1067_v50  ;;  %v8167_v20 = vld [vmem:[#allocation23_spill] sm:$0xff]  ;;  %v813_v50 = vmul.f32 %v4848_v32, %v8168_v22 }
 0x2e8   : > { %v1382_v39 = vmul.f32 %v1071_v23, %v5228_v45  ;;  %v1532_v57 = vpack.c.bf16 %v1515_v63, %v1514_v33  ;;  %v5532_v26 = vsub.f32 %v8167_v20, %v812_v35  ;;  %v815_v20 = vmul.f32 %v4848_v32, %v5163_v38  ;;  %v2611_v38 = vld [vmem:[%s8103_s11 + $0x8] sm:$0xff] }
 0x2ea   : > { %v1418_v40 = vmul.f32 %v5502_v41, %v1382_v39  ;;  %4003 = vmatmul.msk.bf16.gmra.mxu3 %vm702_vm2, %v1532_v57  ;;  %v876_v51 = vmul.f32 %v5532_v26, %v5532_v26  ;;  %v1738_v57 = vpop.f32.mrf.mxu2 }
 0x2ec   : > { %v1454_v1 = vadd.f32 %v5512_v47, %v1418_v40  ;;  %v2613_v40 = vld [vmem:[%s8103_s11 + $0x18] sm:$0xff] }
 0x2ed   : > { %v2615_v35 = vpack.c.bf16 %v2613_v40, %v2612_v34 }
 0x2ee   : > { %v1486_v43 = vmax.f32 %v1454_v1, 0.0 }
 0x2ef   : > { %2674 = vmatpush.bf16.msrb.mxu3 %v2615_v35 }
 0x2f0   : > { %v1518_v52 = vpack.c.bf16 %v1487_v8, %v1486_v43 }
 0x2f2   : > { %3989 = vmatmul.msk.bf16.vlgmr.msrb.gmra.mxu0 %vm702_vm2, %v1518_v52  ;;  %v920_v52 = vsel %vm702_vm2, %v876_v51, 0.0  ;;  %v2610_v51 = vld [vmem:[%s8103_s11] sm:$0xff] }
 0x314   : > { %v994_v9 = vpop.xlane.xlu2 %993 }
 0x315   : > { %v1028_v62 = vmul.f32 %v994_v9, %v4848_v32  ;;  %v997_v7 = vpop.xlane.xlu0 %996  ;;  %v8169_v9 = vld [vmem:[#allocation25_spill] sm:$0xff] }
 0x316   : > { %v1029_v45 = vmul.f32 %v997_v7, %v4848_v32  ;;  %v8170_v7 = vld [vmem:[#allocation31_spill] sm:$0xff] }
 0x317   : > { %v1060_v56 = vadd.f32 1e-05, %v1028_v62  ;;  %v5566_v62 = vsub.f32 %v8169_v9, %v813_v50 }
 0x318   : > { %v5526_v36 = vadd.f32 1e-05, %v1029_v45  ;;  %v814_v45 = vmul.f32 %v4848_v32, %v8170_v7 }
 0x319   : > { %4196 = vrsqrt.f32 %v1060_v56  ;;  %vm1368_vm13 = vweird.f32 %v1060_v56 }
 0x31a   : > { %4198 = vrsqrt.f32 %v5526_v36  ;;  %vm1378_vm3 = vweird.f32 %v5526_v36 }
 0x31c   : > { %v1803_v19 = vpop.xlane.xlu2 %1802  ;;  %v1980_v11 = vpop.xlane.xlu1 %1979 }
 0x31d   : > { %v1887_v27 = vmul.f32 %v1803_v19, %v4848_v32  ;;  %v910_v49 = vpop.xlane.xlu0 %909  ;;  %v2074_v15 = vmul.f32 %v1980_v11, %v4848_v32 }
 0x31e   : > { %v1000_v54 = vmul.f32 %v910_v49, %v4848_v32 }
 0x31f   : > { %v4197_v48 = vpop.eup %4196  ;;  %v5536_v25 = vsub.f32 %v5322_v0, %v1887_v27  ;;  %v5548_v33 = vadd.f32 1e-05, %v2074_v15 }
 0x320   : > { %v1363_v10 = vmul.f32 %v4197_v48, %v1060_v56  ;;  %v5542_v2 = vpop.eup %4198  ;;  %v5546_v4 = vadd.f32 1e-05, %v1000_v54  ;;  %vm1369_vm12 = vweird.f32 %v4197_v48  ;;  %v2614_v56 = vpack.c.bf16 %v2611_v38, %v2610_v51 }
 0x321   : > { %v1951_v0 = vmul.f32 %v5536_v25, %v5536_v25  ;;  %v1373_v23 = vmul.f32 %v5542_v2, %v5526_v36  ;;  %vm1379_vm14 = vweird.f32 %v5542_v2  ;;  %vm1370_vm15 = vmor %vm1368_vm13, %vm1369_vm12  ;;  %vm2144_vm6 = vweird.f32 %v5548_v33 }
 0x322   : > { %v1364_v63 = vmul.f32 %v4197_v48, %v1363_v10  ;;  %4200 = vrsqrt.f32 %v5546_v4  ;;  %vm1380_vm4 = vmor %vm1378_vm3, %vm1379_vm14  ;;  %2675 = vmatpush.bf16.msrb.mxu3 %v2614_v56  ;;  %vm1088_vm11 = vweird.f32 %v5546_v4 }
 0x323   : > { %v1993_v39 = vsel %vm702_vm2, %v1951_v0, 0.0  ;;  %v1374_v43 = vmul.f32 %v5542_v2, %v1373_v23  ;;  %4202 = vrsqrt.f32 %v5548_v33 }
 0x324   : > { %v1365_v1 = vmul.f32 0.5, %v1364_v63  ;;  %v1983_v8 = vpop.xlane.xlu2 %1982  ;;  %1994 = vadd.xlane.f32.xlu1 %v1993_v39  ;;  %v1809_v11 = vpop.xlane.xlu1 %1808  ;;  %v877_v39 = vmul.f32 %v5566_v62, %v5566_v62 }
 0x325   : > { %v2075_v61 = vmul.f32 %v1983_v8, %v4848_v32  ;;  %v1375_v27 = vmul.f32 0.5, %v1374_v43  ;;  %v1806_v49 = vpop.xlane.xlu0 %1805  ;;  %v1889_v10 = vmul.f32 %v1809_v11, %v4848_v32  ;;  %v8171_v8 = vld [vmem:[#allocation27_spill] sm:$0xff] }
 0x326   : > { %v1366_v19 = vsub.f32 1.5, %v1365_v1  ;;  %v1888_v15 = vmul.f32 %v1806_v49, %v4848_v32  ;;  %v5603_v9 = vsub.f32 %v8171_v8, %v814_v45  ;;  %v1741_v49 = vpop.f32.mrf.mxu2 }
 0x327   : > { %v5573_v54 = vadd.f32 1e-05, %v2075_v61  ;;  %v1376_v50 = vsub.f32 1.5, %v1375_v27  ;;  %v5592_v23 = vsub.f32 %v5395_v46, %v1889_v10  ;;  %v5624_v27 = vld [vmem:[%s8100_s8] ss:$0 sm:$0xff] }
 0x328   : > { %v1367_v22 = vmul.f32 %v4197_v48, %v1366_v19  ;;  %v5584_v0 = vpop.eup %4200  ;;  %v5589_v63 = vsub.f32 %v5388_v13, %v1888_v15  ;;  %v8172_v13 = vld [vmem:[#allocation30_spill] sm:$0xff] }
 0x329   : > { %4204 = vrsqrt.f32 %v5573_v54  ;;  %v5596_v34 = vpop.eup %4202  ;;  %v1377_v1 = vmul.f32 %v5542_v2, %v1376_v50  ;;  %v1083_v43 = vmul.f32 %v5584_v0, %v5546_v4  ;;  %v5606_v7 = vsub.f32 %v8172_v13, %v815_v20 }
 0x32a   : > { %v1371_v40 = vsel %vm1370_vm15, %v4197_v48, %v1367_v22  ;;  %v2139_v48 = vmul.f32 %v5596_v34, %v5548_v33  ;;  %v1952_v45 = vmul.f32 %v5589_v63, %v5589_v63  ;;  %v1953_v20 = vmul.f32 %v5592_v23, %v5592_v23 }
 0x32b   : > { %v1412_v46 = vmul.f32 %v1371_v40, %v5297_v5  ;;  %v1381_v36 = vsel %vm1380_vm4, %v5542_v2, %v1377_v1  ;;  %v1084_v61 = vmul.f32 %v5584_v0, %v1083_v43  ;;  %v5628_v2 = vadd.f32 %v5624_v27, %v5528_v55 }
 0x32c   : > { %v913_v35 = vpop.xlane.xlu2 %912  ;;  %921 = vadd.xlane.f32.xlu1 %v920_v52  ;;  %v1413_v5 = vmul.f32 %v1381_v36, %v5310_v60  ;;  %v2140_v19 = vmul.f32 %v5596_v34, %v2139_v48  ;;  %v1996_v11 = vsel %vm702_vm2, %v1952_v45, 0.0  ;;  %v1999_v10 = vsel %vm702_vm2, %v1953_v20, 0.0 }
 0x32d   : > { %v1001_v52 = vmul.f32 %v913_v35, %v4848_v32  ;;  %v1986_v15 = vpop.xlane.xlu0 %1985  ;;  %v5634_v60 = vadd.f32 %v5624_v27, %v1738_v57  ;;  %v1448_v51 = vmul.f32 %v5502_v41, %v1412_v46  ;;  %1997 = vadd.xlane.f32.xlu2 %v1996_v11  ;;  %2000 = vadd.xlane.f32.xlu0 %v1999_v10  ;;  %v1085_v40 = vmul.f32 0.5, %v1084_v61 }
 0x32e   : > { %v2141_v22 = vmul.f32 0.5, %v2140_v19  ;;  %v2076_v55 = vmul.f32 %v1986_v15, %v4848_v32  ;;  %v1449_v56 = vmul.f32 %v5502_v41, %v1413_v5  ;;  %v923_v57 = vsel %vm702_vm2, %v877_v39, 0.0 }
 0x32f   : > { %v5637_v38 = vpop.eup %4204  ;;  %v5639_v50 = vadd.f32 1e-05, %v1001_v52  ;;  %v1822_v13 = vsel %vm702_vm2, %v5628_v2, 0.0  ;;  %v1484_v48 = vadd.f32 %v5512_v47, %v1448_v51  ;;  %v5655_v36 = vmul.f32 %v5603_v9, %v5603_v9 }
 0x330   : > { %v2149_v1 = vmul.f32 %v5637_v38, %v5573_v54  ;;  %v2142_v43 = vsub.f32 1.5, %v2141_v22  ;;  %v5647_v8 = vadd.f32 1e-05, %v2076_v55  ;;  %v5659_v61 = vmul.f32 %v5606_v7, %v5606_v7 }
 0x331   : > { %4206 = vrsqrt.f32 %v5639_v50  ;;  %v1825_v39 = vsel %vm702_vm2, %v5634_v60, 0.0  ;;  %v1485_v35 = vadd.f32 %v5512_v47, %v1449_v56  ;;  %v5666_v45 = vadd.f32 %v5624_v27, %v1741_v49 }
 0x332   : > { %v2150_v46 = vmul.f32 %v5637_v38, %v2149_v1  ;;  %4208 = vrsqrt.f32 %v5647_v8  ;;  %v1086_v20 = vsub.f32 1.5, %v1085_v40  ;;  %v2143_v5 = vmul.f32 %v5596_v34, %v2142_v43 }
 0x333   : > { %vm2145_vm5 = vweird.f32 %v5596_v34  ;;  %vm2154_vm7 = vweird.f32 %v5573_v54  ;;  %vm1089_vm8 = vweird.f32 %v5584_v0  ;;  %vm2155_vm9 = vweird.f32 %v5637_v38  ;;  %v5726_v54 = vld [vmem:[%s8101_s9] ss:$0 sm:$0xff] }
 0x334   : > { %v2151_v19 = vmul.f32 0.5, %v2150_v46  ;;  %v1812_v52 = vpop.xlane.xlu2 %1811  ;;  %1823 = vadd.xlane.f32.xlu1 %v1822_v13  ;;  %v1989_v11 = vpop.xlane.xlu1 %1988  ;;  %v1516_v22 = vmax.f32 %v1484_v48, 0.0  ;;  %vm5680_vm10 = vmor %vm2144_vm6, %vm2145_vm5  ;;  %v1517_v43 = vmax.f32 %v1485_v35, 0.0  ;;  %v1087_v46 = vmul.f32 %v5584_v0, %v1086_v20 }
 0x335   : > { %v1890_v15 = vmul.f32 %v1812_v52, %v4848_v32  ;;  %v2077_v10 = vmul.f32 %v1989_v11, %v4848_v32  ;;  %v1815_v51 = vpop.xlane.xlu0 %1814  ;;  %1826 = vadd.xlane.f32.xlu2 %v1825_v39  ;;  %924 = vadd.xlane.f32.xlu0 %v923_v57  ;;  %v1743_v13 = vpop.f32.mrf.mxu2  ;;  %v2147_v48 = vsel %vm5680_vm10, %v5596_v34, %v2143_v5  ;;  %vm2156_vm12 = vmor %vm2154_vm7, %vm2155_vm9  ;;  %v1828_v34 = vsel %vm702_vm2, %v5666_v45, 0.0 }
 0x336   : > { %v2152_v49 = vsub.f32 1.5, %v2151_v19  ;;  %v1891_v40 = vmul.f32 %v1815_v51, %v4848_v32  ;;  %v5715_v20 = vadd.f32 %v5624_v27, %v1743_v13  ;;  %vm5719_vm13 = vmor %vm1088_vm11, %vm1089_vm8  ;;  %v1533_v11 = vpack.c.bf16 %v1517_v43, %v1516_v22 }
 0x337   : > { %v5676_v55 = vpop.eup %4206  ;;  %v5685_v33 = vsub.f32 %v5434_v14, %v1890_v15  ;;  %v5688_v1 = vadd.f32 1e-05, %v2077_v10  ;;  %v1091_v10 = vsel %vm5719_vm13, %v5584_v0, %v1087_v46  ;;  %vm1098_vm15 = vweird.f32 %v5639_v50 }
 0x338   : > { %v2153_v19 = vmul.f32 %v5637_v38, %v2152_v49  ;;  %v1093_v14 = vmul.f32 %v5676_v55, %v5639_v50  ;;  %v5697_v52 = vpop.eup %4208  ;;  %v5705_v57 = vsub.f32 %v5448_v29, %v1891_v40  ;;  %4004 = vmatmul.msk.bf16.gmra.mxu3 %vm702_vm2, %v1533_v11  ;;  %vm1099_vm14 = vweird.f32 %v5676_v55  ;;  %v5756_v29 = vld [vmem:[%s8102_s10] ss:$0 sm:$0xff] }
 0x339   : > { %4210 = vrsqrt.f32 %v5688_v1  ;;  %v2159_v4 = vmul.f32 %v5697_v52, %v5647_v8  ;;  %v1954_v15 = vmul.f32 %v5685_v33, %v5685_v33  ;;  %vm1100_vm3 = vmor %vm1098_vm15, %vm1099_vm14  ;;  %vm2165_vm4 = vweird.f32 %v5697_v52 }
 0x33a   : > { %v2157_v39 = vsel %vm2156_vm12, %v5637_v38, %v2153_v19  ;;  %v1094_v35 = vmul.f32 %v5676_v55, %v1093_v14  ;;  %v2458_v38 = vmul.f32 %v2147_v48, %v5345_v28  ;;  %v1955_v40 = vmul.f32 %v5705_v57, %v5705_v57 }
 0x33b   : > { %v2459_v5 = vmul.f32 %v2157_v39, %v5391_v53  ;;  %v2160_v51 = vmul.f32 %v5697_v52, %v2159_v4  ;;  %v2002_v22 = vsel %vm702_vm2, %v1954_v15, 0.0  ;;  %vm2164_vm5 = vweird.f32 %v5647_v8 }
 0x33c   : > { %v1095_v49 = vmul.f32 0.5, %v1094_v35  ;;  %v919_v56 = vpop.xlane.xlu2 %918  ;;  %v916_v13 = vpop.xlane.xlu1 %915  ;;  %2003 = vadd.xlane.f32.xlu1 %v2002_v22  ;;  %v2005_v46 = vsel %vm702_vm2, %v1955_v40, 0.0  ;;  %v2494_v39 = vmul.f32 %v5726_v54, %v2458_v38  ;;  %v929_v22 = vsel %vm702_vm2, %v5659_v61, 0.0  ;;  %vm5781_vm6 = vmor %vm2164_vm5, %vm2165_vm4 }
 0x33d   : > { %v2495_v28 = vmul.f32 %v5726_v54, %v2459_v5  ;;  %v1003_v53 = vmul.f32 %v919_v56, %v4848_v32  ;;  %v1002_v43 = vmul.f32 %v916_v13, %v4848_v32  ;;  %v2161_v0 = vmul.f32 0.5, %v2160_v51  ;;  %v5745_v19 = vpop.xlane.xlu0 %1991  ;;  %2006 = vadd.xlane.f32.xlu2 %v2005_v46  ;;  %1829 = vadd.xlane.f32.xlu0 %v1828_v34  ;;  %v1746_v34 = vpop.f32.mrf.mxu2 }
 0x33e   : > { %v1096_v48 = vsub.f32 1.5, %v1095_v49  ;;  %v1384_v5 = vmul.f32 %v1091_v10, %v5283_v42  ;;  %v1831_v42 = vsel %vm702_vm2, %v5715_v20, 0.0  ;;  %v2530_v40 = vadd.f32 %v5756_v29, %v2494_v39 }
 0x33f   : > { %v4211_v14 = vpop.eup %4210  ;;  %v5749_v35 = vadd.f32 1e-05, %v1003_v53  ;;  %v5751_v4 = vadd.f32 1e-05, %v1002_v43  ;;  %v2162_v15 = vsub.f32 1.5, %v2161_v0  ;;  %v2531_v50 = vadd.f32 %v5756_v29, %v2495_v28 }
 0x340   : > { %v1097_v11 = vmul.f32 %v5676_v55, %v1096_v48  ;;  %v2169_v38 = vmul.f32 %v4211_v14, %v5688_v1  ;;  %v1420_v13 = vmul.f32 %v5502_v41, %v1384_v5  ;;  %vm2174_vm7 = vweird.f32 %v5688_v1 }
 0x341   : > { %4212 = vrsqrt.f32 %v5749_v35  ;;  %v2163_v56 = vmul.f32 %v5697_v52, %v2162_v15  ;;  %v2563_v48 = vmax.f32 %v2531_v50, 0.0  ;;  %vm2175_vm8 = vweird.f32 %v4211_v14 }
 0x342   : > { %v1101_v49 = vsel %vm1100_vm3, %v5676_v55, %v1097_v11  ;;  %v2170_v51 = vmul.f32 %v4211_v14, %v2169_v38  ;;  %4214 = vrsqrt.f32 %v5751_v4  ;;  %v926_v55 = vsel %vm702_vm2, %v5655_v36, 0.0  ;;  %vm2176_vm9 = vmor %vm2174_vm7, %vm2175_vm8 }
 0x343   : > { %v1385_v10 = vmul.f32 %v1101_v49, %v5401_v12  ;;  %v5787_v39 = vadd.f32 %v5624_v27, %v1746_v34  ;;  %v2167_v8 = vsel %vm5781_vm6, %v5697_v52, %v2163_v56  ;;  %v2562_v15 = vmax.f32 %v2530_v40, 0.0 }
 0x344   : > { %v2171_v28 = vmul.f32 0.5, %v2170_v51  ;;  %v1818_v53 = vpop.xlane.xlu2 %1817  ;;  %1832 = vadd.xlane.f32.xlu1 %v1831_v42  ;;  %v1456_v34 = vadd.f32 %v5512_v47, %v1420_v13  ;;  %v2460_v56 = vmul.f32 %v2167_v8, %v5420_v6  ;;  %vm1118_vm12 = vweird.f32 %v5749_v35 }
 0x345   : > { %v1421_v43 = vmul.f32 %v5502_v41, %v1385_v10  ;;  %v1892_v12 = vmul.f32 %v1818_v53, %v4848_v32  ;;  %v1821_v36 = vpop.xlane.xlu0 %1820  ;;  %927 = vadd.xlane.f32.xlu2 %v926_v55  ;;  %930 = vadd.xlane.f32.xlu0 %v929_v22  ;;  %v2594_v42 = vpack.c.bf16 %v2563_v48, %v2562_v15  ;;  %v1748_v22 = vpop.f32.mrf.mxu2  ;;  %vm1108_vm14 = vweird.f32 %v5751_v4 }
 0x346   : > { %v2172_v46 = vsub.f32 1.5, %v2171_v28  ;;  %v1893_v11 = vmul.f32 %v1821_v36, %v4848_v32  ;;  %v816_v10 = vmul.f32 %v4848_v32, %v5287_v21  ;;  %v2496_v15 = vmul.f32 %v5726_v54, %v2460_v56 }
 0x347   : > { %v4213_v61 = vpop.eup %4212  ;;  %v5793_v5 = vsub.f32 %v5484_v44, %v1892_v12  ;;  %v1457_v51 = vadd.f32 %v5512_v47, %v1421_v43  ;;  %v1834_v43 = vsel %vm702_vm2, %v5787_v39, 0.0  ;;  %v1488_v12 = vmax.f32 %v1456_v34, 0.0 }
 0x348   : > { %v4215_v38 = vpop.eup %4214  ;;  %v2173_v50 = vmul.f32 %v4211_v14, %v2172_v46  ;;  %v1113_v49 = vmul.f32 %v4213_v61, %v5749_v35  ;;  %v5804_v52 = vsub.f32 %v5489_v37, %v1893_v11  ;;  %4021 = vmatmul.msk.bf16.vlgmr.msrb.gmra.mxu3 %vm702_vm2, %v2594_v42  ;;  %v5821_v0 = vsub.f32 %v5107_v31, %v816_v10 }
 0x349   : > { %v1103_v44 = vmul.f32 %v4215_v38, %v5751_v4  ;;  %v1956_v1 = vmul.f32 %v5793_v5, %v5793_v5  ;;  %v1489_v21 = vmax.f32 %v1457_v51, 0.0  ;;  %vm1119_vm10 = vweird.f32 %v4213_v61 }
 0x34a   : > { %v2177_v40 = vsel %vm2176_vm9, %v4211_v14, %v2173_v50  ;;  %v1114_v28 = vmul.f32 %v4213_v61, %v1113_v49  ;;  %v1957_v55 = vmul.f32 %v5804_v52, %v5804_v52  ;;  %vm1109_vm11 = vweird.f32 %v4215_v38  ;;  %vm1120_vm13 = vmor %vm1118_vm12, %vm1119_vm10 }
 0x34b   : > { %v2461_v13 = vmul.f32 %v2177_v40, %v5445_v24  ;;  %v1104_v53 = vmul.f32 %v4215_v38, %v1103_v44  ;;  %v2008_v6 = vsel %vm702_vm2, %v1956_v1, 0.0  ;;  %v1519_v36 = vpack.c.bf16 %v1489_v21, %v1488_v12  ;;  %vm1110_vm15 = vmor %vm1108_vm14, %vm1109_vm11 }
 0x34c   : > { %v1115_v37 = vmul.f32 0.5, %v1114_v28  ;;  %v2011_v24 = vsel %vm702_vm2, %v1957_v55, 0.0  ;;  %2009 = vadd.xlane.f32.xlu1 %v2008_v6  ;;  %v5824_v11 = vadd.f32 %v5624_v27, %v1748_v22  ;;  %v880_v51 = vmul.f32 %v5821_v0, %v5821_v0 }
 0x34d   : > { %v1105_v48 = vmul.f32 0.5, %v1104_v53  ;;  %v2497_v14 = vmul.f32 %v5726_v54, %v2461_v13  ;;  %2012 = vadd.xlane.f32.xlu2 %v2011_v24  ;;  %1835 = vadd.xlane.f32.xlu0 %v1834_v43  ;;  %v2532_v35 = vadd.f32 %v5756_v29, %v2496_v15  ;;  %v1751_v28 = vpop.f32.mrf.mxu2  ;;  %v2078_v12 = vmul.f32 %v5745_v19, %v4848_v32  ;;  %v2761_v19 = vld [vmem:[%s8105_s13 + $0x20] sm:$0xff] }
 0x34e   : > { %v1116_v46 = vsub.f32 1.5, %v1115_v37  ;;  %3990 = vmatmul.msk.bf16.gmra.mxu0 %vm702_vm2, %v1519_v36  ;;  %v1837_v10 = vsel %vm702_vm2, %v5824_v11, 0.0  ;;  %v932_v13 = vsel %vm702_vm2, %v880_v51, 0.0 }
 0x34f   : > { %v1106_v8 = vsub.f32 1.5, %v1105_v48  ;;  %v2533_v49 = vadd.f32 %v5756_v29, %v2497_v14  ;;  %v2564_v53 = vmax.f32 %v2532_v35, 0.0  ;;  %v2110_v48 = vadd.f32 1e-05, %v2078_v12 }
 0x350   : > { %v1117_v50 = vmul.f32 %v4213_v61, %v1116_v46 }
 0x351   : > { %v1107_v31 = vmul.f32 %v4215_v38, %v1106_v8  ;;  %v2565_v4 = vmax.f32 %v2533_v49, 0.0  ;;  %4216 = vrsqrt.f32 %v2110_v48  ;;  %v2762_v49 = vld [vmem:[%s8105_s13 + $0x28] sm:$0xf]  ;;  %vm2184_vm4 = vweird.f32 %v2110_v48 }
 0x352   : > { %v1121_v34 = vsel %vm1120_vm13, %v4213_v61, %v1117_v50  ;;  %v2765_v51 = vpack.c.bf16 %v2762_v49, %v2761_v19 }
 0x353   : > { %v1387_v44 = vmul.f32 %v1121_v34, %v5462_v58  ;;  %v1111_v42 = vsel %vm1110_vm15, %v4215_v38, %v1107_v31  ;;  %v5843_v38 = vadd.f32 %v5624_v27, %v1751_v28  ;;  %v2595_v55 = vpack.c.bf16 %v2565_v4, %v2564_v53 }
 0x354   : > { %v1386_v56 = vmul.f32 %v1111_v42, %v5459_v18  ;;  %1838 = vadd.xlane.f32.xlu1 %v1837_v10 }
 0x355   : > { %v1423_v40 = vmul.f32 %v5502_v41, %v1387_v44  ;;  %933 = vadd.xlane.f32.xlu2 %v932_v13  ;;  %v1840_v37 = vsel %vm702_vm2, %v5843_v38, 0.0  ;;  %v5852_v21 = vpop.f32.mrf.mxu2  ;;  %v2771_v44 = vsel %vm609_vm0, %v2765_v51, 0 }
 0x356   : > { %v1422_v61 = vmul.f32 %v5502_v41, %v1386_v56  ;;  %2778 = vmatpush.bf16.msrb.mxu1 %v2771_v44 }
 0x357   : > { %v1459_v58 = vadd.f32 %v5512_v47, %v1423_v40  ;;  %v4217_v24 = vpop.eup %4216 }
 0x358   : > { %v1458_v1 = vadd.f32 %v5512_v47, %v1422_v61  ;;  %4022 = vmatmul.msk.bf16.gmra.mxu3 %vm702_vm2, %v2595_v55  ;;  %v2179_v14 = vmul.f32 %v4217_v24, %v2110_v48  ;;  %vm2185_vm3 = vweird.f32 %v4217_v24 }
 0x359   : > { %v1491_v18 = vmax.f32 %v1459_v58, 0.0  ;;  %vm2186_vm5 = vmor %vm2184_vm4, %vm2185_vm3 }
 0x35a   : > { %v1490_v22 = vmax.f32 %v1458_v1, 0.0  ;;  %v2180_v46 = vmul.f32 %v4217_v24, %v2179_v14 }
 0x35c   : > { %v1520_v43 = vpack.c.bf16 %v1491_v18, %v1490_v22  ;;  %v2181_v8 = vmul.f32 0.5, %v2180_v46 }
 0x35d   : > { %1841 = vadd.xlane.f32.xlu2 %v1840_v37  ;;  %v5854_v6 = vpop.f32.mrf.mxu2  ;;  %v817_v37 = vmul.f32 %v4848_v32, %v5380_v30 }
 0x35e   : > { %3991 = vmatmul.msk.bf16.gmra.mxu0 %vm702_vm2, %v1520_v43  ;;  %v2182_v34 = vsub.f32 1.5, %v2181_v8 }
 0x360   : > { %v2183_v10 = vmul.f32 %v4217_v24, %v2182_v34 }
 0x362   : > { %v2187_v13 = vsel %vm2186_vm5, %v4217_v24, %v2183_v10 }
 0x363   : > { %v2462_v43 = vmul.f32 %v2187_v13, %v5475_v17 }
 0x365   : > { %v5856_v36 = vpop.f32.mrf.mxu2  ;;  %v2498_v19 = vmul.f32 %v5726_v54, %v2462_v43 }
 0x36d   : > { %v5866_v42 = vpop.f32.mrf.mxu2 }
 0x375   : > { %v5882_v24 = vpop.f32.mrf.mxu2 }
 0x397   : > { %v1995_v15 = vpop.xlane.xlu1 %1994 }
 0x398   : > { %v2079_v50 = vmul.f32 %v1995_v15, %v4848_v32  ;;  %v5889_v15 = vsub.f32 %v5171_v16, %v817_v37 }
 0x39a   : > { %v2111_v31 = vadd.f32 1e-05, %v2079_v50 }
 0x39c   : > { %4218 = vrsqrt.f32 %v2111_v31  ;;  %vm2194_vm6 = vweird.f32 %v2111_v31 }
 0x39f   : > { %v922_v35 = vpop.xlane.xlu1 %921 }
 0x3a0   : > { %v1004_v56 = vmul.f32 %v922_v35, %v4848_v32  ;;  %v1998_v4 = vpop.xlane.xlu2 %1997  ;;  %v2001_v28 = vpop.xlane.xlu0 %2000 }
 0x3a1   : > { %v2080_v58 = vmul.f32 %v1998_v4, %v4848_v32  ;;  %v2081_v1 = vmul.f32 %v2001_v28, %v4848_v32 }
 0x3a2   : > { %v4219_v40 = vpop.eup %4218  ;;  %v5869_v61 = vadd.f32 1e-05, %v1004_v56 }
 0x3a3   : > { %v2189_v53 = vmul.f32 %v4219_v40, %v2111_v31  ;;  %v5874_v18 = vadd.f32 1e-05, %v2080_v58  ;;  %v5876_v22 = vadd.f32 1e-05, %v2081_v1  ;;  %vm2195_vm0 = vweird.f32 %v4219_v40 }
 0x3a4   : > { %4220 = vrsqrt.f32 %v5869_v61  ;;  %vm2196_vm7 = vmor %vm2194_vm6, %vm2195_vm0  ;;  %v5921_v1 = vadd.f32 %v5756_v29, %v2498_v19  ;;  %vm1128_vm9 = vweird.f32 %v5869_v61 }
 0x3a5   : > { %v2190_v55 = vmul.f32 %v4219_v40, %v2189_v53  ;;  %4222 = vrsqrt.f32 %v5874_v18  ;;  %v881_v53 = vmul.f32 %v5889_v15, %v5889_v15  ;;  %vm2204_vm10 = vweird.f32 %v5874_v18 }
 0x3a6   : > { %4224 = vrsqrt.f32 %v5876_v22  ;;  %vm2214_vm11 = vweird.f32 %v5876_v22 }
 0x3a7   : > { %v2191_v12 = vmul.f32 0.5, %v2190_v55  ;;  %v1824_v48 = vpop.xlane.xlu1 %1823 }
 0x3a8   : > { %v1894_v14 = vmul.f32 %v1824_v48, %v4848_v32  ;;  %v1827_v30 = vpop.xlane.xlu2 %1826  ;;  %v925_v50 = vpop.xlane.xlu0 %924 }
 0x3a9   : > { %v2192_v46 = vsub.f32 1.5, %v2191_v12  ;;  %v1895_v51 = vmul.f32 %v1827_v30, %v4848_v32  ;;  %v1005_v44 = vmul.f32 %v925_v50, %v4848_v32  ;;  %v5933_v30 = vadd.f32 %v5624_v27, %v5852_v21 }
 0x3aa   : > { %v5886_v8 = vpop.eup %4220  ;;  %v5892_v17 = vsub.f32 %v5628_v2, %v1894_v14 }
 0x3ab   : > { %v2193_v49 = vmul.f32 %v4219_v40, %v2192_v46  ;;  %v1123_v34 = vmul.f32 %v5886_v8, %v5869_v61  ;;  %v5901_v10 = vpop.eup %4222  ;;  %v5905_v56 = vsub.f32 %v5634_v60, %v1895_v51  ;;  %v5912_v13 = vadd.f32 1e-05, %v1005_v44  ;;  %v5929_v46 = vpop.f32.mrf.mxu2 }
 0x3ac   : > { %v1958_v16 = vmul.f32 %v5892_v17, %v5892_v17  ;;  %v5907_v31 = vpop.eup %4224  ;;  %v2199_v28 = vmul.f32 %v5901_v10, %v5874_v18  ;;  %v935_v51 = vsel %vm702_vm2, %v881_v53, 0.0  ;;  %v5939_v44 = vadd.f32 %v5624_v27, %v5854_v6 }
 0x3ad   : > { %v2197_v35 = vsel %vm2196_vm7, %v4219_v40, %v2193_v49  ;;  %v1124_v2 = vmul.f32 %v5886_v8, %v1123_v34  ;;  %v2209_v40 = vmul.f32 %v5907_v31, %v5876_v22  ;;  %v1959_v60 = vmul.f32 %v5905_v56, %v5905_v56 }
 0x3ae   : > { %v2463_v4 = vmul.f32 %v2197_v35, %v5536_v25  ;;  %v2200_v25 = vmul.f32 %v5901_v10, %v2199_v28  ;;  %4226 = vrsqrt.f32 %v5912_v13  ;;  %v2014_v55 = vsel %vm702_vm2, %v1958_v16, 0.0 }
 0x3af   : > { %v1125_v58 = vmul.f32 0.5, %v1124_v2  ;;  %v2210_v37 = vmul.f32 %v5907_v31, %v2209_v40  ;;  %v2017_v12 = vsel %vm702_vm2, %v1959_v60, 0.0  ;;  %2015 = vadd.xlane.f32.xlu0 %v2014_v55  ;;  %v2004_v48 = vpop.xlane.xlu1 %2003  ;;  %v2566_v2 = vmax.f32 %v5921_v1, 0.0 }
 0x3b0   : > { %v2499_v14 = vmul.f32 %v5726_v54, %v2463_v4  ;;  %v2201_v50 = vmul.f32 0.5, %v2200_v25  ;;  %2018 = vadd.xlane.f32.xlu1 %v2017_v12  ;;  %v2007_v19 = vpop.xlane.xlu2 %2006  ;;  %v1830_v49 = vpop.xlane.xlu0 %1829  ;;  %v2082_v34 = vmul.f32 %v2004_v48, %v4848_v32  ;;  %vm1129_vm8 = vweird.f32 %v5886_v8 }
 0x3b1   : > { %v1126_v43 = vsub.f32 1.5, %v1125_v58  ;;  %v2083_v16 = vmul.f32 %v2007_v19, %v4848_v32  ;;  %v1896_v35 = vmul.f32 %v1830_v49, %v4848_v32  ;;  %v2211_v21 = vmul.f32 0.5, %v2210_v37  ;;  %vm5975_vm12 = vmor %vm1128_vm9, %vm1129_vm8  ;;  %v2760_v19 = vld [vmem:[%s8105_s13 + $0x18] sm:$0xff] }
 0x3b2   : > { %v5947_v4 = vadd.f32 %v5624_v27, %v5856_v36  ;;  %v5949_v28 = vadd.f32 1e-05, %v2082_v34  ;;  %v2535_v58 = vadd.f32 %v5756_v29, %v2499_v14  ;;  %v2202_v1 = vsub.f32 1.5, %v2201_v50  ;;  %v2759_v50 = vld [vmem:[%s8105_s13 + $0x10] sm:$0xff] }
 0x3b3   : > { %v1127_v53 = vmul.f32 %v5886_v8, %v1126_v43  ;;  %v5952_v40 = vadd.f32 1e-05, %v2083_v16  ;;  %v5955_v6 = vsub.f32 %v5666_v45, %v1896_v35  ;;  %v1843_v36 = vsel %vm702_vm2, %v5933_v30, 0.0 }
 0x3b4   : > { %v5958_v60 = vpop.eup %4226  ;;  %4228 = vrsqrt.f32 %v5949_v28  ;;  %v5969_v45 = vadd.f32 %v5624_v27, %v5866_v42  ;;  %v2212_v55 = vsub.f32 1.5, %v2211_v21  ;;  %v1846_v43 = vsel %vm702_vm2, %v5939_v44, 0.0 }
 0x3b5   : > { %v1133_v25 = vmul.f32 %v5958_v60, %v5912_v13  ;;  %4230 = vrsqrt.f32 %v5952_v40  ;;  %v1960_v37 = vmul.f32 %v5955_v6, %v5955_v6  ;;  %vm2205_vm13 = vweird.f32 %v5901_v10 }
 0x3b6   : > { %v1131_v42 = vsel %vm5975_vm12, %v5886_v8, %v1127_v53  ;;  %v2567_v14 = vmax.f32 %v2535_v58, 0.0  ;;  %v2203_v49 = vmul.f32 %v5901_v10, %v2202_v1  ;;  %v2764_v21 = vpack.c.bf16 %v2760_v19, %v2759_v50  ;;  %vm6015_vm15 = vmor %vm2204_vm10, %vm2205_vm13 }
 0x3b7   : > { %v1134_v12 = vmul.f32 %v5958_v60, %v1133_v25  ;;  %1844 = vadd.xlane.f32.xlu0 %v1843_v36  ;;  %v1833_v48 = vpop.xlane.xlu1 %1832  ;;  %v2020_v16 = vsel %vm702_vm2, %v1960_v37, 0.0  ;;  %v2213_v3 = vmul.f32 %v5907_v31, %v2212_v55  ;;  %vm2215_vm14 = vweird.f32 %v5907_v31  ;;  %v6007_v37 = vpop.f32.mrf.mxu2 }
 0x3b8   : > { %936 = vadd.xlane.f32.xlu1 %v935_v51  ;;  %v928_v34 = vpop.xlane.xlu2 %927  ;;  %v931_v8 = vpop.xlane.xlu0 %930  ;;  %v1897_v35 = vmul.f32 %v1833_v48, %v4848_v32  ;;  %2021 = vadd.xlane.f32.xlu2 %v2020_v16  ;;  %v2596_v25 = vpack.c.bf16 %v2567_v14, %v2566_v2  ;;  %v1388_v51 = vmul.f32 %v1131_v42, %v5532_v26  ;;  %vm1139_vm3 = vweird.f32 %v5958_v60  ;;  %vm6038_vm4 = vmor %vm2214_vm11, %vm2215_vm14 }
 0x3b9   : > { %v1135_v53 = vmul.f32 0.5, %v1134_v12  ;;  %v1006_v58 = vmul.f32 %v928_v34, %v4848_v32  ;;  %v1007_v36 = vmul.f32 %v931_v8, %v4848_v32  ;;  %2779 = vmatpush.bf16.msrb.mxu1 %v2764_v21  ;;  %v2207_v42 = vsel %vm6015_vm15, %v5901_v10, %v2203_v49 }
 0x3ba   : > { %v5999_v61 = vpop.eup %4228  ;;  %v6005_v1 = vsub.f32 %v5715_v20, %v1897_v35  ;;  %4023 = vmatmul.msk.bf16.gmra.mxu3 %vm702_vm2, %v2596_v25  ;;  %vm1138_vm5 = vweird.f32 %v5912_v13  ;;  %v1424_v49 = vmul.f32 %v5502_v41, %v1388_v51  ;;  %v1849_v22 = vsel %vm702_vm2, %v5947_v4, 0.0 }
 0x3bb   : > { %v6009_v12 = vpop.eup %4230  ;;  %v1136_v55 = vsub.f32 1.5, %v1135_v53  ;;  %v2219_v26 = vmul.f32 %v5999_v61, %v5949_v28  ;;  %v6022_v20 = vadd.f32 1e-05, %v1006_v58  ;;  %v6030_v48 = vadd.f32 1e-05, %v1007_v36  ;;  %vm1140_vm0 = vmor %vm1138_vm5, %vm1139_vm3 }
 0x3bc   : > { %v2229_v18 = vmul.f32 %v6009_v12, %v5952_v40  ;;  %v1961_v14 = vmul.f32 %v6005_v1, %v6005_v1  ;;  %v2464_v16 = vmul.f32 %v2207_v42, %v5589_v63  ;;  %v2217_v13 = vsel %vm6038_vm4, %v5907_v31, %v2213_v3 }
 0x3bd   : > { %v1137_v19 = vmul.f32 %v5958_v60, %v1136_v55  ;;  %v2220_v10 = vmul.f32 %v5999_v61, %v2219_v26  ;;  %4232 = vrsqrt.f32 %v6022_v20  ;;  %v6061_v63 = vadd.f32 %v5624_v27, %v5882_v24 }
 0x3be   : > { %4234 = vrsqrt.f32 %v6030_v48  ;;  %v2023_v34 = vsel %vm702_vm2, %v1961_v14, 0.0  ;;  %v2230_v35 = vmul.f32 %v6009_v12, %v2229_v18  ;;  %v1852_v51 = vsel %vm702_vm2, %v5969_v45, 0.0 }
 0x3bf   : > { %v1141_v8 = vsel %vm1140_vm0, %v5958_v60, %v1137_v19  ;;  %2024 = vadd.xlane.f32.xlu0 %v2023_v34  ;;  %v2010_v41 = vpop.xlane.xlu1 %2009  ;;  %v2221_v25 = vmul.f32 0.5, %v2220_v10  ;;  %v2465_v60 = vmul.f32 %v2217_v13, %v5592_v23  ;;  %vm2224_vm6 = vweird.f32 %v5949_v28 }
 0x3c0   : > { %v1389_v21 = vmul.f32 %v1141_v8, %v5566_v62  ;;  %1847 = vadd.xlane.f32.xlu1 %v1846_v43  ;;  %v2013_v53 = vpop.xlane.xlu2 %2012  ;;  %v1836_v58 = vpop.xlane.xlu0 %1835  ;;  %v2084_v36 = vmul.f32 %v2010_v41, %v4848_v32  ;;  %1850 = vadd.xlane.f32.xlu2 %v1849_v22  ;;  %v6068_v62 = vadd.f32 %v5624_v27, %v5929_v46  ;;  %v2231_v24 = vmul.f32 0.5, %v2230_v35  ;;  %v6086_v46 = vld [vmem:[%s8095_s3] ss:$0 sm:$0xff] }
 0x3c1   : > { %v2085_v3 = vmul.f32 %v2013_v53, %v4848_v32  ;;  %v1898_v31 = vmul.f32 %v1836_v58, %v4848_v32  ;;  %v1460_v26 = vadd.f32 %v5512_v47, %v1424_v49  ;;  %v2500_v23 = vmul.f32 %v5726_v54, %v2464_v16  ;;  %v6095_v47 = vpop.f32.mrf.mxu2  ;;  %v6116_v53 = vld [vmem:[%s8096_s4] ss:$0 sm:$0xff] }
 0x3c2   : > { %v6070_v43 = vadd.f32 1e-05, %v2084_v36  ;;  %v1425_v18 = vmul.f32 %v6086_v46, %v1389_v21  ;;  %v2222_v19 = vsub.f32 1.5, %v2221_v25  ;;  %v1855_v49 = vsel %vm702_vm2, %v6061_v63, 0.0 }
 0x3c3   : > { %v6074_v2 = vpop.eup %4232  ;;  %v6077_v55 = vadd.f32 1e-05, %v2085_v3  ;;  %v6092_v50 = vsub.f32 %v5787_v39, %v1898_v31  ;;  %vm2234_vm7 = vweird.f32 %v5952_v40  ;;  %vm2235_vm8 = vweird.f32 %v6009_v12 }
 0x3c4   : > { %v6081_v42 = vpop.eup %4234  ;;  %v1143_v14 = vmul.f32 %v6074_v2, %v6022_v20  ;;  %4236 = vrsqrt.f32 %v6070_v43  ;;  %vm2225_vm9 = vweird.f32 %v5999_v61  ;;  %v2501_v22 = vmul.f32 %v5726_v54, %v2465_v60  ;;  %vm6165_vm4 = vmor %vm2234_vm7, %vm2235_vm8 }
 0x3c5   : > { %v1153_v10 = vmul.f32 %v6081_v42, %v6030_v48  ;;  %4238 = vrsqrt.f32 %v6077_v55  ;;  %v2232_v34 = vsub.f32 1.5, %v2231_v24  ;;  %vm1148_vm10 = vweird.f32 %v6022_v20  ;;  %vm6137_vm13 = vmor %vm2224_vm6, %vm2225_vm9 }
 0x3c6   : > { %v1144_v39 = vmul.f32 %v6074_v2, %v1143_v14  ;;  %v1492_v8 = vmax.f32 %v1460_v26, 0.0  ;;  %v1962_v21 = vmul.f32 %v6092_v50, %v6092_v50  ;;  %v1461_v58 = vadd.f32 %v6116_v53, %v1425_v18 }
 0x3c7   : > { %v1154_v16 = vmul.f32 %v6081_v42, %v1153_v10  ;;  %1853 = vadd.xlane.f32.xlu0 %v1852_v51  ;;  %v1839_v13 = vpop.xlane.xlu1 %1838  ;;  %v2536_v36 = vadd.f32 %v5756_v29, %v2500_v23  ;;  %v2223_v25 = vmul.f32 %v5999_v61, %v2222_v19  ;;  %vm1149_vm11 = vweird.f32 %v6074_v2 }
 0x3c8   : > { %v1145_v35 = vmul.f32 0.5, %v1144_v39  ;;  %1856 = vadd.xlane.f32.xlu1 %v1855_v49  ;;  %v6109_v41 = vpop.xlane.xlu2 %933  ;;  %v1899_v31 = vmul.f32 %v1839_v13, %v4848_v32  ;;  %v2026_v24 = vsel %vm702_vm2, %v1962_v21, 0.0  ;;  %v1493_v26 = vmax.f32 %v1461_v58, 0.0  ;;  %vm1150_vm14 = vmor %vm1148_vm10, %vm1149_vm11 }
 0x3c9   : > { %v1155_v3 = vmul.f32 0.5, %v1154_v16  ;;  %v2537_v14 = vadd.f32 %v5756_v29, %v2501_v22  ;;  %v2233_v18 = vmul.f32 %v6009_v12, %v2232_v34  ;;  %vm1159_vm12 = vweird.f32 %v6081_v42  ;;  %2027 = vadd.xlane.f32.xlu2 %v2026_v24 }
 0x3ca   : > { %v6123_v60 = vpop.eup %4236  ;;  %v1146_v51 = vsub.f32 1.5, %v1145_v35  ;;  %v1521_v34 = vpack.c.bf16 %v1493_v26, %v1492_v8  ;;  %v2568_v16 = vmax.f32 %v2536_v36, 0.0  ;;  %vm1158_vm15 = vweird.f32 %v6030_v48  ;;  %v1773_v36 = vpop.f32.mrf.mxu2 }
 0x3cb   : > { %v6127_v10 = vpop.eup %4238  ;;  %v1156_v23 = vsub.f32 1.5, %v1155_v3  ;;  %v2239_v19 = vmul.f32 %v6123_v60, %v6070_v43  ;;  %v6153_v35 = vadd.f32 %v5624_v27, %v6007_v37  ;;  %vm1160_vm3 = vmor %vm1158_vm15, %vm1159_vm12  ;;  %v6158_v58 = vsub.f32 %v5824_v11, %v1899_v31 }
 0x3cc   : > { %v1147_v39 = vmul.f32 %v6074_v2, %v1146_v51  ;;  %v2249_v22 = vmul.f32 %v6127_v10, %v6077_v55  ;;  %3992 = vmatmul.msk.bf16.gmra.mxu0 %vm702_vm2, %v1521_v34  ;;  %v2569_v20 = vmax.f32 %v2537_v14, 0.0  ;;  %v2227_v37 = vsel %vm6137_vm13, %v5999_v61, %v2223_v25 }
 0x3cd   : > { %v1157_v13 = vmul.f32 %v6081_v42, %v1156_v23  ;;  %v2240_v28 = vmul.f32 %v6123_v60, %v2239_v19  ;;  %v2237_v3 = vsel %vm6165_vm4, %v6009_v12, %v2233_v18  ;;  %v1858_v23 = vsel %vm702_vm2, %v6068_v62, 0.0 }
 0x3ce   : > { %v1151_v21 = vsel %vm1150_vm14, %v6074_v2, %v1147_v39  ;;  %v2250_v8 = vmul.f32 %v6127_v10, %v2249_v22  ;;  %v2597_v40 = vpack.c.bf16 %v2569_v20, %v2568_v16  ;;  %v1861_v12 = vsel %vm702_vm2, %v6153_v35, 0.0 }
 0x3cf   : > { %v1390_v2 = vmul.f32 %v1151_v21, %v5603_v9  ;;  %v1161_v11 = vsel %vm1160_vm3, %v6081_v42, %v1157_v13  ;;  %v2241_v51 = vmul.f32 0.5, %v2240_v28  ;;  %v2467_v25 = vmul.f32 %v2237_v3, %v5705_v57  ;;  %v2758_v57 = vld [vmem:[%s8105_s13 + $0x8] sm:$0xff] }
 0x3d0   : > { %v1391_v31 = vmul.f32 %v1161_v11, %v5606_v7  ;;  %v1842_v24 = vpop.xlane.xlu2 %1841  ;;  %v2251_v14 = vmul.f32 0.5, %v2250_v8  ;;  %4024 = vmatmul.msk.bf16.gmra.mxu3 %vm702_vm2, %v2597_v40  ;;  %1859 = vadd.xlane.f32.xlu1 %v1858_v23  ;;  %v1963_v7 = vmul.f32 %v6158_v58, %v6158_v58  ;;  %v2466_v18 = vmul.f32 %v2227_v37, %v5685_v33  ;;  %v2757_v33 = vld [vmem:[%s8105_s13] sm:$0xff] }
 0x3d1   : > { %v1426_v26 = vmul.f32 %v6086_v46, %v1390_v2  ;;  %v1900_v61 = vmul.f32 %v1842_v24, %v4848_v32  ;;  %1862 = vadd.xlane.f32.xlu2 %v1861_v12  ;;  %v2242_v39 = vsub.f32 1.5, %v2241_v51  ;;  %v6199_v16 = vadd.f32 %v5624_v27, %v6095_v47  ;;  %v6228_v51 = vld [vmem:[%s8100_s8] ss:$0 sm:$0xff]  ;;  %v8189_v23 = vld [vmem:[#allocation9_spill] sm:$0xff] }
 0x3d2   : > { %v1427_v9 = vmul.f32 %v6086_v46, %v1391_v31  ;;  %v2029_v19 = vsel %vm702_vm2, %v1963_v7, 0.0  ;;  %v2252_v49 = vsub.f32 1.5, %v2251_v14  ;;  %vm2244_vm5 = vweird.f32 %v6070_v43  ;;  %v1776_v8 = vpop.f32.mrf.mxu2 }
 0x3d3   : > { %v6189_v42 = vsub.f32 %v5843_v38, %v1900_v61  ;;  %2030 = vadd.xlane.f32.xlu0 %v2029_v19  ;;  %v1462_v34 = vadd.f32 %v6116_v53, %v1426_v26  ;;  %vm2245_vm0 = vweird.f32 %v6123_v60  ;;  %v2502_v27 = vmul.f32 %v5726_v54, %v2466_v18 }
 0x3d4   : > { %v1463_v38 = vadd.f32 %v6116_v53, %v1427_v9  ;;  %v2503_v47 = vmul.f32 %v5726_v54, %v2467_v25  ;;  %v2253_v20 = vmul.f32 %v6127_v10, %v2252_v49  ;;  %vm2255_vm6 = vweird.f32 %v6127_v10  ;;  %vm2246_vm8 = vmor %vm2244_vm5, %vm2245_vm0  ;;  %v8190_v49 = vld [vmem:[#allocation10_spill] sm:$0xff] }
 0x3d5   : > { %v1964_v22 = vmul.f32 %v6189_v42, %v6189_v42  ;;  %v1494_v28 = vmax.f32 %v1462_v34, 0.0  ;;  %v2243_v48 = vmul.f32 %v6123_v60, %v2242_v39  ;;  %v2763_v37 = vpack.c.bf16 %v2758_v57, %v2757_v33  ;;  %v6255_v39 = vpop.f32.mrf.mxu1 }
 0x3d6   : > { %v1495_v21 = vmax.f32 %v1463_v38, 0.0  ;;  %v1864_v2 = vsel %vm702_vm2, %v6199_v16, 0.0  ;;  %v2538_v3 = vadd.f32 %v5756_v29, %v2502_v27  ;;  %v2539_v31 = vadd.f32 %v5756_v29, %v2503_v47  ;;  %8191 = vst [vmem:[#allocation24_spill] sm:$0xff] %v6255_v39  ;;  %v8197_v27 = vld [vmem:[#allocation13_spill] sm:$0xff] }
 0x3d7   : > { %v2032_v13 = vsel %vm702_vm2, %v1964_v22, 0.0  ;;  %vm2254_vm7 = vweird.f32 %v6077_v55  ;;  %2780 = vmatpush.bf16.msrb.mxu1 %v2763_v37  ;;  %v6231_v40 = vadd.f32 %v6228_v51, %v1776_v8  ;;  %v2247_v55 = vsel %vm2246_vm8, %v6123_v60, %v2243_v48  ;;  %v8192_v22 = vld [vmem:[#allocation11_spill] sm:$0xff] }
 0x3d8   : > { %2033 = vadd.xlane.f32.xlu1 %v2032_v13  ;;  %v1522_v11 = vpack.c.bf16 %v1495_v21, %v1494_v28  ;;  %vm2256_vm9 = vmor %vm2254_vm7, %vm2255_vm6  ;;  %v2570_v24 = vmax.f32 %v2538_v3, 0.0  ;;  %v2571_v26 = vmax.f32 %v2539_v31, 0.0  ;;  %v6236_v43 = vadd.f32 %v6228_v51, %v1773_v36 }
 0x3d9   : > { %v2257_v14 = vsel %vm2256_vm9, %v6127_v10, %v2253_v20  ;;  %v1870_v61 = vsel %vm702_vm2, %v6231_v40, 0.0  ;;  %v2468_v12 = vmul.f32 %v2247_v55, %v5793_v5 }
 0x3da   : > { %4037 = vmatmul.msk.bf16.vlgmr.msrb.gmra.mxu1 %vm560_vm1, %v8189_v23  ;;  %v2469_v9 = vmul.f32 %v2257_v14, %v5804_v52  ;;  %v2598_v7 = vpack.c.bf16 %v2571_v26, %v2570_v24  ;;  %v1867_v60 = vsel %vm702_vm2, %v6236_v43, 0.0  ;;  %v1778_v20 = vpop.f32.mrf.mxu2 }
 0x3db   : > { %1865 = vadd.xlane.f32.xlu0 %v1864_v2  ;;  %v2504_v10 = vmul.f32 %v5726_v54, %v2468_v12 }
 0x3dc   : > { %3993 = vmatmul.msk.bf16.gmra.mxu0 %vm702_vm2, %v1522_v11  ;;  %v2505_v36 = vmul.f32 %v5726_v54, %v2469_v9  ;;  %v1008_v54 = vmul.f32 %v6109_v41, %v4848_v32 }
 0x3dd   : > { %v2540_v25 = vadd.f32 %v5756_v29, %v2504_v10  ;;  %v6259_v34 = vpop.f32.mrf.mxu1 }
 0x3de   : > { %v2541_v18 = vadd.f32 %v5756_v29, %v2505_v36  ;;  %8193 = vst [vmem:[#allocation28_spill] sm:$0xff] %v6259_v34  ;;  %v1040_v38 = vadd.f32 1e-05, %v1008_v54  ;;  %v8194_v29 = vld [vmem:[#allocation12_spill] sm:$0xff] }
 0x3df   : > { %v2572_v19 = vmax.f32 %v2540_v25, 0.0 }
 0x3e0   : > { %4025 = vmatmul.msk.bf16.gmra.mxu3 %vm702_vm2, %v2598_v7  ;;  %1871 = vadd.xlane.f32.xlu1 %v1870_v61  ;;  %v2573_v52 = vmax.f32 %v2541_v18, 0.0  ;;  %4240 = vrsqrt.f32 %v1040_v38  ;;  %vm1168_vm11 = vweird.f32 %v1040_v38 }
 0x3e2   : > { %v2599_v5 = vpack.c.bf16 %v2573_v52, %v2572_v19  ;;  %v1781_v12 = vpop.f32.mrf.mxu2  ;;  %v8199_v19 = vld [vmem:[#allocation14_spill] sm:$0xff] }
 0x3e3   : > { %1868 = vadd.xlane.f32.xlu0 %v1867_v60 }
 0x3e5   : > { %v6265_v33 = vpop.f32.mrf.mxu1 }
 0x3e6   : > { %8195 = vst [vmem:[#allocation23_spill] sm:$0xff] %v6265_v33  ;;  %v4241_v57 = vpop.eup %4240 }
 0x3e7   : > { %v1163_v13 = vmul.f32 %v4241_v57, %v1040_v38  ;;  %vm1169_vm10 = vweird.f32 %v4241_v57  ;;  %v6298_v38 = vadd.f32 %v6228_v51, %v1778_v20 }
 0x3e8   : > { %vm1170_vm12 = vmor %vm1168_vm11, %vm1169_vm10 }
 0x3e9   : > { %v1164_v21 = vmul.f32 %v4241_v57, %v1163_v13 }
 0x3ea   : > { %4038 = vmatmul.msk.bf16.gmra.mxu1 %vm560_vm1, %v8190_v49 }
 0x3eb   : > { %v1165_v47 = vmul.f32 0.5, %v1164_v21 }
 0x3ed   : > { %v6267_v28 = vpop.f32.mrf.mxu1  ;;  %v1166_v37 = vsub.f32 1.5, %v1165_v47 }
 0x3ee   : > { %8196 = vst [vmem:[#allocation29_spill] sm:$0xff] %v6267_v28 }
 0x3ef   : > { %v1167_v24 = vmul.f32 %v4241_v57, %v1166_v37  ;;  %v1873_v37 = vsel %vm702_vm2, %v6298_v38, 0.0 }
 0x3f0   : > { %4026 = vmatmul.msk.bf16.gmra.mxu3 %vm702_vm2, %v2599_v5 }
 0x3f1   : > { %v1171_v23 = vsel %vm1170_vm12, %v4241_v57, %v1167_v24 }
 0x3f2   : > { %v1392_v49 = vmul.f32 %v1171_v23, %v5821_v0 }
 0x3f4   : > { %v6303_v21 = vmul.f32 %v6086_v46, %v1392_v49 }
 0x3f5   : > { %v6273_v11 = vpop.f32.mrf.mxu1 }
 0x3f6   : > { %8198 = vst [vmem:[#allocation25_spill] sm:$0xff] %v6273_v11 }
 0x3fa   : > { %4039 = vmatmul.msk.bf16.gmra.mxu1 %vm560_vm1, %v8192_v22 }
 0x3fd   : > { %v6288_v52 = vpop.f32.mrf.mxu1 }
 0x3fe   : > { %8200 = vst [vmem:[#allocation31_spill] sm:$0xff] %v6288_v52 }
 0x40a   : > { %4040 = vmatmul.msk.bf16.gmra.mxu1 %vm560_vm1, %v8194_v29 }
 0x41a   : > { %4041 = vmatmul.msk.bf16.gmra.mxu1 %vm560_vm1, %v8197_v27 }
 0x422   : > { %v2016_v8 = vpop.xlane.xlu0 %2015 }
 0x423   : > { %v2086_v41 = vmul.f32 %v2016_v8, %v4848_v32  ;;  %v2019_v48 = vpop.xlane.xlu1 %2018 }
 0x424   : > { %v2087_v2 = vmul.f32 %v2019_v48, %v4848_v32 }
 0x425   : > { %v2118_v3 = vadd.f32 1e-05, %v2086_v41 }
 0x426   : > { %v6275_v31 = vadd.f32 1e-05, %v2087_v2 }
 0x427   : > { %4242 = vrsqrt.f32 %v2118_v3  ;;  %vm2264_vm15 = vweird.f32 %v2118_v3 }
 0x428   : > { %4244 = vrsqrt.f32 %v6275_v31  ;;  %vm2274_vm3 = vweird.f32 %v6275_v31 }
 0x42a   : > { %v1845_v26 = vpop.xlane.xlu0 %1844  ;;  %4042 = vmatmul.msk.bf16.gmra.mxu1 %vm560_vm1, %v8199_v19 }
 0x42b   : > { %v1901_v14 = vmul.f32 %v1845_v26, %v4848_v32  ;;  %v937_v55 = vpop.xlane.xlu1 %936  ;;  %v2022_v61 = vpop.xlane.xlu2 %2021 }
 0x42c   : > { %v1009_v9 = vmul.f32 %v937_v55, %v4848_v32  ;;  %v2088_v60 = vmul.f32 %v2022_v61, %v4848_v32  ;;  %v1783_v61 = vpop.f32.mrf.mxu2 }
 0x42d   : > { %v4243_v7 = vpop.eup %4242  ;;  %v6282_v10 = vsub.f32 %v5933_v30, %v1901_v14 }
 0x42e   : > { %v4245_v36 = vpop.eup %4244  ;;  %v2259_v25 = vmul.f32 %v4243_v7, %v2118_v3  ;;  %v6284_v18 = vadd.f32 1e-05, %v1009_v9  ;;  %v6292_v22 = vadd.f32 1e-05, %v2088_v60  ;;  %vm2265_vm13 = vweird.f32 %v4243_v7  ;;  %v6320_v60 = vpop.f32.mrf.mxu1 }
 0x42f   : > { %v2269_v5 = vmul.f32 %v4245_v36, %v6275_v31  ;;  %v1965_v54 = vmul.f32 %v6282_v10, %v6282_v10  ;;  %vm2275_vm14 = vweird.f32 %v4245_v36  ;;  %8201 = vst [vmem:[#allocation27_spill] sm:$0xff] %v6320_v60  ;;  %vm2266_vm4 = vmor %vm2264_vm15, %vm2265_vm13  ;;  %v6329_v3 = vadd.f32 %v6228_v51, %v1781_v12 }
 0x430   : > { %v2260_v30 = vmul.f32 %v4243_v7, %v2259_v25  ;;  %4246 = vrsqrt.f32 %v6284_v18  ;;  %vm2276_vm5 = vmor %vm2274_vm3, %vm2275_vm14  ;;  %vm1178_vm0 = vweird.f32 %v6284_v18  ;;  %vm2284_vm7 = vweird.f32 %v6292_v22 }
 0x431   : > { %v2270_v29 = vmul.f32 %v4245_v36, %v2269_v5  ;;  %4248 = vrsqrt.f32 %v6292_v22  ;;  %v2035_v57 = vsel %vm702_vm2, %v1965_v54, 0.0 }
 0x432   : > { %v2261_v13 = vmul.f32 0.5, %v2260_v30  ;;  %2036 = vadd.xlane.f32.xlu2 %v2035_v57  ;;  %v2025_v0 = vpop.xlane.xlu0 %2024 }
 0x433   : > { %v2271_v27 = vmul.f32 0.5, %v2270_v29  ;;  %v2089_v47 = vmul.f32 %v2025_v0, %v4848_v32  ;;  %v1848_v8 = vpop.xlane.xlu1 %1847  ;;  %v1851_v48 = vpop.xlane.xlu2 %1850 }
 0x434   : > { %v2262_v41 = vsub.f32 1.5, %v2261_v13  ;;  %v1902_v20 = vmul.f32 %v1848_v8, %v4848_v32  ;;  %v1903_v24 = vmul.f32 %v1851_v48, %v4848_v32 }
 0x435   : > { %v2272_v2 = vsub.f32 1.5, %v2271_v27  ;;  %v6310_v26 = vadd.f32 1e-05, %v2089_v47 }
 0x436   : > { %v6312_v14 = vpop.eup %4246  ;;  %v2263_v55 = vmul.f32 %v4243_v7, %v2262_v41  ;;  %v6316_v23 = vsub.f32 %v5939_v44, %v1902_v20  ;;  %v6326_v49 = vsub.f32 %v5947_v4, %v1903_v24  ;;  %v6339_v4 = vadd.f32 %v6228_v51, %v1783_v61 }
 0x437   : > { %v6318_v9 = vpop.eup %4248  ;;  %v2273_v25 = vmul.f32 %v4245_v36, %v2272_v2  ;;  %v1173_v19 = vmul.f32 %v6312_v14, %v6284_v18  ;;  %4250 = vrsqrt.f32 %v6310_v26  ;;  %vm1179_vm6 = vweird.f32 %v6312_v14  ;;  %v6365_v2 = vld [vmem:[%s8102_s10] ss:$0 sm:$0xff] }
 0x438   : > { %v2267_v31 = vsel %vm2266_vm4, %v4243_v7, %v2263_v55  ;;  %v2279_v44 = vmul.f32 %v6318_v9, %v6292_v22  ;;  %v1967_v29 = vmul.f32 %v6326_v49, %v6326_v49  ;;  %v1966_v13 = vmul.f32 %v6316_v23, %v6316_v23  ;;  %vm1180_vm9 = vmor %vm1178_vm0, %vm1179_vm6 }
 0x439   : > { %v2470_v5 = vmul.f32 %v2267_v31, %v5892_v17  ;;  %v2277_v54 = vsel %vm2276_vm5, %v4245_v36, %v2273_v25  ;;  %v1174_v30 = vmul.f32 %v6312_v14, %v1173_v19  ;;  %vm2285_vm8 = vweird.f32 %v6318_v9  ;;  %v8202_v19 = vld [vmem:[#allocation15_spill] sm:$0xff] }
 0x43a   : > { %v2471_v12 = vmul.f32 %v2277_v54, %v5905_v56  ;;  %v2280_v7 = vmul.f32 %v6318_v9, %v2279_v44  ;;  %1874 = vadd.xlane.f32.xlu2 %v1873_v37  ;;  %v1854_v57 = vpop.xlane.xlu0 %1853  ;;  %v6352_v56 = vld [vmem:[%s8101_s9] ss:$0 sm:$0xff]  ;;  %v2041_v47 = vsel %vm702_vm2, %v1967_v29, 0.0  ;;  %v2038_v8 = vsel %vm702_vm2, %v1966_v13, 0.0  ;;  %4043 = vmatmul.msk.bf16.gmra.mxu1 %vm560_vm1, %v8202_v19  ;;  %vm2286_vm10 = vmor %vm2284_vm7, %vm2285_vm8 }
 0x43b   : > { %v1175_v0 = vmul.f32 0.5, %v1174_v30  ;;  %v1904_v17 = vmul.f32 %v1854_v57, %v4848_v32  ;;  %v1857_v36 = vpop.xlane.xlu1 %1856  ;;  %v2506_v51 = vmul.f32 %v6352_v56, %v2470_v5  ;;  %2042 = vadd.xlane.f32.xlu1 %v2041_v47  ;;  %2039 = vadd.xlane.f32.xlu0 %v2038_v8  ;;  %v1879_v54 = vsel %vm702_vm2, %v6339_v4, 0.0  ;;  %v6390_v57 = vpop.f32.mrf.mxu1 }
 0x43c   : > { %v2281_v27 = vmul.f32 0.5, %v2280_v7  ;;  %v1905_v41 = vmul.f32 %v1857_v36, %v4848_v32  ;;  %v2507_v37 = vmul.f32 %v6352_v56, %v2471_v12  ;;  %v2028_v25 = vpop.xlane.xlu2 %2027  ;;  %8203 = vst [vmem:[#allocation30_spill] sm:$0xff] %v6390_v57  ;;  %vm2294_vm12 = vweird.f32 %v6310_v26 }
 0x43d   : > { %v1176_v48 = vsub.f32 1.5, %v1175_v0  ;;  %v6359_v20 = vsub.f32 %v5969_v45, %v1904_v17  ;;  %v2542_v24 = vadd.f32 %v6365_v2, %v2506_v51  ;;  %v4251_v55 = vpop.eup %4250  ;;  %v1876_v45 = vsel %vm702_vm2, %v6329_v3, 0.0 }
 0x43e   : > { %v2282_v61 = vsub.f32 1.5, %v2281_v27  ;;  %v2289_v44 = vmul.f32 %v4251_v55, %v6310_v26  ;;  %v2090_v5 = vmul.f32 %v2028_v25, %v4848_v32  ;;  %v6385_v12 = vsub.f32 %v6061_v63, %v1905_v41 }
 0x43f   : > { %v1177_v31 = vmul.f32 %v6312_v14, %v1176_v48  ;;  %v1968_v7 = vmul.f32 %v6359_v20, %v6359_v20  ;;  %v2543_v29 = vadd.f32 %v6365_v2, %v2507_v37  ;;  %v2574_v18 = vmax.f32 %v2542_v24, 0.0 }
 0x440   : > { %v2283_v30 = vmul.f32 %v6318_v9, %v2282_v61  ;;  %v2290_v0 = vmul.f32 %v4251_v55, %v2289_v44  ;;  %v6395_v17 = vadd.f32 1e-05, %v2090_v5  ;;  %v1464_v41 = vadd.f32 %v6116_v53, %v6303_v21 }
 0x441   : > { %v1181_v13 = vsel %vm1180_vm9, %v6312_v14, %v1177_v31  ;;  %v2044_v51 = vsel %vm702_vm2, %v1968_v7, 0.0  ;;  %v2575_v27 = vmax.f32 %v2543_v29, 0.0  ;;  %vm2295_vm11 = vweird.f32 %v4251_v55 }
 0x442   : > { %v2287_v36 = vsel %vm2286_vm10, %v6318_v9, %v2283_v30  ;;  %v1393_v63 = vmul.f32 %v1181_v13, %v5889_v15  ;;  %1877 = vadd.xlane.f32.xlu2 %v1876_v45  ;;  %v2291_v47 = vmul.f32 0.5, %v2290_v0  ;;  %4252 = vrsqrt.f32 %v6395_v17  ;;  %vm2296_vm13 = vmor %vm2294_vm12, %vm2295_vm11  ;;  %v6427_v13 = vpop.f32.mrf.mxu3 }
 0x443   : > { %v2472_v22 = vmul.f32 %v2287_v36, %v5955_v6  ;;  %v2600_v14 = vpack.c.bf16 %v2575_v27, %v2574_v18  ;;  %2045 = vadd.xlane.f32.xlu1 %v2044_v51  ;;  %1880 = vadd.xlane.f32.xlu0 %v1879_v54  ;;  %v1860_v15 = vpop.xlane.xlu1 %1859  ;;  %v1969_v9 = vmul.f32 %v6385_v12, %v6385_v12  ;;  %v1496_v45 = vmax.f32 %v1464_v41, 0.0  ;;  %v6416_v5 = vpop.f32.mrf.mxu1 }
 0x444   : > { %v1429_v8 = vmul.f32 %v6086_v46, %v1393_v63  ;;  %v2292_v48 = vsub.f32 1.5, %v2291_v47  ;;  %v1863_v37 = vpop.xlane.xlu2 %1862  ;;  %v1906_v24 = vmul.f32 %v1860_v15, %v4848_v32  ;;  %8204 = vst [vmem:[#allocation9_spill] sm:$0xff] %v6416_v5  ;;  %vm2304_vm15 = vweird.f32 %v6395_v17 }
 0x445   : > { %4027 = vmatmul.msk.bf16.gmra.mxu3 %vm702_vm2, %v2600_v14  ;;  %v1907_v21 = vmul.f32 %v1863_v37, %v4848_v32  ;;  %v2508_v61 = vmul.f32 %v6352_v56, %v2472_v22  ;;  %v2047_v30 = vsel %vm702_vm2, %v1969_v9, 0.0  ;;  %8205 = vst [vmem:[#allocation10_spill] sm:$0xff] %v6427_v13  ;;  %v8206_v22 = vld [vmem:[#allocation16_spill] sm:$0xff] }
 0x446   : > { %v1465_v6 = vadd.f32 %v6116_v53, %v1429_v8  ;;  %v2293_v46 = vmul.f32 %v4251_v55, %v2292_v48  ;;  %v2031_v25 = vpop.xlane.xlu0 %2030  ;;  %v6414_v19 = vsub.f32 %v6068_v62, %v1906_v24 }
 0x447   : > { %v6419_v53 = vsub.f32 %v6153_v35, %v1907_v21  ;;  %v2091_v26 = vmul.f32 %v2031_v25, %v4848_v32 }
 0x448   : > { %v1497_v31 = vmax.f32 %v1465_v6, 0.0  ;;  %v4253_v44 = vpop.eup %4252  ;;  %v2297_v54 = vsel %vm2296_vm13, %v4251_v55, %v2293_v46  ;;  %v1970_v62 = vmul.f32 %v6414_v19, %v6414_v19 }
 0x449   : > { %v2473_v7 = vmul.f32 %v2297_v54, %v6005_v1  ;;  %v2299_v29 = vmul.f32 %v4253_v44, %v6395_v17  ;;  %v2123_v0 = vadd.f32 1e-05, %v2091_v26  ;;  %v1971_v55 = vmul.f32 %v6419_v53, %v6419_v53 }
 0x44a   : > { %2048 = vadd.xlane.f32.xlu2 %v2047_v30  ;;  %v1523_v35 = vpack.c.bf16 %v1497_v31, %v1496_v45  ;;  %v2050_v63 = vsel %vm702_vm2, %v1970_v62, 0.0  ;;  %v2544_v1 = vadd.f32 %v6365_v2, %v2508_v61  ;;  %4044 = vmatmul.msk.bf16.gmra.mxu1 %vm560_vm1, %v8206_v22  ;;  %vm2305_vm14 = vweird.f32 %v4253_v44  ;;  %v6448_v25 = vpop.f32.mrf.mxu3 }
 0x44b   : > { %v2509_v18 = vmul.f32 %v6352_v56, %v2473_v7  ;;  %v2300_v36 = vmul.f32 %v4253_v44, %v2299_v29  ;;  %4254 = vrsqrt.f32 %v2123_v0  ;;  %v2053_v51 = vsel %vm702_vm2, %v1971_v55, 0.0  ;;  %2051 = vadd.xlane.f32.xlu0 %v2050_v63  ;;  %v6435_v27 = vpop.xlane.xlu1 %2033  ;;  %v6442_v46 = vpop.f32.mrf.mxu1  ;;  %8208 = vst [vmem:[#allocation12_spill] sm:$0xff] %v6448_v25  ;;  %vm2306_vm3 = vmor %vm2304_vm15, %vm2305_vm14 }
 0x44c   : > { %3994 = vmatmul.msk.bf16.gmra.mxu0 %vm702_vm2, %v1523_v35  ;;  %2054 = vadd.xlane.f32.xlu1 %v2053_v51  ;;  %v2576_v48 = vmax.f32 %v2544_v1, 0.0  ;;  %8207 = vst [vmem:[#allocation11_spill] sm:$0xff] %v6442_v46  ;;  %vm2314_vm5 = vweird.f32 %v2123_v0 }
 0x44d   : > { %v2301_v47 = vmul.f32 0.5, %v2300_v36  ;;  %v2545_v8 = vadd.f32 %v6365_v2, %v2509_v18 }
 0x44e   : > { %v1866_v41 = vpop.xlane.xlu0 %1865 }
 0x44f   : > { %v2302_v14 = vsub.f32 1.5, %v2301_v47  ;;  %v2577_v15 = vmax.f32 %v2545_v8, 0.0  ;;  %v1908_v9 = vmul.f32 %v1866_v41, %v4848_v32  ;;  %v8209_v47 = vld [vmem:[#allocation17_spill] sm:$0xff] }
 0x451   : > { %v2303_v37 = vmul.f32 %v4253_v44, %v2302_v14  ;;  %v2601_v24 = vpack.c.bf16 %v2577_v15, %v2576_v48  ;;  %v4255_v6 = vpop.eup %4254  ;;  %v6445_v21 = vsub.f32 %v6199_v16, %v1908_v9 }
 0x452   : > { %v2309_v61 = vmul.f32 %v4255_v6, %v2123_v0  ;;  %vm2315_vm4 = vweird.f32 %v4255_v6  ;;  %v6471_v22 = vpop.f32.mrf.mxu3 }
 0x453   : > { %v1972_v45 = vmul.f32 %v6445_v21, %v6445_v21  ;;  %v1872_v31 = vpop.xlane.xlu1 %1871  ;;  %v2307_v54 = vsel %vm2306_vm3, %v4253_v44, %v2303_v37  ;;  %vm2316_vm0 = vmor %vm2314_vm5, %vm2315_vm4  ;;  %8210 = vst [vmem:[#allocation13_spill] sm:$0xff] %v6471_v22 }
 0x454   : > { %v2310_v26 = vmul.f32 %v4255_v6, %v2309_v61  ;;  %v1910_v30 = vmul.f32 %v1872_v31, %v4848_v32  ;;  %v2474_v62 = vmul.f32 %v2307_v54, %v6092_v50  ;;  %v6481_v61 = vld [vmem:[#allocation2] ss:$0 sm:$0xff] }
 0x455   : > { %4028 = vmatmul.msk.bf16.gmra.mxu3 %vm702_vm2, %v2601_v24  ;;  %v2056_v7 = vsel %vm702_vm2, %v1972_v45, 0.0  ;;  %v2092_v45 = vmul.f32 %v6435_v27, %v4848_v32 }
 0x456   : > { %v2311_v16 = vmul.f32 0.5, %v2310_v26  ;;  %v1869_v29 = vpop.xlane.xlu0 %1868  ;;  %2057 = vadd.xlane.f32.xlu2 %v2056_v7  ;;  %v6456_v17 = vsub.f32 %v6231_v40, %v1910_v30  ;;  %v2510_v40 = vmul.f32 %v6352_v56, %v2474_v62  ;;  %v8213_v62 = vld [vmem:[#allocation19_spill] sm:$0xff] }
 0x457   : > { %v1909_v55 = vmul.f32 %v1869_v29, %v4848_v32  ;;  %v2782_v36 = vpop.f32.mrf.mxu1  ;;  %v2124_v26 = vadd.f32 1e-05, %v2092_v45 }
 0x458   : > { %v2312_v35 = vsub.f32 1.5, %v2311_v16  ;;  %v1974_v44 = vmul.f32 %v6456_v17, %v6456_v17  ;;  %v2546_v14 = vadd.f32 %v6365_v2, %v2510_v40  ;;  %v2783_v31 = vadd.f32 %v6481_v61, %v2782_v36 }
 0x459   : > { %v6463_v18 = vsub.f32 %v6236_v43, %v1909_v55  ;;  %4256 = vrsqrt.f32 %v2124_v26  ;;  %vm2324_vm7 = vweird.f32 %v2124_v26 }
 0x45a   : > { %v2313_v63 = vmul.f32 %v4255_v6, %v2312_v35  ;;  %v2062_v1 = vsel %vm702_vm2, %v1974_v44, 0.0  ;;  %4045 = vmatmul.msk.bf16.gmra.mxu1 %vm560_vm1, %v8209_v47  ;;  %v2578_v15 = vmax.f32 %v2546_v14, 0.0  ;;  %v6478_v24 = vpop.f32.mrf.mxu3  ;;  %v4053_v30 = vmul.f32 -1.442695, %v2783_v31 }
 0x45b   : > { %v1973_v50 = vmul.f32 %v6463_v18, %v6463_v18  ;;  %2063 = vadd.xlane.f32.xlu1 %v2062_v1  ;;  %8211 = vst [vmem:[#allocation14_spill] sm:$0xff] %v6478_v24 }
 0x45c   : > { %v2317_v51 = vsel %vm2316_vm0, %v4255_v6, %v2313_v63  ;;  %4258 = vpow2.f32 %v4053_v30 }
 0x45d   : > { %v2475_v43 = vmul.f32 %v2317_v51, %v6158_v58  ;;  %v2059_v8 = vsel %vm702_vm2, %v1973_v50, 0.0  ;;  %v8212_v58 = vld [vmem:[#allocation18_spill] sm:$0xff] }
 0x45e   : > { %2060 = vadd.xlane.f32.xlu0 %v2059_v8 }
 0x45f   : > { %v2511_v0 = vmul.f32 %v6352_v56, %v2475_v43  ;;  %v2784_v41 = vpop.f32.mrf.mxu1  ;;  %v4257_v55 = vpop.eup %4256 }
 0x460   : > { %v2785_v7 = vadd.f32 %v6481_v61, %v2784_v41  ;;  %v2319_v63 = vmul.f32 %v4257_v55, %v2124_v26  ;;  %vm2325_vm6 = vweird.f32 %v4257_v55 }
 0x461   : > { %v2547_v48 = vadd.f32 %v6365_v2, %v2511_v0  ;;  %vm2326_vm8 = vmor %vm2324_vm7, %vm2325_vm6 }
 0x462   : > { %v4054_v29 = vmul.f32 -1.442695, %v2785_v7  ;;  %v4259_v35 = vpop.eup %4258  ;;  %v2320_v43 = vmul.f32 %v4257_v55, %v2319_v63 }
 0x463   : > { %v2579_v9 = vmax.f32 %v2547_v48, 0.0  ;;  %v6493_v36 = vadd.f32 1.0, %v4259_v35  ;;  %v6498_v48 = vpop.f32.mrf.mxu3 }
 0x464   : > { %4260 = vpow2.f32 %v4054_v29  ;;  %v2321_v41 = vmul.f32 0.5, %v2320_v43  ;;  %8214 = vst [vmem:[#allocation15_spill] sm:$0xff] %v6498_v48 }
 0x465   : > { %v2602_v37 = vpack.c.bf16 %v2579_v9, %v2578_v15  ;;  %4262 = vrcp.f32 %v6493_v36  ;;  %vm2995_vm9 = vweird.f32 %v6493_v36 }
 0x467   : > { %4029 = vmatmul.msk.bf16.gmra.mxu3 %vm702_vm2, %v2602_v37  ;;  %v2787_v6 = vpop.f32.mrf.mxu1 }
 0x468   : > { %v2788_v44 = vadd.f32 %v6481_v61, %v2787_v6 }
 0x46a   : > { %4046 = vmatmul.msk.bf16.gmra.mxu1 %vm560_vm1, %v8212_v58  ;;  %v4055_v40 = vmul.f32 -1.442695, %v2788_v44  ;;  %v4261_v8 = vpop.eup %4260  ;;  %v2322_v58 = vsub.f32 1.5, %v2321_v41 }
 0x46b   : > { %v6500_v15 = vadd.f32 1.0, %v4261_v8  ;;  %v6502_v37 = vpop.eup %4262 }
 0x46c   : > { %4264 = vpow2.f32 %v4055_v40  ;;  %v2323_v30 = vmul.f32 %v4257_v55, %v2322_v58  ;;  %vm2996_vm10 = vweird.f32 %v6502_v37  ;;  %v8217_v58 = vld [vmem:[#allocation20_spill] sm:$0xff] }
 0x46d   : > { %vm6548_vm11 = vmor %vm2995_vm9, %vm2996_vm10  ;;  %vm3010_vm12 = vweird.f32 %v6500_v15 }
 0x46e   : > { %v2327_v63 = vsel %vm2326_vm8, %v4257_v55, %v2323_v30 }
 0x46f   : > { %v2789_v54 = vpop.f32.mrf.mxu1 }
 0x470   : > { %v2790_v27 = vadd.f32 %v6481_v61, %v2789_v54 }
 0x472   : > { %v4056_v51 = vmul.f32 -1.442695, %v2790_v27  ;;  %v4265_v6 = vpop.eup %4264 }
 0x473   : > { %v6507_v31 = vadd.f32 1.0, %v4265_v6  ;;  %v3001_v6 = vand.u32 2147483648, %v6493_v36 }
 0x474   : > { %4266 = vpow2.f32 %v4056_v51  ;;  %v2476_v51 = vmul.f32 %v2327_v63, %v6189_v42 }
 0x475   : > { %vm3025_vm3 = vweird.f32 %v6507_v31 }
 0x477   : > { %v2792_v16 = vpop.f32.mrf.mxu1 }
 0x478   : > { %v2793_v50 = vadd.f32 %v6481_v61, %v2792_v16  ;;  %v2991_v16 = vmul.f32 %v6502_v37, %v6493_v36 }
 0x47a   : > { %4047 = vmatmul.msk.bf16.gmra.mxu1 %vm560_vm1, %v8213_v62  ;;  %v4057_v0 = vmul.f32 -1.442695, %v2793_v50  ;;  %v4267_v45 = vpop.eup %4266  ;;  %v2992_v40 = vsub.f32 1.0, %v2991_v16 }
 0x47b   : > { %v6509_v7 = vadd.f32 1.0, %v4267_v45 }
 0x47c   : > { %4268 = vpow2.f32 %v4057_v0 }
 0x47d   : > { %vm3040_vm5 = vweird.f32 %v6509_v7 }
 0x47f   : > { %v2794_v1 = vpop.f32.mrf.mxu1 }
 0x480   : > { %v2795_v47 = vadd.f32 %v6481_v61, %v2794_v1 }
 0x482   : > { %v4058_v14 = vmul.f32 -1.442695, %v2795_v47  ;;  %v4269_v54 = vpop.eup %4268  ;;  %v2993_v47 = vmul.f32 %v6502_v37, %v2992_v40 }
 0x483   : > { %v6519_v27 = vadd.f32 1.0, %v4269_v54  ;;  %v2999_v54 = vand.u32 2147483647, %v6493_v36 }
 0x484   : > { %4270 = vpow2.f32 %v4058_v14  ;;  %v2994_v45 = vadd.f32 %v6502_v37, %v2993_v47 }
 0x485   : > { %4272 = vrcp.f32 %v6500_v15  ;;  %vm6567_vm13 = vcmp.eq.f32.partialorder %v2999_v54, 8.507059e+37  ;;  %vm3055_vm10 = vweird.f32 %v6519_v27 }
 0x486   : > { %4274 = vrcp.f32 %v6507_v31 }
 0x487   : > { %v2797_v9 = vpop.f32.mrf.mxu1  ;;  %4276 = vrcp.f32 %v6509_v7 }
 0x488   : > { %v2798_v35 = vadd.f32 %v6481_v61, %v2797_v9  ;;  %4278 = vrcp.f32 %v6519_v27  ;;  %v2512_v9 = vmul.f32 %v6352_v56, %v2476_v51  ;;  %v3016_v51 = vand.u32 2147483648, %v6500_v15 }
 0x48a   : > { %4048 = vmatmul.msk.bf16.gmra.mxu1 %vm560_vm1, %v4737_v59  ;;  %v4271_v29 = vpop.eup %4270  ;;  %v6516_v59 = vpop.f32.mrf.mxu3  ;;  %v4059_v50 = vmul.f32 -1.442695, %v2798_v35  ;;  %v6560_v36 = vadd.f32 %v6365_v2, %v2512_v9 }
 0x48b   : > { %v6514_v44 = vpop.eup %4272  ;;  %8215 = vst [vmem:[#allocation16_spill] sm:$0xff] %v6516_v59  ;;  %v6522_v1 = vadd.f32 1.0, %v4271_v29  ;;  %v3044_v59 = vand.u32 2147483647, %v6509_v7 }
 0x48c   : > { %v3006_v26 = vmul.f32 %v6514_v44, %v6500_v15  ;;  %v6530_v43 = vpop.eup %4274  ;;  %vm3011_vm14 = vweird.f32 %v6514_v44 }
 0x48d   : > { %4280 = vrcp.f32 %v6522_v1  ;;  %v6534_v0 = vpop.eup %4276  ;;  %v3021_v35 = vmul.f32 %v6530_v43, %v6507_v31  ;;  %vm6586_vm15 = vmor %vm3010_vm12, %vm3011_vm14  ;;  %vm3026_vm4 = vweird.f32 %v6530_v43  ;;  %vm6630_vm7 = vcmp.eq.f32.partialorder %v3044_v59, 8.507059e+37 }
 0x48e   : > { %4282 = vpow2.f32 %v4059_v50  ;;  %v3007_v42 = vsub.f32 1.0, %v3006_v26  ;;  %v6546_v30 = vpop.eup %4278  ;;  %v3002_v26 = vor.u32 1.1754944e-38, %v3001_v6  ;;  %vm3041_vm0 = vweird.f32 %v6534_v0  ;;  %vm6639_vm8 = vmor %vm3025_vm3, %vm3026_vm4 }
 0x48f   : > { %v2799_v62 = vpop.f32.mrf.mxu1  ;;  %v3022_v6 = vsub.f32 1.0, %v3021_v35  ;;  %v6591_v35 = vor.u32 1.1754944e-38, %v3016_v51  ;;  %vm6651_vm9 = vmor %vm3040_vm5, %vm3041_vm0  ;;  %vm3070_vm12 = vweird.f32 %v6522_v1  ;;  %v3074_v46 = vand.u32 2147483647, %v6522_v1 }
 0x490   : > { %v2800_v55 = vadd.f32 %v6481_v61, %v2799_v62  ;;  %v3036_v62 = vmul.f32 %v6534_v0, %v6509_v7  ;;  %v3008_v50 = vmul.f32 %v6514_v44, %v3007_v42 }
 0x491   : > { %v3023_v24 = vmul.f32 %v6530_v43, %v3022_v6  ;;  %vm6720_vm0 = vcmp.eq.f32.partialorder %v3074_v46, 8.507059e+37 }
 0x492   : > { %v6538_v41 = vpop.f32.mrf.mxu3  ;;  %v4060_v16 = vmul.f32 -1.442695, %v2800_v55  ;;  %v2998_v55 = vsel %vm6548_vm11, %v6502_v37, %v2994_v45  ;;  %v3037_v9 = vsub.f32 1.0, %v3036_v62  ;;  %v6579_v37 = vadd.f32 %v6514_v44, %v3008_v50 }
 0x493   : > { %8216 = vst [vmem:[#allocation17_spill] sm:$0xff] %v6538_v41  ;;  %v6556_v63 = vpop.eup %4280  ;;  %v3014_v62 = vand.u32 2147483647, %v6500_v15  ;;  %v6596_v50 = vsel %vm6567_vm13, %v3002_v26, %v2998_v55  ;;  %vm3056_vm11 = vweird.f32 %v6546_v30 }
 0x494   : > { %v4283_v47 = vpop.eup %4282  ;;  %4284 = vpow2.f32 %v4060_v16  ;;  %v3038_v48 = vmul.f32 %v6534_v0, %v3037_v9  ;;  %vm3071_vm13 = vweird.f32 %v6556_v63  ;;  %vm6687_vm3 = vmor %vm3055_vm10, %vm3056_vm11 }
 0x495   : > { %v6581_v45 = vadd.f32 1.0, %v4283_v47  ;;  %v3046_v47 = vand.u32 2147483648, %v6509_v7  ;;  %vm6617_vm6 = vcmp.eq.f32.partialorder %v3014_v62, 8.507059e+37  ;;  %v3024_v62 = vadd.f32 %v6530_v43, %v3023_v24  ;;  %vm6702_vm4 = vmor %vm3070_vm12, %vm3071_vm13 }
 0x496   : > { %v6628_v26 = vadd.f32 %v6534_v0, %v3038_v48 }
 0x497   : > { %v2802_v8 = vpop.f32.mrf.mxu1  ;;  %v6621_v6 = vor.u32 1.1754944e-38, %v3046_v47 }
 0x498   : > { %v2803_v14 = vadd.f32 %v6481_v61, %v2802_v8  ;;  %v3031_v8 = vand.u32 2147483648, %v6507_v31  ;;  %v3043_v52 = vsel %vm6651_vm9, %v6534_v0, %v6628_v26 }
 0x49a   : > { %4049 = vmatmul.msk.bf16.gmra.mxu1 %vm560_vm1, %v8217_v58  ;;  %v4061_v40 = vmul.f32 -1.442695, %v2803_v14  ;;  %v3051_v14 = vmul.f32 %v6546_v30, %v6519_v27  ;;  %v3066_v58 = vmul.f32 %v6556_v63, %v6522_v1  ;;  %v6599_v29 = vpop.f32.mrf.mxu3  ;;  %v4285_v55 = vpop.eup %4284  ;;  %v3032_v13 = vor.u32 1.1754944e-38, %v3031_v8 }
 0x49b   : > { %8224 = vst [vmem:[#allocation18_spill] sm:$0xff] %v6599_v29  ;;  %v6645_v48 = vadd.f32 1.0, %v4285_v55  ;;  %v8233_v55 = vld [vmem:[#allocation21_spill] sm:$0xff] }
 0x49c   : > { %4286 = vpow2.f32 %v4061_v40  ;;  %v3052_v41 = vsub.f32 1.0, %v3051_v14  ;;  %v3067_v15 = vsub.f32 1.0, %v3066_v58  ;;  %v3029_v58 = vand.u32 2147483647, %v6507_v31 }
 0x49d   : > { %4288 = vrcp.f32 %v6581_v45  ;;  %v3076_v31 = vand.u32 2147483648, %v6522_v1  ;;  %vm3100_vm11 = vweird.f32 %v6645_v48 }
 0x49e   : > { %v3068_v25 = vmul.f32 %v6556_v63, %v3067_v15  ;;  %v3059_v15 = vand.u32 2147483647, %v6519_v27  ;;  %vm6679_vm14 = vcmp.eq.f32.partialorder %v3029_v58, 8.507059e+37 }
 0x49f   : > { %v6574_v42 = vpop.f32.mrf.mxu1 }
 0x4a0   : > { %vm6710_vm5 = vcmp.eq.f32.partialorder %v3059_v15, 8.507059e+37  ;;  %v2805_v8 = vadd.f32 %v6481_v61, %v6574_v42 }
 0x4a2   : > { %v4287_v14 = vpop.eup %4286  ;;  %v4062_v9 = vmul.f32 -1.442695, %v2805_v8 }
 0x4a3   : > { %v6658_v59 = vadd.f32 1.0, %v4287_v14  ;;  %v6668_v57 = vpop.eup %4288  ;;  %v6670_v14 = vpop.f32.mrf.mxu3 }
 0x4a4   : > { %8234 = vst [vmem:[#allocation19_spill] sm:$0xff] %v6670_v14  ;;  %v3081_v60 = vmul.f32 %v6668_v57, %v6581_v45  ;;  %vm3086_vm9 = vweird.f32 %v6668_v57 }
 0x4a5   : > { %v2037_v54 = vpop.xlane.xlu2 %2036 }
 0x4a6   : > { %v2093_v40 = vmul.f32 %v2037_v54, %v4848_v32  ;;  %v3053_v54 = vmul.f32 %v6546_v30, %v3052_v41  ;;  %v3061_v41 = vand.u32 2147483648, %v6519_v27 }
 0x4a8   : > { %v6604_v51 = vadd.f32 1e-05, %v2093_v40  ;;  %v6625_v40 = vpop.f32.mrf.mxu1  ;;  %v3054_v5 = vadd.f32 %v6546_v30, %v3053_v54  ;;  %v3069_v54 = vadd.f32 %v6556_v63, %v3068_v25  ;;  %v3062_v58 = vor.u32 1.1754944e-38, %v3061_v41 }
 0x4aa   : > { %4290 = vrsqrt.f32 %v6604_v51  ;;  %4050 = vmatmul.msk.bf16.gmra.mxu1 %vm560_vm1, %v8233_v55  ;;  %v3091_v55 = vand.u32 2147483648, %v6581_v45 }
 0x4ab   : > { %4292 = vrcp.f32 %v6645_v48 }
 0x4ac   : > { %4294 = vrcp.f32 %v6658_v59 }
 0x4ad   : > { %v1875_v22 = vpop.xlane.xlu2 %1874 }
 0x4ae   : > { %v1911_v7 = vmul.f32 %v1875_v22, %v4848_v32  ;;  %v3028_v22 = vsel %vm6639_vm8, %v6530_v43, %v3024_v62  ;;  %v2040_v0 = vpop.xlane.xlu0 %2039  ;;  %v2043_v26 = vpop.xlane.xlu1 %2042  ;;  %v3077_v62 = vor.u32 1.1754944e-38, %v3076_v31  ;;  %v3058_v31 = vsel %vm6687_vm3, %v6546_v30, %v3054_v5 }
 0x4af   : > { %v2095_v41 = vmul.f32 %v2043_v26, %v4848_v32  ;;  %v3073_v26 = vsel %vm6702_vm4, %v6556_v63, %v3069_v54  ;;  %v8245_v63 = vsel %vm6586_vm15, %v6514_v44, %v6579_v37  ;;  %v6751_v54 = vsel %vm6679_vm14, %v3032_v13, %v3028_v22 }
 0x4b0   : > { %v6692_v24 = vpop.eup %4290  ;;  %v6696_v43 = vsub.f32 %v6298_v38, %v1911_v7  ;;  %v2094_v38 = vmul.f32 %v2040_v0, %v4848_v32  ;;  %v2809_v15 = vpop.f32.mrf.mxu1  ;;  %v6747_v42 = vsel %vm6617_vm6, %v6591_v35, %v8245_v63  ;;  %v6760_v44 = vsel %vm6630_vm7, %v6621_v6, %v3043_v52 }
 0x4b1   : > { %v2329_v25 = vmul.f32 %v6692_v24, %v6604_v51  ;;  %v6734_v5 = vadd.f32 1e-05, %v2095_v41  ;;  %v2810_v46 = vadd.f32 %v6481_v61, %v2809_v15  ;;  %v6753_v27 = vpop.eup %4292  ;;  %vm2335_vm15 = vweird.f32 %v6692_v24 }
 0x4b2   : > { %v1975_v1 = vmul.f32 %v6696_v43, %v6696_v43  ;;  %v6725_v0 = vadd.f32 1e-05, %v2094_v38  ;;  %v6762_v37 = vpop.eup %4294  ;;  %v6767_v13 = vsel %vm6710_vm5, %v3062_v58, %v3058_v31  ;;  %v6771_v35 = vsel %vm6720_vm0, %v3077_v62, %v3073_v26 }
 0x4b3   : > { %v2330_v14 = vmul.f32 %v6692_v24, %v2329_v25  ;;  %v3082_v6 = vsub.f32 1.0, %v3081_v60  ;;  %vm2334_vm6 = vweird.f32 %v6604_v51  ;;  %v6789_v60 = vmul.f32 %v6753_v27, %v6645_v48 }
 0x4b4   : > { %v2065_v30 = vsel %vm702_vm2, %v1975_v1, 0.0  ;;  %4296 = vrsqrt.f32 %v6725_v0  ;;  %v6777_v1 = vpop.f32.mrf.mxu3  ;;  %vm2336_vm7 = vmor %vm2334_vm6, %vm2335_vm15  ;;  %vm3085_vm8 = vweird.f32 %v6581_v45  ;;  %vm2344_vm10 = vweird.f32 %v6725_v0 }
 0x4b5   : > { %v2331_v25 = vmul.f32 0.5, %v2330_v14  ;;  %v1878_v38 = vpop.xlane.xlu2 %1877  ;;  %2066 = vadd.xlane.f32.xlu2 %v2065_v30  ;;  %4298 = vrsqrt.f32 %v6734_v5  ;;  %v4064_v14 = vmul.f32 -1.442695, %v2810_v46  ;;  %8246 = vst [vmem:[#allocation20_spill] sm:$0xff] %v6777_v1  ;;  %vm2354_vm3 = vweird.f32 %v6734_v5  ;;  %vm6900_vm5 = vmor %vm3085_vm8, %vm3086_vm9 }
 0x4b6   : > { %v1912_v41 = vmul.f32 %v1878_v38, %v4848_v32  ;;  %v1881_v29 = vpop.xlane.xlu0 %1880  ;;  %v2046_v52 = vpop.xlane.xlu1 %2045  ;;  %vm3101_vm0 = vweird.f32 %v6753_v27  ;;  %vm3115_vm15 = vweird.f32 %v6658_v59  ;;  %vm3116_vm6 = vweird.f32 %v6762_v37 }
 0x4b7   : > { %v2332_v16 = vsub.f32 1.5, %v2331_v25  ;;  %v1913_v58 = vmul.f32 %v1881_v29, %v4848_v32  ;;  %v2096_v62 = vmul.f32 %v2046_v52, %v4848_v32  ;;  %4300 = vpow2.f32 %v4064_v14  ;;  %v8247_v29 = vld [vmem:[#allocation22_spill] sm:$0xff]  ;;  %vm6964_vm9 = vmor %vm3115_vm15, %vm3116_vm6 }
 0x4b8   : > { %v6774_v22 = vsub.f32 %v6329_v3, %v1912_v41  ;;  %v6785_v3 = vmul.f32 %v6762_v37, %v6658_v59  ;;  %v6800_v8 = vpop.f32.mrf.mxu1  ;;  %4302 = vpow2.f32 %v4062_v9  ;;  %v6818_v41 = vor.u32 1.1754944e-38, %v3091_v55 }
 0x4b9   : > { %v2333_v15 = vmul.f32 %v6692_v24, %v2332_v16  ;;  %v6796_v7 = vsub.f32 %v6339_v4, %v1913_v58  ;;  %v6798_v26 = vadd.f32 1e-05, %v2096_v62  ;;  %v3097_v52 = vsub.f32 1.0, %v6789_v60 }
 0x4ba   : > { %v6792_v31 = vpop.eup %4296  ;;  %v1976_v46 = vmul.f32 %v6774_v22, %v6774_v22  ;;  %4051 = vmatmul.msk.bf16.gmra.mxu1 %vm560_vm1, %v8247_v29  ;;  %v3112_v55 = vsub.f32 1.0, %v6785_v3 }
 0x4bb   : > { %v2337_v51 = vsel %vm2336_vm7, %v6692_v24, %v2333_v15  ;;  %v6804_v30 = vpop.eup %4298  ;;  %v2339_v38 = vmul.f32 %v6792_v31, %v6725_v0  ;;  %v6810_v24 = vmul.f32 %v6668_v57, %v3082_v6  ;;  %4304 = vrsqrt.f32 %v6798_v26  ;;  %vm6934_vm7 = vmor %vm3100_vm11, %vm3101_vm0 }
 0x4bc   : > { %v2477_v25 = vmul.f32 %v2337_v51, %v6282_v10  ;;  %v2349_v4 = vmul.f32 %v6804_v30, %v6734_v5  ;;  %v2068_v15 = vsel %vm702_vm2, %v1976_v46, 0.0  ;;  %v1977_v58 = vmul.f32 %v6796_v7, %v6796_v7 }
 0x4bd   : > { %v2049_v63 = vpop.xlane.xlu2 %2048  ;;  %v2340_v16 = vmul.f32 %v6792_v31, %v2339_v38  ;;  %v4301_v62 = vpop.eup %4300  ;;  %2069 = vadd.xlane.f32.xlu0 %v2068_v15  ;;  %vm2345_vm12 = vweird.f32 %v6792_v31  ;;  %vm2355_vm13 = vweird.f32 %v6804_v30  ;;  %v3098_v0 = vmul.f32 %v6753_v27, %v3097_v52 }
 0x4be   : > { %v2513_v10 = vmul.f32 %v6352_v56, %v2477_v25  ;;  %v2097_v9 = vmul.f32 %v2049_v63, %v4848_v32  ;;  %v2350_v6 = vmul.f32 %v6804_v30, %v2349_v4  ;;  %v2052_v38 = vpop.xlane.xlu0 %2051  ;;  %v2071_v4 = vsel %vm702_vm2, %v1977_v58, 0.0  ;;  %v4303_v29 = vpop.eup %4302  ;;  %vm6863_vm14 = vmor %vm2344_vm10, %vm2345_vm12 }
 0x4bf   : > { %v2341_v51 = vmul.f32 0.5, %v2340_v16  ;;  %v2098_v46 = vmul.f32 %v2052_v38, %v4848_v32  ;;  %v2055_v3 = vpop.xlane.xlu1 %2054  ;;  %2072 = vadd.xlane.f32.xlu1 %v2071_v4  ;;  %v6844_v15 = vpop.f32.mrf.mxu3  ;;  %vm6875_vm4 = vmor %vm2354_vm3, %vm2355_vm13  ;;  %v3113_v52 = vmul.f32 %v6762_v37, %v3112_v55 }
 0x4c0   : > { %v6832_v25 = vadd.f32 1e-05, %v2097_v9  ;;  %v2549_v63 = vadd.f32 %v6365_v2, %v2513_v10  ;;  %v2351_v60 = vmul.f32 0.5, %v2350_v6  ;;  %v2099_v9 = vmul.f32 %v2055_v3, %v4848_v32  ;;  %v6850_v58 = vpop.f32.mrf.mxu1 }
 0x4c1   : > { %v2342_v16 = vsub.f32 1.5, %v2341_v51  ;;  %v6842_v10 = vpop.eup %4304  ;;  %v6846_v6 = vadd.f32 1.0, %v4301_v62  ;;  %v6848_v38 = vadd.f32 1e-05, %v2098_v46  ;;  %v4489_v3 = vmov 0  }
 0x4c2   : > { %4306 = vrsqrt.f32 %v6832_v25  ;;  %v2352_v14 = vsub.f32 1.5, %v2351_v60  ;;  %v2359_v47 = vmul.f32 %v6842_v10, %v6798_v26  ;;  %v6855_v1 = vadd.f32 1e-05, %v2099_v9  ;;  %4142 = vset.pattern.permute.xlu2 %v4489_v3  ;;  %4143 = vset.pattern.permute.xlu0 %v4489_v3 }
 0x4c3   : > { %v2343_v51 = vmul.f32 %v6792_v31, %v2342_v16  ;;  %v2581_v4 = vmax.f32 %v2549_v63, 0.0  ;;  %v2808_v60 = vadd.f32 %v6481_v61, %v6625_v40  ;;  %4308 = vrsqrt.f32 %v6848_v38  ;;  %4144 = vset.pattern.permute.xlu1 %v4489_v3 }
 0x4c4   : > { %v2353_v46 = vmul.f32 %v6804_v30, %v2352_v14  ;;  %4310 = vrsqrt.f32 %v6855_v1  ;;  %v3104_v14 = vand.u32 2147483647, %v6645_v48  ;;  %v6889_v16 = vadd.f32 %v6668_v57, %v6810_v24 }
 0x4c5   : > { %v2347_v63 = vsel %vm6863_vm14, %v6792_v31, %v2343_v51  ;;  %4312 = vrcp.f32 %v6846_v6  ;;  %v2360_v31 = vmul.f32 %v6842_v10, %v2359_v47  ;;  %v8252_v51 = vmax.f32 %v6560_v36, 0.0 }
 0x4c6   : > { %v2357_v5 = vsel %vm6875_vm4, %v6804_v30, %v2353_v46  ;;  %v8255_v47 = vand.u32 2147483648, %v6645_v48  ;;  %v4063_v62 = vmul.f32 -1.442695, %v2808_v60  ;;  %v2478_v36 = vmul.f32 %v2347_v63, %v6316_v23 }
 0x4c7   : > { %v2603_v3 = vpack.c.bf16 %v2581_v4, %v8252_v51  ;;  %v2479_v4 = vmul.f32 %v2357_v5, %v6326_v49  ;;  %v2813_v46 = vadd.f32 %v6481_v61, %v6800_v8  ;;  %v6919_v40 = vadd.f32 %v6753_v27, %v3098_v0  ;;  %v6954_v28 = vpop.f32.mrf.mxu3 }
 0x4c8   : > { %v6891_v9 = vpop.eup %4306  ;;  %v6907_v24 = vor.u32 1.1754944e-38, %v8255_v47  ;;  %v6923_v23 = vadd.f32 1.0, %v4303_v29  ;;  %v2361_v49 = vmul.f32 0.5, %v2360_v31  ;;  %v2817_v51 = vpop.f32.mrf.mxu1  ;;  %v3119_v47 = vand.u32 2147483647, %v6658_v59 }
 0x4c9   : > { %v2369_v55 = vmul.f32 %v6891_v9, %v6832_v25  ;;  %4030 = vmatmul.msk.bf16.gmra.mxu3 %vm702_vm2, %v2603_v3  ;;  %v6921_v60 = vpop.eup %4308  ;;  %v2058_v5 = vpop.xlane.xlu2 %2057  ;;  %v6942_v3 = vadd.f32 %v6762_v37, %v3113_v52  ;;  %v8258_v8 = vand.u32 2147483647, %v6581_v45  ;;  %v2514_v11 = vmul.f32 %v6352_v56, %v2478_v36 }
 0x4ca   : > { %v6938_v29 = vpop.eup %4310  ;;  %v2100_v31 = vmul.f32 %v2058_v5, %v4848_v32  ;;  %v2515_v5 = vmul.f32 %v6352_v56, %v2479_v4  ;;  %v2818_v39 = vadd.f32 %v6481_v61, %v2817_v51  ;;  %vm6968_vm10 = vcmp.eq.f32.partialorder %v3104_v14, 8.507059e+37  ;;  %v8265_v4 = vld [vmem:[#allocation26_spill] sm:$0xff] }
 0x4cb   : > { %v2370_v63 = vmul.f32 %v6891_v9, %v2369_v55  ;;  %v3121_v55 = vand.u32 2147483648, %v6658_v59  ;;  %vm6948_vm8 = vcmp.eq.f32.partialorder %v8258_v8, 8.507059e+37  ;;  %v6952_v48 = vpop.eup %4312  ;;  %4314 = vpow2.f32 %v4063_v62  ;;  %4052 = vmatmul.msk.bf16.gmra.mxu1 %vm560_vm1, %v8265_v4 }
 0x4cc   : > { %v4065_v36 = vmul.f32 -1.442695, %v2813_v46  ;;  %v2379_v56 = vmul.f32 %v6921_v60, %v6848_v38  ;;  %v2362_v59 = vsub.f32 1.5, %v2361_v49  ;;  %v2389_v14 = vmul.f32 %v6938_v29, %v6855_v1 }
 0x4cd   : > { %v2371_v52 = vmul.f32 0.5, %v2370_v63  ;;  %3472 = vperm.xlu2 %4142, %v6596_v50   ;;  %v3103_v50 = vsel %vm6934_vm7, %v6753_v27, %v6919_v40  ;;  %v4067_v51 = vmul.f32 -1.442695, %v2818_v39  ;;  %v6982_v34 = vadd.f32 1e-05, %v2100_v31 }
 0x4ce   : > { %v3118_v62 = vsel %vm6964_vm9, %v6762_v37, %v6942_v3  ;;  %v3122_v46 = vor.u32 1.1754944e-38, %v3121_v55  ;;  %v3156_v4 = vmul.f32 %v6952_v48, %v6846_v6  ;;  %v2815_v27 = vadd.f32 %v6481_v61, %v6850_v58 }
 0x4cf   : > { %v2372_v63 = vsub.f32 1.5, %v2371_v52  ;;  %v2550_v40 = vadd.f32 %v6365_v2, %v2514_v11  ;;  %v2551_v49 = vadd.f32 %v6365_v2, %v2515_v5  ;;  %vm6994_vm1 = vcmp.eq.f32.partialorder %v3119_v47, 8.507059e+37 }
 0x4d0   : > { %vm2375_vm11 = vweird.f32 %v6891_v9  ;;  %v2380_v37 = vmul.f32 %v6921_v60, %v2379_v56  ;;  %4316 = vpow2.f32 %v4067_v51  ;;  %v2363_v31 = vmul.f32 %v6842_v10, %v2362_v59  ;;  %v2819_v2 = vpop.f32.mrf.mxu1 }
 0x4d1   : > { %v2373_v0 = vmul.f32 %v6891_v9, %v2372_v63  ;;  %vm2365_vm12 = vweird.f32 %v6842_v10  ;;  %4318 = vpow2.f32 %v4065_v36  ;;  %v2390_v11 = vmul.f32 %v6938_v29, %v2389_v14  ;;  %v2061_v58 = vpop.xlane.xlu0 %2060  ;;  %v4315_v3 = vpop.eup %4314  ;;  %3477 = vperm.xlu0 %4143, %v6747_v42  }
 0x4d2   : > { %vm2374_vm13 = vweird.f32 %v6832_v25  ;;  %4320 = vrsqrt.f32 %v6982_v34  ;;  %v2101_v47 = vmul.f32 %v2061_v58, %v4848_v32  ;;  %v3157_v55 = vsub.f32 1.0, %v3156_v4  ;;  %v7028_v63 = vpop.f32.mrf.mxu3 }
 0x4d3   : > { %vm2364_vm14 = vweird.f32 %v6798_v26  ;;  %vm7011_vm3 = vmor %vm2374_vm13, %vm2375_vm11  ;;  %v4066_v52 = vmul.f32 -1.442695, %v2815_v27  ;;  %v2582_v45 = vmax.f32 %v2550_v40, 0.0  ;;  %v2583_v25 = vmax.f32 %v2551_v49, 0.0 }
 0x4d4   : > { %vm7018_vm4 = vmor %vm2364_vm14, %vm2365_vm12  ;;  %v2377_v42 = vsel %vm7011_vm3, %v6891_v9, %v2373_v0  ;;  %v2381_v26 = vmul.f32 0.5, %v2380_v37  ;;  %v7025_v56 = vadd.f32 1e-05, %v2101_v47  ;;  %v2820_v59 = vadd.f32 %v6481_v61, %v2819_v2 }
 0x4d5   : > { %3487 = vperm.xlu2 %4142, %v6760_v44   ;;  %4322 = vrcp.f32 %v6923_v23  ;;  %v2367_v44 = vsel %vm7018_vm4, %v6842_v10, %v2363_v31  ;;  %v2391_v14 = vmul.f32 0.5, %v2390_v11  ;;  %v8272_v51 = vsel %vm6900_vm5, %v6668_v57, %v6889_v16 }
 0x4d6   : > { %v7042_v9 = vsel %vm6948_vm8, %v6818_v41, %v8272_v51  ;;  %v4317_v4 = vpop.eup %4316  ;;  %v7044_v27 = vadd.f32 1.0, %v4315_v3  ;;  %4324 = vrsqrt.f32 %v7025_v56  ;;  %v3158_v40 = vmul.f32 %v6952_v48, %v3157_v55 }
 0x4d7   : > { %v7051_v10 = vsel %vm6968_vm10, %v6907_v24, %v3103_v50  ;;  %v4319_v30 = vpop.eup %4318  ;;  %v2481_v57 = vmul.f32 %v2377_v42, %v6385_v12  ;;  %v7054_v16 = vadd.f32 1.0, %v4317_v4  ;;  %v2604_v33 = vpack.c.bf16 %v2583_v25, %v2582_v45 }
 0x4d8   : > { %v3123_v41 = vsel %vm6994_vm1, %v3122_v46, %v3118_v62  ;;  %v7058_v49 = vpop.eup %4320  ;;  %v2480_v0 = vmul.f32 %v2367_v44, %v6359_v20  ;;  %v2382_v37 = vsub.f32 1.5, %v2381_v26  ;;  %4326 = vpow2.f32 %v4066_v52  ;;  %3482 = vperm.xlu1 %4144, %v6751_v54   ;;  %v2822_v12 = vpop.f32.mrf.mxu1  ;;  %v7077_v54 = vld [vmem:[%s8101_s9] ss:$0 sm:$0xff] }
 0x4d9   : > { %v4068_v31 = vmul.f32 -1.442695, %v2820_v59  ;;  %v2392_v11 = vsub.f32 1.5, %v2391_v14  ;;  %4328 = vrcp.f32 %v7054_v16  ;;  %4031 = vmatmul.msk.bf16.gmra.mxu3 %vm702_vm2, %v2604_v33  ;;  %vm3160_vm5 = vweird.f32 %v6846_v6  ;;  %3512 = vperm.xlu0 %4143, %v3123_v41   ;;  %v7121_v59 = vld [vmem:[%s8102_s10] ss:$0 sm:$0xff] }
 0x4da   : > { %vm3161_vm0 = vweird.f32 %v6952_v48  ;;  %4330 = vrcp.f32 %v7044_v27  ;;  %v3159_v20 = vadd.f32 %v6952_v48, %v3158_v40  ;;  %v3164_v24 = vand.u32 2147483647, %v6846_v6  ;;  %v7107_v42 = vpop.f32.mrf.mxu3 }
 0x4db   : > { %v3166_v8 = vand.u32 2147483648, %v6846_v6  ;;  %v7070_v50 = vpop.eup %4322  ;;  %v7072_v62 = vadd.f32 1.0, %v4319_v30  ;;  %v2517_v46 = vmul.f32 %v7077_v54, %v2481_v57  ;;  %vm2385_vm15 = vweird.f32 %v6921_v60  ;;  %vm7084_vm6 = vmor %vm3160_vm5, %vm3161_vm0 }
 0x4dc   : > { %v2399_v39 = vmul.f32 %v7058_v49, %v6982_v34  ;;  %v7088_v58 = vpop.eup %4324  ;;  %v2383_v2 = vmul.f32 %v6921_v60, %v2382_v37  ;;  %vm2395_vm7 = vweird.f32 %v6938_v29  ;;  %4332 = vpow2.f32 %v4068_v31 }
 0x4dd   : > { %3492 = vperm.xlu2 %4142, %v6767_v13   ;;  %v2823_v3 = vadd.f32 %v6481_v61, %v2822_v12  ;;  %v2516_v47 = vmul.f32 %v7077_v54, %v2480_v0  ;;  %v2393_v55 = vmul.f32 %v6938_v29, %v2392_v11  ;;  %v2409_v13 = vmul.f32 %v7088_v58, %v7025_v56 }
 0x4de   : > { %v3167_v5 = vor.u32 1.1754944e-38, %v3166_v8  ;;  %v4327_v52 = vpop.eup %4326  ;;  %vm2384_vm8 = vweird.f32 %v6848_v38  ;;  %v3163_v45 = vsel %vm7084_vm6, %v6952_v48, %v3159_v20  ;;  %vm7101_vm9 = vcmp.eq.f32.partialorder %v3164_v24, 8.507059e+37 }
 0x4df   : > { %v3126_v61 = vmul.f32 %v7070_v50, %v6923_v23  ;;  %v4329_v36 = vpop.eup %4328  ;;  %vm7111_vm10 = vmor %vm2384_vm8, %vm2385_vm15  ;;  %vm2394_vm1 = vweird.f32 %v6855_v1  ;;  %v2400_v38 = vmul.f32 %v7058_v49, %v2399_v39  ;;  %v2410_v48 = vmul.f32 %v7088_v58, %v2409_v13 }
 0x4e0   : > { %v2553_v44 = vadd.f32 %v7121_v59, %v2517_v46  ;;  %v7124_v14 = vpop.eup %4330  ;;  %4334 = vrcp.f32 %v7072_v62  ;;  %v2387_v51 = vsel %vm7111_vm10, %v6921_v60, %v2383_v2  ;;  %vm7132_vm11 = vmor %vm2394_vm1, %vm2395_vm7  ;;  %v4069_v4 = vmul.f32 -1.442695, %v2823_v3  ;;  %3497 = vperm.xlu1 %4144, %v6771_v35   ;;  %v7146_v41 = vpop.f32.mrf.mxu1 }
 0x4e1   : > { %v3201_v40 = vmul.f32 %v4329_v36, %v7054_v16  ;;  %v2397_v30 = vsel %vm7132_vm11, %v6938_v29, %v2393_v55  ;;  %v7140_v57 = vadd.f32 1.0, %v4327_v52  ;;  %v3168_v60 = vsel %vm7101_vm9, %v3167_v5, %v3163_v45 }
 0x4e2   : > { %v2552_v33 = vadd.f32 %v7121_v59, %v2516_v47  ;;  %v4333_v0 = vpop.eup %4332  ;;  %v2411_v37 = vmul.f32 0.5, %v2410_v48  ;;  %3527 = vperm.xlu0 %4143, %v3168_v60   ;;  %vm3205_vm12 = vweird.f32 %v7054_v16  ;;  %vm3206_vm13 = vweird.f32 %v4329_v36  ;;  %v7165_v55 = vpop.f32.mrf.mxu3 }
 0x4e3   : > { %v3202_v31 = vsub.f32 1.0, %v3201_v40  ;;  %v2482_v29 = vmul.f32 %v2387_v51, %v6414_v19  ;;  %v2401_v11 = vmul.f32 0.5, %v2400_v38  ;;  %v2585_v35 = vmax.f32 %v2553_v44, 0.0  ;;  %vm7159_vm14 = vmor %vm3205_vm12, %vm3206_vm13 }
 0x4e4   : > { %v3209_v12 = vand.u32 2147483647, %v7054_v16  ;;  %4336 = vpow2.f32 %v4069_v4  ;;  %v3211_v24 = vand.u32 2147483648, %v7054_v16  ;;  %v3127_v8 = vsub.f32 1.0, %v3126_v61 }
 0x4e5   : > { %3502 = vperm.xlu2 %4142, %v7042_v9   ;;  %v3203_v20 = vmul.f32 %v4329_v36, %v3202_v31  ;;  %v2483_v46 = vmul.f32 %v2397_v30, %v6419_v53  ;;  %4338 = vrcp.f32 %v7140_v57  ;;  %v7155_v39 = vadd.f32 1.0, %v4333_v0 }
 0x4e6   : > { %v2584_v6 = vmax.f32 %v2552_v33, 0.0  ;;  %v7163_v9 = vpop.eup %4334  ;;  %v2412_v2 = vsub.f32 1.5, %v2411_v37  ;;  %vm3210_vm3 = vcmp.eq.f32.partialorder %v3209_v12, 8.507059e+37  ;;  %v3212_v47 = vor.u32 1.1754944e-38, %v3211_v24 }
 0x4e7   : > { %v3204_v3 = vadd.f32 %v4329_v36, %v3203_v20  ;;  %vm2414_vm4 = vweird.f32 %v7025_v56  ;;  %v3128_v13 = vmul.f32 %v7070_v50, %v3127_v8  ;;  %vm3130_vm5 = vweird.f32 %v6923_v23 }
 0x4e8   : > { %v2605_v53 = vpack.c.bf16 %v2585_v35, %v2584_v6  ;;  %v7171_v16 = vmul.f32 %v7077_v54, %v2482_v29  ;;  %v2402_v5 = vsub.f32 1.5, %v2401_v11  ;;  %vm3131_vm0 = vweird.f32 %v7070_v50  ;;  %3507 = vperm.xlu1 %4144, %v7051_v10   ;;  %v7185_v48 = vpop.f32.mrf.mxu1 }
 0x4e9   : > { %v3208_v52 = vsel %vm7159_vm14, %v4329_v36, %v3204_v3  ;;  %v3129_v25 = vadd.f32 %v7070_v50, %v3128_v13  ;;  %vm7179_vm15 = vmor %vm3130_vm5, %vm3131_vm0  ;;  %v3134_v26 = vand.u32 2147483647, %v6923_v23  ;;  %v3136_v38 = vand.u32 2147483648, %v6923_v23 }
 0x4ea   : > { %4032 = vmatmul.msk.bf16.gmra.mxu3 %vm702_vm2, %v2605_v53  ;;  %v3213_v45 = vsel %vm3210_vm3, %v3212_v47, %v3208_v52  ;;  %v4337_v36 = vpop.eup %4336  ;;  %v2413_v44 = vmul.f32 %v7088_v58, %v2412_v2  ;;  %vm2415_vm6 = vweird.f32 %v7088_v58  ;;  %4340 = vrcp.f32 %v7155_v39  ;;  %v2064_v47 = vpop.xlane.xlu1 %2063 }
 0x4eb   : > { %3542 = vperm.xlu0 %4143, %v3213_v45   ;;  %v3141_v10 = vmul.f32 %v7124_v14, %v7044_v27  ;;  %v7192_v51 = vpop.eup %4338  ;;  %vm2405_vm7 = vweird.f32 %v7058_v49  ;;  %v3133_v23 = vsel %vm7179_vm15, %v7070_v50, %v3129_v25  ;;  %vm3135_vm8 = vcmp.eq.f32.partialorder %v3134_v26, 8.507059e+37  ;;  %vm7207_vm1 = vmor %vm2414_vm4, %vm2415_vm6 }
 0x4ec   : > { %v3137_v1 = vor.u32 1.1754944e-38, %v3136_v38  ;;  %vm3145_vm9 = vweird.f32 %v7044_v27  ;;  %vm3146_vm10 = vweird.f32 %v7124_v14  ;;  %v3149_v40 = vand.u32 2147483647, %v7044_v27 }
 0x4ed   : > { %v3142_v4 = vsub.f32 1.0, %v3141_v10  ;;  %v3151_v30 = vand.u32 2147483648, %v7044_v27  ;;  %v2519_v60 = vmul.f32 %v7077_v54, %v2483_v46  ;;  %v7211_v50 = vadd.f32 1.0, %v4337_v36  ;;  %vm7223_vm12 = vmor %vm3145_vm9, %vm3146_vm10  ;;  %v7235_v46 = vpop.f32.mrf.mxu3 }
 0x4ee   : > { %v3138_v0 = vsel %vm3135_vm8, %v3137_v1, %v3133_v23  ;;  %v3171_v37 = vmul.f32 %v7163_v9, %v7072_v62  ;;  %v2403_v31 = vmul.f32 %v7058_v49, %v2402_v5  ;;  %v2417_v29 = vsel %vm7207_vm1, %v7088_v58, %v2413_v44 }
 0x4ef   : > { %3517 = vperm.xlu2 %4142, %v3138_v0   ;;  %v3143_v11 = vmul.f32 %v7124_v14, %v3142_v4  ;;  %vm3175_vm11 = vweird.f32 %v7072_v62  ;;  %v3152_v35 = vor.u32 1.1754944e-38, %v3151_v30  ;;  %vm3176_vm13 = vweird.f32 %v7163_v9 }
 0x4f0   : > { %v3172_v12 = vsub.f32 1.0, %v3171_v37  ;;  %v3179_v20 = vand.u32 2147483647, %v7072_v62  ;;  %v7229_v24 = vpop.eup %4340  ;;  %vm3150_vm14 = vcmp.eq.f32.partialorder %v3149_v40, 8.507059e+37  ;;  %v3181_v8 = vand.u32 2147483648, %v7072_v62  ;;  %v7244_v2 = vpop.f32.mrf.mxu1  ;;  %vm7251_vm5 = vmor %vm3175_vm11, %vm3176_vm13 }
 0x4f1   : > { %v3144_v58 = vadd.f32 %v7124_v14, %v3143_v11  ;;  %v3186_v27 = vmul.f32 %v7192_v51, %v7140_v57  ;;  %4342 = vrcp.f32 %v7211_v50  ;;  %vm3190_vm4 = vweird.f32 %v7140_v57 }
 0x4f2   : > { %v3173_v6 = vmul.f32 %v7163_v9, %v3172_v12  ;;  %vm7239_vm3 = vcmp.eq.f32.partialorder %v3179_v20, 8.507059e+37  ;;  %v3182_v53 = vor.u32 1.1754944e-38, %v3181_v8  ;;  %vm3191_vm0 = vweird.f32 %v7192_v51 }
 0x4f3   : > { %v3148_v3 = vsel %vm7223_vm12, %v7124_v14, %v3144_v58  ;;  %v3187_v13 = vsub.f32 1.0, %v3186_v27  ;;  %v3194_v45 = vand.u32 2147483647, %v7140_v57  ;;  %v3196_v25 = vand.u32 2147483648, %v7140_v57  ;;  %vm7270_vm6 = vmor %vm3190_vm4, %vm3191_vm0 }
 0x4f4   : > { %v3153_v5 = vsel %vm3150_vm14, %v3152_v35, %v3148_v3  ;;  %v3174_v52 = vadd.f32 %v7163_v9, %v3173_v6  ;;  %vm2404_vm15 = vweird.f32 %v6982_v34  ;;  %v2554_v14 = vadd.f32 %v7121_v59, %v7171_v16 }
 0x4f5   : > { %3522 = vperm.xlu1 %4144, %v3153_v5   ;;  %v3188_v62 = vmul.f32 %v7192_v51, %v3187_v13  ;;  %v2555_v61 = vadd.f32 %v7121_v59, %v2519_v60  ;;  %v2485_v26 = vmul.f32 %v2417_v29, %v6463_v18  ;;  %v3197_v34 = vor.u32 1.1754944e-38, %v3196_v25  ;;  %vm7278_vm8 = vmor %vm2404_vm15, %vm2405_vm7  ;;  %v7300_v11 = vpop.f32.mrf.mxu3  ;;  %v7313_v25 = vld [vmem:[#allocation2] ss:$0 sm:$0xff] }
 0x4f6   : > { %v3178_v38 = vsel %vm7251_vm5, %v7163_v9, %v3174_v52  ;;  %v3216_v44 = vmul.f32 %v7229_v24, %v7155_v39  ;;  %v2586_v57 = vmax.f32 %v2554_v14, 0.0  ;;  %v2407_v1 = vsel %vm7278_vm8, %v7058_v49, %v2403_v31 }
 0x4f7   : > { %v3183_v18 = vsel %vm7239_vm3, %v3182_v53, %v3178_v38  ;;  %v3189_v9 = vadd.f32 %v7192_v51, %v3188_v62  ;;  %v2587_v10 = vmax.f32 %v2555_v61, 0.0  ;;  %v4343_v23 = vpop.eup %4342  ;;  %vm3195_vm9 = vcmp.eq.f32.partialorder %v3194_v45, 8.507059e+37 }
 0x4f8   : > { %3532 = vperm.xlu2 %4142, %v3183_v18   ;;  %v3217_v4 = vsub.f32 1.0, %v3216_v44  ;;  %vm3220_vm7 = vweird.f32 %v7155_v39  ;;  %vm3221_vm10 = vweird.f32 %v7229_v24  ;;  %v3224_v60 = vand.u32 2147483647, %v7155_v39  ;;  %v2832_v37 = vpop.f32.mrf.mxu1 }
 0x4f9   : > { %v3193_v40 = vsel %vm7270_vm6, %v7192_v51, %v3189_v9  ;;  %v2606_v30 = vpack.c.bf16 %v2587_v10, %v2586_v57  ;;  %v3226_v0 = vand.u32 2147483648, %v7155_v39  ;;  %v2484_v49 = vmul.f32 %v2407_v1, %v6445_v21  ;;  %vm3222_vm1 = vmor %vm3220_vm7, %vm3221_vm10 }
 0x4fa   : > { %v3218_v33 = vmul.f32 %v7229_v24, %v3217_v4  ;;  %v2521_v31 = vmul.f32 %v7077_v54, %v2485_v26  ;;  %v3198_v29 = vsel %vm3195_vm9, %v3197_v34, %v3193_v40  ;;  %v3231_v51 = vmul.f32 %v4343_v23, %v7211_v50 }
 0x4fb   : > { %4033 = vmatmul.msk.bf16.gmra.mxu3 %vm702_vm2, %v2606_v30  ;;  %vm3225_vm11 = vcmp.eq.f32.partialorder %v3224_v60, 8.507059e+37  ;;  %v3227_v35 = vor.u32 1.1754944e-38, %v3226_v0  ;;  %vm3235_vm12 = vweird.f32 %v7211_v50  ;;  %vm3236_vm13 = vweird.f32 %v4343_v23 }
 0x4fc   : > { %v3219_v56 = vadd.f32 %v7229_v24, %v3218_v33  ;;  %v3232_v39 = vsub.f32 1.0, %v3231_v51  ;;  %v3239_v21 = vand.u32 2147483647, %v7211_v50  ;;  %v3241_v12 = vand.u32 2147483648, %v7211_v50  ;;  %vm3237_vm14 = vmor %vm3235_vm12, %vm3236_vm13 }
 0x4fd   : > { %3537 = vperm.xlu1 %4144, %v3198_v29   ;;  %v2520_v58 = vmul.f32 %v7077_v54, %v2484_v49  ;;  %v2557_v3 = vadd.f32 %v7121_v59, %v2521_v31  ;;  %v2102_v50 = vmul.f32 %v2064_v47, %v4848_v32  ;;  %v7311_v45 = vpop.f32.mrf.mxu3  ;;  %v2825_v62 = vadd.f32 %v7313_v25, %v7146_v41 }
 0x4fe   : > { %v3223_v20 = vsel %vm3222_vm1, %v7229_v24, %v3219_v56  ;;  %v3233_v27 = vmul.f32 %v4343_v23, %v3232_v39  ;;  %v3242_v6 = vor.u32 1.1754944e-38, %v3241_v12  ;;  %vm3240_vm3 = vcmp.eq.f32.partialorder %v3239_v21, 8.507059e+37 }
 0x4ff   : > { %v3228_v8 = vsel %vm3225_vm11, %v3227_v35, %v3223_v20  ;;  %v2556_v5 = vadd.f32 %v7121_v59, %v2520_v58  ;;  %v2589_v24 = vmax.f32 %v2557_v3, 0.0  ;;  %v2134_v61 = vadd.f32 1e-05, %v2102_v50 }
 0x500   : > { %3547 = vperm.xlu2 %4142, %v3228_v8   ;;  %v3234_v19 = vadd.f32 %v4343_v23, %v3233_v27  ;;  %v2834_v53 = vpop.f32.mrf.mxu1  ;;  %v4070_v38 = vmul.f32 -1.442695, %v2825_v62  ;;  %v2828_v44 = vadd.f32 %v7313_v25, %v7185_v48  ;;  %v2830_v41 = vadd.f32 %v7313_v25, %v7244_v2 }
 0x501   : > { %v2588_v14 = vmax.f32 %v2556_v5, 0.0  ;;  %4344 = vrsqrt.f32 %v2134_v61  ;;  %v2833_v10 = vadd.f32 %v7313_v25, %v2832_v37  ;;  %v2835_v49 = vadd.f32 %v7313_v25, %v2834_v53  ;;  %v7355_v53 = vld [vmem:[%s8104_s12] ss:$0 sm:$0xff] }
 0x502   : > { %v3238_v13 = vsel %vm3237_vm14, %v4343_v23, %v3234_v19  ;;  %4346 = vpow2.f32 %v4070_v38  ;;  %v4071_v57 = vmul.f32 -1.442695, %v2828_v44  ;;  %v4072_v4 = vmul.f32 -1.442695, %v2830_v41 }
 0x503   : > { %v3243_v52 = vsel %vm3240_vm3, %v3242_v6, %v3238_v13  ;;  %v2607_v26 = vpack.c.bf16 %v2589_v24, %v2588_v14  ;;  %v4073_v30 = vmul.f32 -1.442695, %v2833_v10  ;;  %v4074_v20 = vmul.f32 -1.442695, %v2835_v49 }
 0x504   : > { %4348 = vpow2.f32 %v4071_v57  ;;  %vm2424_vm5 = vweird.f32 %v2134_v61  ;;  %v2678_v14 = vadd.f32 %v7355_v53, %v6844_v15 }
 0x505   : > { %3552 = vperm.xlu1 %4144, %v3243_v52   ;;  %v7318_v34 = vpop.f32.mrf.mxu3 }
 0x507   : > { %v4345_v18 = vpop.eup %4344 }
 0x508   : > { %v2837_v36 = vpop.f32.mrf.mxu1  ;;  %v4347_v9 = vpop.eup %4346  ;;  %v2419_v23 = vmul.f32 %v4345_v18, %v2134_v61  ;;  %vm2425_vm4 = vweird.f32 %v4345_v18 }
 0x509   : > { %v7325_v1 = vadd.f32 1.0, %v4347_v9  ;;  %v2838_v12 = vadd.f32 %v7313_v25, %v2837_v36  ;;  %vm2426_vm0 = vmor %vm2424_vm5, %vm2425_vm4 }
 0x50a   : > { %v2420_v48 = vmul.f32 %v4345_v18, %v2419_v23  ;;  %v4349_v2 = vpop.eup %4348 }
 0x50b   : > { %4034 = vmatmul.msk.bf16.gmra.mxu3 %vm702_vm2, %v2607_v26  ;;  %4350 = vrcp.f32 %v7325_v1  ;;  %v7337_v51 = vadd.f32 1.0, %v4349_v2  ;;  %v4075_v47 = vmul.f32 -1.442695, %v2838_v12  ;;  %vm3250_vm15 = vweird.f32 %v7325_v1 }
 0x50c   : > { %4352 = vpow2.f32 %v4072_v4  ;;  %v2421_v33 = vmul.f32 0.5, %v2420_v48  ;;  %v3256_v44 = vand.u32 2147483648, %v7325_v1  ;;  %v3254_v15 = vand.u32 2147483647, %v7325_v1 }
 0x50d   : > { %v7327_v40 = vpop.f32.mrf.mxu3  ;;  %4354 = vpow2.f32 %v4073_v30  ;;  %vm3265_vm11 = vweird.f32 %v7337_v51 }
 0x50e   : > { %v2422_v29 = vsub.f32 1.5, %v2421_v33  ;;  %4356 = vrcp.f32 %v7337_v51  ;;  %v7394_v33 = vadd.f32 %v7355_v53, %v6954_v28  ;;  %v3257_v49 = vor.u32 1.1754944e-38, %v3256_v44 }
 0x50f   : > { %vm7404_vm9 = vcmp.eq.f32.partialorder %v3254_v15, 8.507059e+37 }
 0x510   : > { %v2839_v16 = vpop.f32.mrf.mxu1  ;;  %v2423_v58 = vmul.f32 %v4345_v18, %v2422_v29 }
 0x511   : > { %v7332_v0 = vpop.eup %4350  ;;  %v2840_v27 = vadd.f32 %v7313_v25, %v2839_v16 }
 0x512   : > { %v4353_v37 = vpop.eup %4352  ;;  %v3246_v39 = vmul.f32 %v7332_v0, %v7325_v1  ;;  %v2427_v52 = vsel %vm2426_vm0, %v4345_v18, %v2423_v58  ;;  %vm3251_vm6 = vweird.f32 %v7332_v0 }
 0x513   : > { %v4355_v56 = vpop.eup %4354  ;;  %v7343_v21 = vadd.f32 1.0, %v4353_v37  ;;  %v4076_v50 = vmul.f32 -1.442695, %v2840_v27  ;;  %v2486_v26 = vmul.f32 %v2427_v52, %v6456_v17  ;;  %vm7380_vm8 = vmor %vm3250_vm15, %vm3251_vm6 }
 0x514   : > { %v7347_v8 = vadd.f32 1.0, %v4355_v56  ;;  %v3247_v3 = vsub.f32 1.0, %v3246_v39  ;;  %v7362_v62 = vpop.eup %4356 }
 0x515   : > { %v7339_v35 = vpop.f32.mrf.mxu3  ;;  %4358 = vrcp.f32 %v7343_v21  ;;  %v3261_v41 = vmul.f32 %v7362_v62, %v7337_v51  ;;  %v2522_v23 = vmul.f32 %v7077_v54, %v2486_v26  ;;  %vm3266_vm12 = vweird.f32 %v7362_v62 }
 0x516   : > { %4360 = vpow2.f32 %v4074_v20  ;;  %v3248_v24 = vmul.f32 %v7332_v0, %v3247_v3  ;;  %v2685_v3 = vadd.f32 %v7355_v53, %v7107_v42  ;;  %vm3295_vm13 = vweird.f32 %v7347_v8  ;;  %vm7507_vm15 = vmor %vm3265_vm11, %vm3266_vm12 }
 0x517   : > { %4362 = vrcp.f32 %v7347_v8  ;;  %v3262_v20 = vsub.f32 1.0, %v3261_v41  ;;  %v7421_v52 = vadd.f32 %v7121_v59, %v2522_v23  ;;  %vm3280_vm3 = vweird.f32 %v7343_v21 }
 0x518   : > { %v7329_v60 = vpop.f32.mrf.mxu1  ;;  %v3249_v9 = vadd.f32 %v7332_v0, %v3248_v24 }
 0x519   : > { %v2590_v15 = vmax.f32 %v7421_v52, 0.0 }
 0x51a   : > { %v3253_v39 = vsel %vm7380_vm8, %v7332_v0, %v3249_v9 }
 0x51b   : > { %v7371_v38 = vpop.eup %4358  ;;  %v3258_v42 = vsel %vm7404_vm9, %v3257_v49, %v3253_v39 }
 0x51c   : > { %v4361_v16 = vpop.eup %4360  ;;  %v3276_v1 = vmul.f32 %v7371_v38, %v7343_v21  ;;  %vm3281_vm5 = vweird.f32 %v7371_v38 }
 0x51d   : > { %v7366_v61 = vpop.f32.mrf.mxu3  ;;  %v7378_v17 = vpop.eup %4362  ;;  %v7399_v29 = vadd.f32 1.0, %v4361_v16 }
 0x51e   : > { %vm3296_vm14 = vweird.f32 %v7378_v17 }
 0x51f   : > { %vm7493_vm4 = vmor %vm3295_vm13, %vm3296_vm14 }
 0x520   : > { %v7335_v31 = vpop.f32.mrf.mxu1 }
 0x521   : > { %v2845_v9 = vadd.f32 %v7313_v25, %v7335_v31  ;;  %v3271_v31 = vand.u32 2147483648, %v7337_v51 }
 0x528   : > { %v2067_v6 = vpop.xlane.xlu2 %2066  ;;  %v2847_v5 = vpop.f32.mrf.mxu1 }
 0x529   : > { %v2103_v19 = vmul.f32 %v2067_v6, %v4848_v32 }
 0x52b   : > { %v7357_v13 = vadd.f32 1e-05, %v2103_v19  ;;  %v3291_v19 = vmul.f32 %v7378_v17, %v7347_v8 }
 0x52d   : > { %4364 = vrsqrt.f32 %v7357_v13  ;;  %vm2434_vm10 = vweird.f32 %v7357_v13 }
 0x52e   : > { %4366 = vpow2.f32 %v4075_v47  ;;  %v7416_v47 = vpop.f32.mrf.mxu3 }
 0x52f   : > { %4368 = vpow2.f32 %v4076_v50  ;;  %v3277_v50 = vsub.f32 1.0, %v3276_v1  ;;  %v3286_v1 = vand.u32 2147483648, %v7343_v21 }
 0x530   : > { %v3473_v36 = vpop.permute.xlu2 %3472  ;;  %v2070_v4 = vpop.xlane.xlu0 %2069 }
 0x531   : > { %v3630_v18 = vmul.f32 %v3473_v36, %v2678_v14  ;;  %v7388_v30 = vpop.f32.mrf.mxu1  ;;  %v2104_v37 = vmul.f32 %v2070_v4, %v4848_v32  ;;  %v2848_v14 = vadd.f32 %v7313_v25, %v2847_v5  ;;  %v3263_v36 = vmul.f32 %v7362_v62, %v3262_v20 }
 0x532   : > { %v2073_v56 = vpop.xlane.xlu1 %2072  ;;  %v3292_v5 = vsub.f32 1.0, %v3291_v19  ;;  %v7446_v4 = vmul.f32 %v7371_v38, %v3277_v50 }
 0x533   : > { %v7384_v10 = vpop.eup %4364  ;;  %3694 = vrot.lane.b32.xlu0 %v3630_v18, %s4490_s17  ;;  %v7409_v27 = vadd.f32 1e-05, %v2104_v37  ;;  %v2105_v6 = vmul.f32 %v2073_v56, %v4848_v32  ;;  %v2843_v18 = vadd.f32 %v7313_v25, %v7329_v60  ;;  %v4079_v57 = vmul.f32 -1.442695, %v2848_v14 }
 0x534   : > { %v4367_v48 = vpop.eup %4366  ;;  %v2429_v2 = vmul.f32 %v7384_v10, %v7357_v13  ;;  %vm2435_vm7 = vweird.f32 %v7384_v10  ;;  %v7452_v60 = vadd.f32 %v7362_v62, %v3263_v36  ;;  %v4078_v56 = vmul.f32 -1.442695, %v2845_v9 }
 0x535   : > { %v4369_v28 = vpop.eup %4368  ;;  %v7418_v0 = vadd.f32 1.0, %v4367_v48  ;;  %4370 = vrsqrt.f32 %v7409_v27  ;;  %v7425_v32 = vadd.f32 1e-05, %v2105_v6  ;;  %vm2436_vm1 = vmor %vm2434_vm10, %vm2435_vm7  ;;  %v4077_v49 = vmul.f32 -1.442695, %v2843_v18 }
 0x536   : > { %v2430_v58 = vmul.f32 %v7384_v10, %v2429_v2  ;;  %4372 = vrcp.f32 %v7399_v29  ;;  %v7428_v26 = vadd.f32 1.0, %v4369_v28  ;;  %v3293_v2 = vmul.f32 %v7378_v17, %v3292_v5 }
 0x537   : > { %4374 = vrsqrt.f32 %v7425_v32  ;;  %v3299_v14 = vand.u32 2147483647, %v7347_v8  ;;  %vm2444_vm6 = vweird.f32 %v7409_v27  ;;  %vm2454_vm10 = vweird.f32 %v7425_v32 }
 0x538   : > { %v2431_v24 = vmul.f32 0.5, %v2430_v58  ;;  %v3488_v16 = vpop.permute.xlu2 %3487  ;;  %4376 = vrcp.f32 %v7418_v0  ;;  %v7474_v58 = vpop.f32.mrf.mxu3  ;;  %vm3340_vm14 = vweird.f32 %v7428_v26 }
 0x539   : > { %v7443_v23 = vpop.f32.mrf.mxu1  ;;  %4378 = vrcp.f32 %v7428_v26  ;;  %v3633_v50 = vmul.f32 %v3488_v16, %v2685_v3  ;;  %vm7515_vm8 = vcmp.eq.f32.partialorder %v3299_v14, 8.507059e+37 }
 0x53a   : > { %v2432_v44 = vsub.f32 1.5, %v2431_v24  ;;  %4380 = vpow2.f32 %v4079_v57  ;;  %v3294_v24 = vadd.f32 %v7378_v17, %v3293_v2 }
 0x53b   : > { %3557 = vperm.xlu0 %4143, %v3258_v42   ;;  %v7456_v48 = vpop.eup %4370  ;;  %v3269_v42 = vand.u32 2147483647, %v7337_v51  ;;  %4382 = vpow2.f32 %v4077_v49 }
 0x53c   : > { %v2433_v41 = vmul.f32 %v7384_v10, %v2432_v44  ;;  %v7462_v37 = vpop.eup %4372  ;;  %v2439_v12 = vmul.f32 %v7456_v48, %v7409_v27  ;;  %4384 = vpow2.f32 %v4078_v56  ;;  %vm2445_vm0 = vweird.f32 %v7456_v48 }
 0x53d   : > { %v7467_v20 = vpop.eup %4374  ;;  %vm2446_vm7 = vmor %vm2444_vm6, %vm2445_vm0  ;;  %vm3270_vm12 = vcmp.eq.f32.partialorder %v3269_v42, 8.507059e+37  ;;  %vm3311_vm0 = vweird.f32 %v7462_v37 }
 0x53e   : > { %v2437_v13 = vsel %vm2436_vm1, %v7384_v10, %v2433_v41  ;;  %v3301_v10 = vand.u32 2147483648, %v7347_v8  ;;  %v7472_v28 = vpop.eup %4376  ;;  %v2449_v19 = vmul.f32 %v7467_v20, %v7425_v32  ;;  %v3306_v41 = vmul.f32 %v7462_v37, %v7399_v29  ;;  %vm7543_vm1 = vmor %vm3280_vm3, %vm3281_vm5 }
 0x53f   : > { %v2487_v39 = vmul.f32 %v2437_v13, %v6696_v43  ;;  %v2440_v43 = vmul.f32 %v7456_v48, %v2439_v12  ;;  %v7484_v36 = vpop.eup %4378  ;;  %v3298_v12 = vsel %vm7493_vm4, %v7378_v17, %v3294_v24  ;;  %vm2455_vm9 = vweird.f32 %v7467_v20 }
 0x540   : > { %v2450_v5 = vmul.f32 %v7467_v20, %v2449_v19  ;;  %v7497_v16 = vpop.permute.xlu2 %3492  ;;  %v3302_v9 = vor.u32 1.1754944e-38, %v3301_v10  ;;  %v4381_v49 = vpop.eup %4380  ;;  %v3336_v51 = vmul.f32 %v7484_v36, %v7428_v26  ;;  %v3268_v19 = vsel %vm7507_vm15, %v7362_v62, %v7452_v60  ;;  %vm2456_vm11 = vmor %vm2454_vm10, %vm2455_vm9 }
 0x541   : > { %v2523_v6 = vmul.f32 %v7077_v54, %v2487_v39  ;;  %v2441_v44 = vmul.f32 0.5, %v2440_v43  ;;  %v2854_v39 = vpop.f32.mrf.mxu1  ;;  %v3279_v24 = vadd.f32 %v7371_v38, %v7446_v4  ;;  %v4383_v14 = vpop.eup %4382  ;;  %v7547_v4 = vadd.f32 1.0, %v4381_v49 }
 0x542   : > { %v2451_v13 = vmul.f32 0.5, %v2450_v5  ;;  %v2855_v52 = vadd.f32 %v7313_v25, %v2854_v39  ;;  %v3303_v32 = vsel %vm7515_vm8, %v3302_v9, %v3298_v12  ;;  %v3284_v5 = vand.u32 2147483647, %v7343_v21 }
 0x543   : > { %3700 = vrot.lane.b32.xlu0 %v3633_v50, %s4490_s17  ;;  %v2559_v18 = vadd.f32 %v7121_v59, %v2523_v6  ;;  %v2442_v57 = vsub.f32 1.5, %v2441_v44  ;;  %v3478_v56 = vpop.permute.xlu0 %3477  ;;  %v3272_v50 = vor.u32 1.1754944e-38, %v3271_v31  ;;  %v7555_v31 = vpop.f32.mrf.mxu3  ;;  %v3307_v3 = vsub.f32 1.0, %v3306_v41 }
 0x544   : > { %v2452_v43 = vsub.f32 1.5, %v2451_v13  ;;  %v3631_v27 = vmul.f32 %v3478_v56, %v7394_v33  ;;  %v4082_v42 = vmul.f32 -1.442695, %v2855_v52  ;;  %v3287_v41 = vor.u32 1.1754944e-38, %v3286_v1 }
 0x545   : > { %v2591_v2 = vmax.f32 %v2559_v18, 0.0  ;;  %v2443_v6 = vmul.f32 %v7456_v48, %v2442_v57  ;;  %v3337_v18 = vsub.f32 1.0, %v3336_v51  ;;  %v2693_v57 = vadd.f32 %v7355_v53, %v7300_v11 }
 0x546   : > { %v2453_v33 = vmul.f32 %v7467_v20, %v2452_v43  ;;  %3696 = vrot.lane.b32.xlu2 %v3631_v27, %s4490_s17  ;;  %v3273_v8 = vsel %vm3270_vm12, %v3272_v50, %v3268_v19  ;;  %4386 = vrcp.f32 %v7547_v4  ;;  %v2850_v11 = vadd.f32 %v7313_v25, %v7388_v30 }
 0x547   : > { %v2608_v17 = vpack.c.bf16 %v2591_v2, %v2590_v15  ;;  %v2447_v44 = vsel %vm2446_vm7, %v7456_v48, %v2443_v6  ;;  %v4385_v15 = vpop.eup %4384  ;;  %vm7576_vm13 = vcmp.eq.f32.partialorder %v3284_v5, 8.507059e+37  ;;  %v3308_v21 = vmul.f32 %v7462_v37, %v3307_v3 }
 0x548   : > { %v2488_v60 = vmul.f32 %v2447_v44, %v6774_v22  ;;  %v2457_v48 = vsel %vm2456_vm11, %v7467_v20, %v2453_v33  ;;  %v2683_v22 = vadd.f32 %v7355_v53, %v7028_v63  ;;  %v3283_v20 = vsel %vm7543_vm1, %v7371_v38, %v3279_v24  ;;  %v3503_v49 = vpop.permute.xlu2 %3502 }
 0x549   : > { %4035 = vmatmul.msk.bf16.gmra.mxu3 %vm702_vm2, %v2608_v17  ;;  %v2489_v9 = vmul.f32 %v2457_v48, %v6796_v7  ;;  %v7574_v7 = vadd.f32 1.0, %v4383_v14  ;;  %v3338_v38 = vmul.f32 %v7484_v36, %v3337_v18  ;;  %v7582_v1 = vadd.f32 1.0, %v4385_v15  ;;  %v2857_v51 = vpop.f32.mrf.mxu1 }
 0x54a   : > { %v2524_v13 = vmul.f32 %v7077_v54, %v2488_v60  ;;  %v3483_v2 = vpop.permute.xlu1 %3482  ;;  %v3321_v12 = vmul.f32 %v7472_v28, %v7418_v0  ;;  %4388 = vpow2.f32 %v4082_v42  ;;  %v3636_v10 = vmul.f32 %v3503_v49, %v2693_v57 }
 0x54b   : > { %3572 = vperm.xlu0 %4143, %v3303_v32   ;;  %v2525_v63 = vmul.f32 %v7077_v54, %v2489_v9  ;;  %v3632_v56 = vmul.f32 %v3483_v2, %v2683_v22  ;;  %vm3341_vm3 = vweird.f32 %v7484_v36  ;;  %v2688_v6 = vadd.f32 %v7355_v53, %v7165_v55  ;;  %v7610_v52 = vpop.f32.mrf.mxu3 }
 0x54c   : > { %v2560_v54 = vadd.f32 %v7121_v59, %v2524_v13  ;;  %v4080_v43 = vmul.f32 -1.442695, %v2850_v11  ;;  %v2853_v27 = vadd.f32 %v7313_v25, %v7443_v23  ;;  %4390 = vrcp.f32 %v7574_v7  ;;  %v7602_v24 = vpop.eup %4386  ;;  %vm7604_vm4 = vmor %vm3340_vm14, %vm3341_vm3 }
 0x54d   : > { %3698 = vrot.lane.b32.xlu1 %v3632_v56, %s4490_s17  ;;  %v2561_v30 = vadd.f32 %v7121_v59, %v2525_v63  ;;  %v3346_v59 = vand.u32 2147483648, %v7428_v26  ;;  %v3288_v17 = vsel %vm7576_vm13, %v3287_v41, %v3283_v20  ;;  %v3339_v19 = vadd.f32 %v7484_v36, %v3338_v38 }
 0x54e   : > { %3562 = vperm.xlu2 %4142, %v3273_v8   ;;  %v3344_v50 = vand.u32 2147483647, %v7428_v26  ;;  %v2592_v55 = vmax.f32 %v2560_v54, 0.0  ;;  %v3309_v23 = vadd.f32 %v7462_v37, %v3308_v21  ;;  %v3316_v33 = vand.u32 2147483648, %v7399_v29 }
 0x54f   : > { %v2593_v14 = vmax.f32 %v2561_v30, 0.0  ;;  %4392 = vrcp.f32 %v7582_v1  ;;  %vm3310_vm5 = vweird.f32 %v7399_v29  ;;  %v3322_v26 = vsub.f32 1.0, %v3321_v12 }
 0x550   : > { %4394 = vpow2.f32 %v4080_v43  ;;  %v4081_v62 = vmul.f32 -1.442695, %v2853_v27  ;;  %v3347_v15 = vor.u32 1.1754944e-38, %v3346_v59  ;;  %v3314_v60 = vand.u32 2147483647, %v7399_v29  ;;  %v4389_v32 = vpop.eup %4388  ;;  %vm7622_vm6 = vmor %vm3310_vm5, %vm3311_vm0  ;;  %v3518_v39 = vpop.permute.xlu2 %3517 }
 0x551   : > { %v3634_v48 = vmul.f32 %v7497_v16, %v2688_v6  ;;  %v3343_v5 = vsel %vm7604_vm4, %v7484_v36, %v3339_v19  ;;  %vm3345_vm15 = vcmp.eq.f32.partialorder %v3344_v50, 8.507059e+37  ;;  %v3381_v18 = vmul.f32 %v7602_v24, %v7547_v4 }
 0x552   : > { %v2609_v3 = vpack.c.bf16 %v2593_v14, %v2592_v55  ;;  %v7626_v57 = vpop.eup %4390  ;;  %v3323_v29 = vmul.f32 %v7472_v28, %v3322_v26  ;;  %v2690_v16 = vadd.f32 %v7355_v53, %v7235_v46  ;;  %v7632_v36 = vadd.f32 1.0, %v4389_v32  ;;  %v3498_v13 = vpop.permute.xlu1 %3497 }
 0x553   : > { %3706 = vrot.lane.b32.xlu0 %v3636_v10, %s4490_s17  ;;  %v3348_v9 = vsel %vm3345_vm15, %v3347_v15, %v3343_v5  ;;  %v3317_v42 = vor.u32 1.1754944e-38, %v3316_v33  ;;  %4396 = vpow2.f32 %v4081_v62  ;;  %v3313_v8 = vsel %vm7622_vm6, %v7462_v37, %v3309_v23  ;;  %v2859_v46 = vpop.f32.mrf.mxu1  ;;  %v7656_v12 = vpop.f32.mrf.mxu3 }
 0x554   : > { %vm7640_vm8 = vcmp.eq.f32.partialorder %v3314_v60, 8.507059e+37  ;;  %v3382_v41 = vsub.f32 1.0, %v3381_v18  ;;  %vm3325_vm9 = vweird.f32 %v7418_v0  ;;  %v3331_v11 = vand.u32 2147483648, %v7418_v0 }
 0x555   : > { %3567 = vperm.xlu1 %4144, %v3288_v17   ;;  %v7635_v2 = vpop.eup %4392  ;;  %v3351_v49 = vmul.f32 %v7626_v57, %v7574_v7  ;;  %v2858_v56 = vadd.f32 %v7313_v25, %v2857_v51  ;;  %v3324_v37 = vadd.f32 %v7472_v28, %v3323_v29  ;;  %4398 = vrcp.f32 %v7632_v36 }
 0x556   : > { %3702 = vrot.lane.b32.xlu2 %v3634_v48, %s4490_s17  ;;  %v4395_v63 = vpop.eup %4394  ;;  %v3635_v38 = vmul.f32 %v3498_v13, %v2690_v16  ;;  %v2860_v21 = vadd.f32 %v7313_v25, %v2859_v46  ;;  %v3329_v54 = vand.u32 2147483647, %v7418_v0  ;;  %v2700_v30 = vadd.f32 %v7355_v53, %v7327_v40 }
 0x557   : > { %v3318_v10 = vsel %vm7640_vm8, %v3317_v42, %v3313_v8  ;;  %v3383_v6 = vmul.f32 %v7602_v24, %v3382_v41  ;;  %v7665_v43 = vadd.f32 1.0, %v4395_v63  ;;  %v3332_v25 = vor.u32 1.1754944e-38, %v3331_v11  ;;  %v3513_v8 = vpop.permute.xlu0 %3512 }
 0x558   : > { %v3352_v0 = vsub.f32 1.0, %v3351_v49  ;;  %v3366_v40 = vmul.f32 %v7635_v2, %v7582_v1  ;;  %v3639_v59 = vmul.f32 %v3518_v39, %v2700_v30  ;;  %v4083_v17 = vmul.f32 -1.442695, %v2858_v56  ;;  %v3533_v56 = vpop.permute.xlu2 %3532 }
 0x559   : > { %4036 = vmatmul.msk.bf16.gmra.mxu3 %vm702_vm2, %v2609_v3  ;;  %vm3326_vm2 = vweird.f32 %v7472_v28  ;;  %v4397_v27 = vpop.eup %4396  ;;  %vm3385_vm10 = vweird.f32 %v7547_v4  ;;  %vm3386_vm1 = vweird.f32 %v7602_v24  ;;  %v4084_v19 = vmul.f32 -1.442695, %v2860_v21 }
 0x55a   : > { %vm7660_vm7 = vmor %vm3325_vm9, %vm3326_vm2  ;;  %vm3330_vm11 = vcmp.eq.f32.partialorder %v3329_v54, 8.507059e+37  ;;  %v3391_v55 = vand.u32 2147483648, %v7547_v4  ;;  %v3384_v14 = vadd.f32 %v7602_v24, %v3383_v6  ;;  %v3389_v44 = vand.u32 2147483647, %v7547_v4  ;;  %v3508_v62 = vpop.permute.xlu1 %3507 }
 0x55b   : > { %3587 = vperm.xlu0 %4143, %v3348_v9   ;;  %v3328_v50 = vsel %vm7660_vm7, %v7472_v28, %v3324_v37  ;;  %v7679_v23 = vpop.eup %4398  ;;  %v2695_v33 = vadd.f32 %v7355_v53, %v7311_v45  ;;  %4400 = vrcp.f32 %v7665_v43  ;;  %v7684_v26 = vadd.f32 1.0, %v4397_v27  ;;  %vm7686_vm12 = vmor %vm3385_vm10, %vm3386_vm1  ;;  %v7699_v3 = vpop.f32.mrf.mxu3 }
 0x55c   : > { %4402 = vpow2.f32 %v4083_v17  ;;  %v3333_v15 = vsel %vm3330_vm11, %v3332_v25, %v3328_v50  ;;  %v3353_v60 = vmul.f32 %v7626_v57, %v3352_v0  ;;  %v3367_v32 = vsub.f32 1.0, %v3366_v40 }
 0x55d   : > { %3704 = vrot.lane.b32.xlu1 %v3635_v38, %s4490_s17  ;;  %4404 = vpow2.f32 %v4084_v19  ;;  %v3392_v4 = vor.u32 1.1754944e-38, %v3391_v55  ;;  %vm3355_vm13 = vweird.f32 %v7574_v7  ;;  %vm3356_vm14 = vweird.f32 %v7626_v57 }
 0x55e   : > { %3577 = vperm.xlu2 %4142, %v3318_v10   ;;  %v3637_v45 = vmul.f32 %v3508_v62, %v2695_v33  ;;  %v3388_v48 = vsel %vm7686_vm12, %v7602_v24, %v3384_v14  ;;  %vm3390_vm3 = vcmp.eq.f32.partialorder %v3389_v44, 8.507059e+37  ;;  %v3426_v5 = vmul.f32 %v7679_v23, %v7632_v36  ;;  %vm7709_vm4 = vmor %vm3355_vm13, %vm3356_vm14  ;;  %v7737_v10 = vpop.f32.mrf.mxu0 }
 0x55f   : > { %v3361_v18 = vand.u32 2147483648, %v7574_v7  ;;  %v3354_v22 = vadd.f32 %v7626_v57, %v3353_v60  ;;  %v3359_v29 = vand.u32 2147483647, %v7574_v7  ;;  %4406 = vrcp.f32 %v7684_v26 }
 0x560   : > { %v3393_v24 = vsel %vm3390_vm3, %v3392_v4, %v3388_v48  ;;  %v3368_v9 = vmul.f32 %v7635_v2, %v3367_v32  ;;  %v3427_v20 = vsub.f32 1.0, %v3426_v5  ;;  %v2698_v41 = vadd.f32 %v7355_v53, %v7318_v34 }
 0x561   : > { %v7704_v16 = vpop.eup %4400  ;;  %v3362_v63 = vor.u32 1.1754944e-38, %v3361_v18  ;;  %vm3370_vm5 = vweird.f32 %v7582_v1  ;;  %vm3371_vm0 = vweird.f32 %v7635_v2  ;;  %v3358_v7 = vsel %vm7709_vm4, %v7626_v57, %v3354_v22  ;;  %v3528_v18 = vpop.permute.xlu0 %3527 }
 0x562   : > { %v4403_v42 = vpop.eup %4402  ;;  %vm3360_vm15 = vcmp.eq.f32.partialorder %v3359_v29, 8.507059e+37  ;;  %v3396_v11 = vmul.f32 %v7704_v16, %v7665_v43  ;;  %v3638_v49 = vmul.f32 %v3513_v8, %v2698_v41  ;;  %v3369_v37 = vadd.f32 %v7635_v2, %v3368_v9  ;;  %vm7730_vm6 = vmor %vm3370_vm5, %vm3371_vm0  ;;  %v3548_v8 = vpop.permute.xlu2 %3547 }
 0x563   : > { %3712 = vrot.lane.b32.xlu0 %v3639_v59, %s4490_s17  ;;  %v4405_v46 = vpop.eup %4404  ;;  %v3374_v39 = vand.u32 2147483647, %v7582_v1  ;;  %v3376_v34 = vand.u32 2147483648, %v7582_v1  ;;  %v2708_v38 = vadd.f32 %v7355_v53, %v7416_v47  ;;  %v3428_v57 = vmul.f32 %v7679_v23, %v3427_v20  ;;  %v7742_v6 = vpop.f32.mrf.mxu3 }
 0x564   : > { %v7728_v21 = vadd.f32 1.0, %v4405_v46  ;;  %v7739_v51 = vadd.f32 1.0, %v4403_v42  ;;  %v3363_v1 = vsel %vm3360_vm15, %v3362_v63, %v3358_v7  ;;  %vm3430_vm8 = vweird.f32 %v7632_v36 }
 0x565   : > { %3582 = vperm.xlu1 %4144, %v3333_v15   ;;  %v7735_v30 = vpop.eup %4406  ;;  %v3642_v47 = vmul.f32 %v3533_v56, %v2708_v38  ;;  %vm3431_vm9 = vweird.f32 %v7679_v23  ;;  %v3397_v25 = vsub.f32 1.0, %v3396_v11  ;;  %v3373_v0 = vsel %vm7730_vm6, %v7635_v2, %v3369_v37 }
 0x566   : > { %3708 = vrot.lane.b32.xlu2 %v3637_v45, %s4490_s17  ;;  %vm3375_vm2 = vcmp.eq.f32.partialorder %v3374_v39, 8.507059e+37  ;;  %v3377_v40 = vor.u32 1.1754944e-38, %v3376_v34  ;;  %v3436_v27 = vand.u32 2147483648, %v7632_v36  ;;  %4408 = vrcp.f32 %v7728_v21  ;;  %vm7757_vm7 = vmor %vm3430_vm8, %vm3431_vm9  ;;  %v7777_v45 = vpop.f32.mrf.mxu0 }
 0x567   : > { %v3429_v59 = vadd.f32 %v7679_v23, %v3428_v57  ;;  %v3434_v17 = vand.u32 2147483647, %v7632_v36  ;;  %v3411_v19 = vmul.f32 %v7735_v30, %v7684_v26  ;;  %4410 = vrcp.f32 %v7739_v51  ;;  %v3523_v50 = vpop.permute.xlu1 %3522 }
 0x568   : > { %v2703_v55 = vadd.f32 %v7355_v53, %v7339_v35  ;;  %v3398_v14 = vmul.f32 %v7704_v16, %v3397_v25  ;;  %v3378_v44 = vsel %vm3375_vm2, %v3377_v40, %v3373_v0  ;;  %v3437_v33 = vor.u32 1.1754944e-38, %v3436_v27 }
 0x569   : > { %vm3400_vm10 = vweird.f32 %v7665_v43  ;;  %vm3401_vm1 = vweird.f32 %v7704_v16  ;;  %v3433_v62 = vsel %vm7757_vm7, %v7679_v23, %v3429_v59  ;;  %vm3435_vm11 = vcmp.eq.f32.partialorder %v3434_v17, 8.507059e+37 }
 0x56a   : > { %v3640_v36 = vmul.f32 %v3523_v50, %v2703_v55  ;;  %v3412_v28 = vsub.f32 1.0, %v3411_v19  ;;  %v3404_v15 = vand.u32 2147483647, %v7665_v43  ;;  %v3406_v35 = vand.u32 2147483648, %v7665_v43  ;;  %vm7781_vm12 = vmor %vm3400_vm10, %vm3401_vm1 }
 0x56b   : > { %3602 = vperm.xlu0 %4143, %v3393_v24   ;;  %v3399_v32 = vadd.f32 %v7704_v16, %v3398_v14  ;;  %v3438_v48 = vsel %vm3435_vm11, %v3437_v33, %v3433_v62  ;;  %v7785_v5 = vpop.f32.mrf.mxu3  ;;  %v2705_v29 = vadd.f32 %v7355_v53, %v7366_v61  ;;  %vm3415_vm14 = vweird.f32 %v7684_v26  ;;  %v3543_v14 = vpop.permute.xlu0 %3542 }
 0x56c   : > { %v7771_v60 = vpop.eup %4408  ;;  %v3413_v22 = vmul.f32 %v7735_v30, %v3412_v28  ;;  %vm3405_vm13 = vcmp.eq.f32.partialorder %v3404_v15, 8.507059e+37  ;;  %v3407_v24 = vor.u32 1.1754944e-38, %v3406_v35  ;;  %vm3416_vm3 = vweird.f32 %v7735_v30  ;;  %v7846_v35 = vld [vmem:[%s8098_s6] ss:$0 sm:$0xff] }
 0x56d   : > { %3710 = vrot.lane.b32.xlu1 %v3638_v49, %s4490_s17  ;;  %v7775_v4 = vpop.eup %4410  ;;  %v3456_v13 = vmul.f32 %v7771_v60, %v7728_v21  ;;  %v3403_v43 = vsel %vm7781_vm12, %v7704_v16, %v3399_v32  ;;  %v3641_v42 = vmul.f32 %v3528_v18, %v2705_v29  ;;  %v3421_v61 = vand.u32 2147483648, %v7684_v26  ;;  %vm7805_vm4 = vmor %vm3415_vm14, %vm3416_vm3 }
 0x56e   : > { %3592 = vperm.xlu2 %4142, %v3363_v1   ;;  %v3441_v9 = vmul.f32 %v7775_v4, %v7739_v51  ;;  %v2715_v20 = vadd.f32 %v7355_v53, %v7610_v52  ;;  %v3414_v46 = vadd.f32 %v7735_v30, %v3413_v22  ;;  %v3419_v41 = vand.u32 2147483647, %v7684_v26  ;;  %v7809_v37 = vpop.f32.mrf.mxu0 }
 0x56f   : > { %v3408_v16 = vsel %vm3405_vm13, %v3407_v24, %v3403_v43  ;;  %v3457_v7 = vsub.f32 1.0, %v3456_v13  ;;  %v3422_v56 = vor.u32 1.1754944e-38, %v3421_v61  ;;  %v3538_v26 = vpop.permute.xlu1 %3537  ;;  %v2710_v34 = vadd.f32 %v7355_v53, %v7474_v58 }
 0x570   : > { %v3645_v11 = vmul.f32 %v3548_v8, %v2715_v20  ;;  %v3442_v49 = vsub.f32 1.0, %v3441_v9  ;;  %v3418_v52 = vsel %vm7805_vm4, %v7735_v30, %v3414_v46  ;;  %vm3420_vm5 = vcmp.eq.f32.partialorder %v3419_v41, 8.507059e+37 }
 0x571   : > { %v3458_v39 = vmul.f32 %v7771_v60, %v3457_v7  ;;  %v3423_v57 = vsel %vm3420_vm5, %v3422_v56, %v3418_v52  ;;  %vm3460_vm0 = vweird.f32 %v7728_v21  ;;  %vm3461_vm15 = vweird.f32 %v7771_v60 }
 0x572   : > { %v3443_v54 = vmul.f32 %v7775_v4, %v3442_v49  ;;  %v3643_v1 = vmul.f32 %v3538_v26, %v2710_v34  ;;  %vm3445_vm6 = vweird.f32 %v7739_v51  ;;  %vm3446_vm8 = vweird.f32 %v7775_v4  ;;  %vm3462_vm9 = vmor %vm3460_vm0, %vm3461_vm15 }
 0x573   : > { %3718 = vrot.lane.b32.xlu0 %v3642_v47, %s4490_s17  ;;  %v7818_v38 = vpop.f32.mrf.mxu3  ;;  %v3466_v47 = vand.u32 2147483648, %v7728_v21  ;;  %v3459_v30 = vadd.f32 %v7771_v60, %v3458_v39  ;;  %v3464_v58 = vand.u32 2147483647, %v7728_v21  ;;  %v3451_v25 = vand.u32 2147483648, %v7739_v51  ;;  %vm3447_vm2 = vmor %vm3445_vm6, %vm3446_vm8 }
 0x574   : > { %v3444_v0 = vadd.f32 %v7775_v4, %v3443_v54  ;;  %v3449_v40 = vand.u32 2147483647, %v7739_v51  ;;  %v2713_v51 = vadd.f32 %v7355_v53, %v7555_v31  ;;  %v2718_v33 = vadd.f32 %v7355_v53, %v7656_v12 }
 0x575   : > { %3597 = vperm.xlu1 %4144, %v3378_v44   ;;  %v3467_v27 = vor.u32 1.1754944e-38, %v3466_v47  ;;  %v3463_v59 = vsel %vm3462_vm9, %v7771_v60, %v3459_v30  ;;  %vm3465_vm7 = vcmp.eq.f32.partialorder %v3464_v58, 8.507059e+37  ;;  %v3452_v17 = vor.u32 1.1754944e-38, %v3451_v25 }
 0x576   : > { %3714 = vrot.lane.b32.xlu2 %v3640_v36, %s4490_s17  ;;  %v1608_v19 = vpop.f32.mrf.mxu0  ;;  %v3448_v50 = vsel %vm3447_vm2, %v7775_v4, %v3444_v0  ;;  %vm3450_vm10 = vcmp.eq.f32.partialorder %v3449_v40, 8.507059e+37  ;;  %v3644_v36 = vmul.f32 %v3543_v14, %v2713_v51  ;;  %vm3790_vm1 = vcmask 130048  }
 0x577   : > { %v3468_v2 = vsel %vm3465_vm7, %v3467_v27, %v3463_v59  ;;  %v3453_v55 = vsel %vm3450_vm10, %v3452_v17, %v3448_v50  ;;  %v3553_v44 = vpop.permute.xlu1 %3552  ;;  %v1604_v12 = vadd.f32 %v7846_v35, %v7777_v45  ;;  %vm3823_vm11 = vcmask 162816  }
 0x578   : > { %v3646_v28 = vmul.f32 %v3553_v44, %v2718_v33  ;;  %v1602_v4 = vadd.f32 %v7846_v35, %v7737_v10  ;;  %v2723_v24 = vadd.f32 %v7355_v53, %v7742_v6  ;;  %v2720_v13 = vadd.f32 %v7355_v53, %v7699_v3 }
 0x579   : > { %v1609_v6 = vadd.f32 %v7846_v35, %v1608_v19  ;;  %v2728_v52 = vadd.f32 %v7355_v53, %v7818_v38  ;;  %v2725_v50 = vadd.f32 %v7355_v53, %v7785_v5 }
 0x57b   : > { %3617 = vperm.xlu0 %4143, %v3438_v48   ;;  %v2729_v21 = vpop.f32.mrf.mxu3 }
 0x57c   : > { %v2730_v49 = vadd.f32 %v7355_v53, %v2729_v21 }
 0x57d   : > { %3716 = vrot.lane.b32.xlu1 %v3641_v42, %s4490_s17 }
 0x57e   : > { %3607 = vperm.xlu2 %4142, %v3408_v16   ;;  %v1611_v62 = vpop.f32.mrf.mxu0 }
 0x57f   : > { %v1612_v61 = vadd.f32 %v7846_v35, %v1611_v62 }
 0x583   : > { %3724 = vrot.lane.b32.xlu0 %v3645_v11, %s4490_s17  ;;  %v7839_v15 = vpop.f32.mrf.mxu3 }
 0x585   : > { %3612 = vperm.xlu1 %4144, %v3423_v57   ;;  %v1607_v57 = vadd.f32 %v7846_v35, %v7809_v37 }
 0x586   : > { %3720 = vrot.lane.b32.xlu2 %v3643_v1, %s4490_s17  ;;  %v7850_v31 = vpop.f32.mrf.mxu0 }
 0x587   : > { %v1614_v5 = vadd.f32 %v7846_v35, %v7850_v31 }
 0x58b   : > { %v7854_v60 = vpop.f32.mrf.mxu3 }
 0x58c   : > { %v2735_v44 = vadd.f32 %v7355_v53, %v7854_v60 }
 0x58d   : > { %3627 = vperm.xlu1 %4144, %v3468_v2  }
 0x58e   : > { %3622 = vperm.xlu2 %4142, %v3453_v55   ;;  %v1616_v29 = vpop.f32.mrf.mxu0 }
 0x58f   : > { %v1617_v25 = vadd.f32 %v7846_v35, %v1616_v29 }
 0x593   : > { %v2737_v9 = vpop.f32.mrf.mxu3 }
 0x594   : > { %v2738_v21 = vadd.f32 %v7355_v53, %v2737_v9 }
 0x595   : > { %3722 = vrot.lane.b32.xlu1 %v3644_v36, %s4490_s17 }
 0x596   : > { %3726 = vrot.lane.b32.xlu2 %v3646_v28, %s4490_s17  ;;  %v1618_v20 = vpop.f32.mrf.mxu0 }
 0x597   : > { %v1619_v47 = vadd.f32 %v7846_v35, %v1618_v20 }
 0x59b   : > { %v7878_v7 = vpop.f32.mrf.mxu3 }
 0x59e   : > { %v7885_v39 = vpop.f32.mrf.mxu0 }
 0x5a0   : > { %v3697_v32 = vpop.permute.xlu2 %3696 }
 0x5a1   : > { %v3792_v48 = vsel %vm3790_vm1, %v1604_v12, %v3697_v32 }
 0x5a2   : > { %v3825_v23 = vsel %vm3823_vm11, %v3792_v48, 0.0 }
 0x5a3   : > { %3857 = vst [vmem:[%s7860_s22 + $0x8] sm:$0xff] %v3825_v23  ;;  %v2742_v1 = vpop.f32.mrf.mxu3 }
 0x5a5   : > { %v3695_v18 = vpop.permute.xlu0 %3694 }
 0x5a6   : > { %v3791_v22 = vsel %vm3790_vm1, %v1602_v4, %v3695_v18  ;;  %v1623_v17 = vpop.f32.mrf.mxu0 }
 0x5a7   : > { %v3824_v45 = vsel %vm3823_vm11, %v3791_v22, 0.0  ;;  %v1624_v48 = vadd.f32 %v7846_v35, %v1623_v17  ;;  %v8333_v17 = vld [vmem:[#allocation25_spill] sm:$0xff] }
 0x5a8   : > { %3856 = vst [vmem:[%s7860_s22] sm:$0xff] %v3824_v45  ;;  %v3563_v10 = vpop.permute.xlu2 %3562 }
 0x5a9   : > { %v3648_v43 = vmul.f32 %v3563_v10, %v2723_v24  ;;  %v7928_v24 = vld [vmem:[%s8104_s12] ss:$0 sm:$0xff] }
 0x5aa   : > { %v2733_v10 = vadd.f32 %v7928_v24, %v7839_v15  ;;  %v1622_v15 = vadd.f32 %v7846_v35, %v7885_v39 }
 0x5ab   : > { %3730 = vrot.lane.b32.xlu0 %v3648_v43, %s4490_s17  ;;  %v2744_v55 = vpop.f32.mrf.mxu3 }
 0x5ad   : > { %v3558_v42 = vpop.permute.xlu0 %3557 }
 0x5ae   : > { %v3647_v8 = vmul.f32 %v3558_v42, %v2720_v13  ;;  %v1626_v28 = vpop.f32.mrf.mxu0  ;;  %v2745_v13 = vadd.f32 %v7928_v24, %v2744_v55  ;;  %v8334_v55 = vld [vmem:[#allocation29_spill] sm:$0xff] }
 0x5af   : > { %v1627_v12 = vadd.f32 %v7846_v35, %v1626_v28 }
 0x5b0   : > { %3728 = vrot.lane.b32.xlu1 %v3647_v8, %s4490_s17  ;;  %v3703_v46 = vpop.permute.xlu2 %3702  ;;  %v2743_v8 = vadd.f32 %v7928_v24, %v2742_v1 }
 0x5b1   : > { %v3795_v41 = vsel %vm3790_vm1, %v1612_v61, %v3703_v46 }
 0x5b2   : > { %v3828_v16 = vsel %vm3823_vm11, %v3795_v41, 0.0  ;;  %v8331_v41 = vld [vmem:[#allocation28_spill] sm:$0xff] }
 0x5b3   : > { %3860 = vst [vmem:[%s7860_s22 + $0x20] sm:$0xff] %v3828_v16  ;;  %v1634_v16 = vadd.f32 %v7846_v35, %v8331_v41 }
 0x5b5   : > { %v3701_v3 = vpop.permute.xlu0 %3700 }
 0x5b6   : > { %v3794_v63 = vsel %vm3790_vm1, %v1609_v6, %v3701_v3 }
 0x5b7   : > { %v3827_v11 = vsel %vm3823_vm11, %v3794_v63, 0.0 }
 0x5b8   : > { %3859 = vst [vmem:[%s7860_s22 + $0x18] sm:$0xff] %v3827_v11  ;;  %v3578_v56 = vpop.permute.xlu2 %3577 }
 0x5b9   : > { %v3651_v26 = vmul.f32 %v3578_v56, %v2730_v49  ;;  %v8332_v49 = vld [vmem:[#allocation24_spill] sm:$0xff] }
 0x5ba   : > { %v1632_v56 = vadd.f32 %v7846_v35, %v8332_v49  ;;  %v8340_v49 = vld [vmem:[#allocation9_spill] sm:$0xff] }
 0x5bb   : > { %3736 = vrot.lane.b32.xlu0 %v3651_v26, %s4490_s17 }
 0x5bd   : > { %v3573_v34 = vpop.permute.xlu0 %3572 }
 0x5be   : > { %v3650_v54 = vmul.f32 %v3573_v34, %v2728_v52 }
 0x5bf   : > { %v3699_v30 = vpop.permute.xlu1 %3698 }
 0x5c0   : > { %3734 = vrot.lane.b32.xlu1 %v3650_v54, %s4490_s17  ;;  %v3793_v38 = vsel %vm3790_vm1, %v1607_v57, %v3699_v30  ;;  %v3709_v58 = vpop.permute.xlu2 %3708 }
 0x5c1   : > { %v3826_v0 = vsel %vm3823_vm11, %v3793_v38, 0.0  ;;  %v3798_v40 = vsel %vm3790_vm1, %v1619_v47, %v3709_v58  ;;  %v2740_v47 = vadd.f32 %v7928_v24, %v7878_v7 }
 0x5c2   : > { %3858 = vst [vmem:[%s7860_s22 + $0x10] sm:$0xff] %v3826_v0  ;;  %v3831_v27 = vsel %vm3823_vm11, %v3798_v40, 0.0 }
 0x5c3   : > { %3863 = vst [vmem:[%s7860_s22 + $0x38] sm:$0xff] %v3831_v27 }
 0x5c5   : > { %v3707_v59 = vpop.permute.xlu0 %3706 }
 0x5c6   : > { %v3797_v37 = vsel %vm3790_vm1, %v1617_v25, %v3707_v59  ;;  %v1628_v59 = vpop.f32.mrf.mxu0 }
 0x5c7   : > { %v3830_v19 = vsel %vm3823_vm11, %v3797_v37, 0.0  ;;  %v3568_v2 = vpop.permute.xlu1 %3567  ;;  %v1629_v7 = vadd.f32 %v7846_v35, %v1628_v59 }
 0x5c8   : > { %3862 = vst [vmem:[%s7860_s22 + $0x30] sm:$0xff] %v3830_v19  ;;  %v3649_v14 = vmul.f32 %v3568_v2, %v2725_v50  ;;  %v3593_v51 = vpop.permute.xlu2 %3592  ;;  %v1642_v19 = vadd.f32 %v7846_v35, %v8333_v17 }
 0x5c9   : > { %v3654_v33 = vmul.f32 %v3593_v51, %v2738_v21 }
 0x5ca   : > { %3732 = vrot.lane.b32.xlu2 %v3649_v14, %s4490_s17  ;;  %v1639_v14 = vadd.f32 %v7846_v35, %v8334_v55 }
 0x5cb   : > { %3742 = vrot.lane.b32.xlu0 %v3654_v33, %s4490_s17 }
 0x5cc   : > { %v7913_v53 = vpop.f32.mrf.mxu3 }
 0x5cd   : > { %v3588_v36 = vpop.permute.xlu0 %3587 }
 0x5ce   : > { %v3653_v62 = vmul.f32 %v3588_v36, %v2735_v44 }
 0x5cf   : > { %v3705_v32 = vpop.permute.xlu1 %3704 }
 0x5d0   : > { %3740 = vrot.lane.b32.xlu1 %v3653_v62, %s4490_s17  ;;  %v3796_v60 = vsel %vm3790_vm1, %v1614_v5, %v3705_v32  ;;  %v3715_v4 = vpop.permute.xlu2 %3714  ;;  %v2748_v5 = vadd.f32 %v7928_v24, %v7913_v53 }
 0x5d1   : > { %v3829_v23 = vsel %vm3823_vm11, %v3796_v60, 0.0  ;;  %v3801_v18 = vsel %vm3790_vm1, %v1627_v12, %v3715_v4 }
 0x5d2   : > { %3861 = vst [vmem:[%s7860_s22 + $0x28] sm:$0xff] %v3829_v23  ;;  %v3834_v22 = vsel %vm3823_vm11, %v3801_v18, 0.0  ;;  %v8335_v18 = vld [vmem:[#allocation23_spill] sm:$0xff] }
 0x5d3   : > { %3866 = vst [vmem:[%s7860_s22 + $0x50] sm:$0xff] %v3834_v22  ;;  %v1637_v22 = vadd.f32 %v7846_v35, %v8335_v18 }
 0x5d4   : > { %v2749_v20 = vpop.f32.mrf.mxu3 }
 0x5d5   : > { %v3713_v45 = vpop.permute.xlu0 %3712  ;;  %v2750_v0 = vadd.f32 %v7928_v24, %v2749_v20 }
 0x5d6   : > { %v3800_v31 = vsel %vm3790_vm1, %v1624_v48, %v3713_v45 }
 0x5d7   : > { %v3833_v29 = vsel %vm3823_vm11, %v3800_v31, 0.0  ;;  %v3583_v43 = vpop.permute.xlu1 %3582 }
 0x5d8   : > { %3865 = vst [vmem:[%s7860_s22 + $0x48] sm:$0xff] %v3833_v29  ;;  %v3652_v9 = vmul.f32 %v3583_v43, %v2733_v10  ;;  %v3608_v42 = vpop.permute.xlu2 %3607  ;;  %v8336_v29 = vld [vmem:[#allocation27_spill] sm:$0xff] }
 0x5d9   : > { %v3657_v61 = vmul.f32 %v3608_v42, %v2745_v13  ;;  %v1647_v10 = vadd.f32 %v7846_v35, %v8336_v29 }
 0x5da   : > { %3738 = vrot.lane.b32.xlu2 %v3652_v9, %s4490_s17 }
 0x5db   : > { %3748 = vrot.lane.b32.xlu0 %v3657_v61, %s4490_s17 }
 0x5dc   : > { %v2752_v57 = vpop.f32.mrf.mxu3 }
 0x5dd   : > { %v3603_v46 = vpop.permute.xlu0 %3602  ;;  %v2753_v30 = vadd.f32 %v7928_v24, %v2752_v57  ;;  %v8341_v57 = vld [vmem:[#allocation10_spill] sm:$0xff] }
 0x5de   : > { %v3656_v6 = vmul.f32 %v3603_v46, %v2743_v8  ;;  %v8338_v46 = vld [vmem:[#allocation30_spill] sm:$0xff] }
 0x5df   : > { %v3711_v3 = vpop.permute.xlu1 %3710 }
 0x5e0   : > { %3746 = vrot.lane.b32.xlu1 %v3656_v6, %s4490_s17  ;;  %v3799_v63 = vsel %vm3790_vm1, %v1622_v15, %v3711_v3  ;;  %v3721_v11 = vpop.permute.xlu2 %3720  ;;  %v1649_v6 = vadd.f32 %v7846_v35, %v8338_v46  ;;  %v8339_v3 = vld [vmem:[#allocation11_spill] sm:$0xff] }
 0x5e1   : > { %v3832_v52 = vsel %vm3823_vm11, %v3799_v63, 0.0  ;;  %v3804_v26 = vsel %vm3790_vm1, %v1634_v16, %v3721_v11  ;;  %v1654_v63 = vadd.f32 %v7846_v35, %v8339_v3 }
 0x5e2   : > { %3864 = vst [vmem:[%s7860_s22 + $0x40] sm:$0xff] %v3832_v52  ;;  %v3837_v34 = vsel %vm3823_vm11, %v3804_v26, 0.0 }
 0x5e3   : > { %3869 = vst [vmem:[%s7860_s22 + $0x68] sm:$0xff] %v3837_v34 }
 0x5e4   : > { %v2754_v60 = vpop.f32.mrf.mxu3 }
 0x5e5   : > { %v3719_v54 = vpop.permute.xlu0 %3718  ;;  %v2755_v4 = vadd.f32 %v7928_v24, %v2754_v60  ;;  %v8337_v24 = vld [vmem:[#allocation31_spill] sm:$0xff] }
 0x5e6   : > { %v3803_v39 = vsel %vm3790_vm1, %v1632_v56, %v3719_v54  ;;  %v1644_v43 = vadd.f32 %v7846_v35, %v8337_v24  ;;  %v1652_v56 = vadd.f32 %v7846_v35, %v8340_v49 }
 0x5e7   : > { %v3836_v1 = vsel %vm3823_vm11, %v3803_v39, 0.0  ;;  %v3598_v38 = vpop.permute.xlu1 %3597 }
 0x5e8   : > { %3868 = vst [vmem:[%s7860_s22 + $0x60] sm:$0xff] %v3836_v1  ;;  %v3655_v58 = vmul.f32 %v3598_v38, %v2740_v47  ;;  %v3623_v25 = vpop.permute.xlu2 %3622  ;;  %v1657_v1 = vadd.f32 %v7846_v35, %v8341_v57 }
 0x5e9   : > { %v3660_v40 = vmul.f32 %v3623_v25, %v2753_v30 }
 0x5ea   : > { %3744 = vrot.lane.b32.xlu2 %v3655_v58, %s4490_s17  ;;  %v8342_v58 = vld [vmem:[#allocation13_spill] sm:$0xff] }
 0x5eb   : > { %3754 = vrot.lane.b32.xlu0 %v3660_v40, %s4490_s17  ;;  %v1662_v25 = vadd.f32 %v7846_v35, %v8342_v58  ;;  %v8343_v40 = vld [vmem:[#allocation12_spill] sm:$0xff] }
 0x5ed   : > { %v3618_v27 = vpop.permute.xlu0 %3617 }
 0x5ee   : > { %v3659_v37 = vmul.f32 %v3618_v27, %v2750_v0  ;;  %v1659_v27 = vadd.f32 %v7846_v35, %v8343_v40 }
 0x5ef   : > { %v3717_v50 = vpop.permute.xlu1 %3716 }
 0x5f0   : > { %3752 = vrot.lane.b32.xlu1 %v3659_v37, %s4490_s17  ;;  %v3802_v21 = vsel %vm3790_vm1, %v1629_v7, %v3717_v50  ;;  %v3727_v2 = vpop.permute.xlu2 %3726  ;;  %v8344_v50 = vld [vmem:[#allocation14_spill] sm:$0xff] }
 0x5f1   : > { %v3835_v51 = vsel %vm3823_vm11, %v3802_v21, 0.0  ;;  %v3807_v44 = vsel %vm3790_vm1, %v1642_v19, %v3727_v2  ;;  %v1664_v21 = vadd.f32 %v7846_v35, %v8344_v50 }
 0x5f2   : > { %3867 = vst [vmem:[%s7860_s22 + $0x58] sm:$0xff] %v3835_v51  ;;  %v3840_v33 = vsel %vm3823_vm11, %v3807_v44, 0.0  ;;  %v8345_v51 = vld [vmem:[#allocation16_spill] sm:$0xff] }
 0x5f3   : > { %3872 = vst [vmem:[%s7860_s22 + $0x80] sm:$0xff] %v3840_v33  ;;  %v1669_v44 = vadd.f32 %v7846_v35, %v8345_v51 }
 0x5f5   : > { %v3725_v36 = vpop.permute.xlu0 %3724 }
 0x5f6   : > { %v3806_v62 = vsel %vm3790_vm1, %v1639_v14, %v3725_v36  ;;  %v8346_v36 = vld [vmem:[#allocation15_spill] sm:$0xff] }
 0x5f7   : > { %v3839_v28 = vsel %vm3823_vm11, %v3806_v62, 0.0  ;;  %v3613_v12 = vpop.permute.xlu1 %3612  ;;  %v1667_v62 = vadd.f32 %v7846_v35, %v8346_v36 }
 0x5f8   : > { %3871 = vst [vmem:[%s7860_s22 + $0x78] sm:$0xff] %v3839_v28  ;;  %v3658_v32 = vmul.f32 %v3613_v12, %v2748_v5 }
 0x5fa   : > { %3750 = vrot.lane.b32.xlu2 %v3658_v32, %s4490_s17 }
 0x5ff   : > { %v3628_v48 = vpop.permute.xlu1 %3627 }
 0x600   : > { %v3661_v23 = vmul.f32 %v3628_v48, %v2755_v4  ;;  %v8347_v4 = vld [vmem:[#allocation17_spill] sm:$0xff] }
 0x601   : > { %v1672_v48 = vadd.f32 %v7846_v35, %v8347_v4 }
 0x602   : > { %3756 = vrot.lane.b32.xlu2 %v3661_v23, %s4490_s17  ;;  %s4444_s17 = scalar_lea.hbm %s8107_s15, 512 }
 0x603   : > { %p4446_p1 = scmp.lt.s32.totalorder %s4444_s17, %s4440_s28 }
 0x605   : > { %p4447_p2 = por %p4446_p1, %p4445_p0 }
 0x607   : > { %v3723_v45 = vpop.permute.xlu1 %3722  ;;  %p4448_p3 = pnand %p4447_p2, %p4443_p13 }
 0x608   : > { %v3805_v31 = vsel %vm3790_vm1, %v1637_v22, %v3723_v45  ;;  %v8348_v45 = vld [vmem:[#allocation20_spill] sm:$0xff] }
 0x609   : > { %v3838_v53 = vsel %vm3823_vm11, %v3805_v31, 0.0  ;;  %v1679_v31 = vadd.f32 %v7846_v35, %v8348_v45 }
 0x60a   : > { %3870 = vst [vmem:[%s7860_s22 + $0x70] sm:$0xff] %v3838_v53  ;;  %v8349_v53 = vld [vmem:[#allocation19_spill] sm:$0xff] }
 0x60b   : > { %v1677_v29 = vadd.f32 %v7846_v35, %v8349_v53 }
 0x61d   : > { %v3731_v13 = vpop.permute.xlu0 %3730 }
 0x61e   : > { %v3809_v9 = vsel %vm3790_vm1, %v1647_v10, %v3731_v13 }
 0x61f   : > { %v3842_v42 = vsel %vm3823_vm11, %v3809_v9, 0.0 }
 0x620   : > { %3874 = vst [vmem:[%s7860_s22 + $0x90] sm:$0xff] %v3842_v42 }
 0x622   : > { %v3729_v8 = vpop.permute.xlu1 %3728 }
 0x623   : > { %v3808_v61 = vsel %vm3790_vm1, %v1644_v43, %v3729_v8  ;;  %v8350_v43 = vld [vmem:[#allocation18_spill] sm:$0xff] }
 0x624   : > { %v3841_v20 = vsel %vm3823_vm11, %v3808_v61, 0.0  ;;  %v3733_v15 = vpop.permute.xlu2 %3732  ;;  %v1674_v9 = vadd.f32 %v7846_v35, %v8350_v43 }
 0x625   : > { %3873 = vst [vmem:[%s7860_s22 + $0x88] sm:$0xff] %v3841_v20  ;;  %v3810_v41 = vsel %vm3790_vm1, %v1649_v6, %v3733_v15 }
 0x626   : > { %v3843_v16 = vsel %vm3823_vm11, %v3810_v41, 0.0 }
 0x627   : > { %3875 = vst [vmem:[%s7860_s22 + $0x98] sm:$0xff] %v3843_v16 }
 0x62d   : > { %v3737_v11 = vpop.permute.xlu0 %3736 }
 0x62e   : > { %v3812_v52 = vsel %vm3790_vm1, %v1654_v63, %v3737_v11 }
 0x62f   : > { %v3845_v26 = vsel %vm3823_vm11, %v3812_v52, 0.0 }
 0x630   : > { %3877 = vst [vmem:[%s7860_s22 + $0xa8] sm:$0xff] %v3845_v26 }
 0x632   : > { %v3735_v34 = vpop.permute.xlu1 %3734 }
 0x633   : > { %v3811_v54 = vsel %vm3790_vm1, %v1652_v56, %v3735_v34 }
 0x634   : > { %v3844_v39 = vsel %vm3823_vm11, %v3811_v54, 0.0  ;;  %v3739_v47 = vpop.permute.xlu2 %3738 }
 0x635   : > { %3876 = vst [vmem:[%s7860_s22 + $0xa0] sm:$0xff] %v3844_v39  ;;  %v3813_v30 = vsel %vm3790_vm1, %v1657_v1, %v3739_v47 }
 0x636   : > { %v3846_v38 = vsel %vm3823_vm11, %v3813_v30, 0.0 }
 0x637   : > { %3878 = vst [vmem:[%s7860_s22 + $0xb0] sm:$0xff] %v3846_v38 }
 0x63d   : > { %v3743_v0 = vpop.permute.xlu0 %3742 }
 0x63e   : > { %v3815_v59 = vsel %vm3790_vm1, %v1662_v25, %v3743_v0 }
 0x63f   : > { %v3848_v37 = vsel %vm3823_vm11, %v3815_v59, 0.0 }
 0x640   : > { %3880 = vst [vmem:[%s7860_s22 + $0xc0] sm:$0xff] %v3848_v37 }
 0x642   : > { %v3741_v7 = vpop.permute.xlu1 %3740 }
 0x643   : > { %v3814_v17 = vsel %vm3790_vm1, %v1659_v27, %v3741_v7 }
 0x644   : > { %v3847_v19 = vsel %vm3823_vm11, %v3814_v17, 0.0  ;;  %v3745_v2 = vpop.permute.xlu2 %3744 }
 0x645   : > { %3879 = vst [vmem:[%s7860_s22 + $0xb8] sm:$0xff] %v3847_v19  ;;  %v3816_v55 = vsel %vm3790_vm1, %v1664_v21, %v3745_v2 }
 0x646   : > { %v3849_v14 = vsel %vm3823_vm11, %v3816_v55, 0.0 }
 0x647   : > { %3881 = vst [vmem:[%s7860_s22 + $0xc8] sm:$0xff] %v3849_v14 }
 0x64d   : > { %v3749_v33 = vpop.permute.xlu0 %3748 }
 0x64e   : > { %v3818_v28 = vsel %vm3790_vm1, %v1669_v44, %v3749_v33 }
 0x64f   : > { %v3851_v5 = vsel %vm3823_vm11, %v3818_v28, 0.0 }
 0x650   : > { %3883 = vst [vmem:[%s7860_s22 + $0xd8] sm:$0xff] %v3851_v5 }
 0x652   : > { %v3747_v12 = vpop.permute.xlu1 %3746 }
 0x653   : > { %v3817_v32 = vsel %vm3790_vm1, %v1667_v62, %v3747_v12 }
 0x654   : > { %v3850_v60 = vsel %vm3823_vm11, %v3817_v32, 0.0  ;;  %v3751_v23 = vpop.permute.xlu2 %3750 }
 0x655   : > { %3882 = vst [vmem:[%s7860_s22 + $0xd0] sm:$0xff] %v3850_v60  ;;  %v3819_v18 = vsel %vm3790_vm1, %v1672_v48, %v3751_v23 }
 0x656   : > { %v3852_v22 = vsel %vm3823_vm11, %v3819_v18, 0.0 }
 0x657   : > { %3884 = vst [vmem:[%s7860_s22 + $0xe0] sm:$0xff] %v3852_v22 }
 0x65c   : > { %v3757_v10 = vpop.permute.xlu2 %3756 }
 0x65d   : > { %v3822_v13 = vsel %vm3790_vm1, %v1679_v31, %v3757_v10  ;;  %v3755_v24 = vpop.permute.xlu0 %3754 }
 0x65e   : > { %v3855_v42 = vsel %vm3823_vm11, %v3822_v13, 0.0  ;;  %v3821_v8 = vsel %vm3790_vm1, %v1677_v29, %v3755_v24 }
 0x65f   : > { %3887 = vst [vmem:[%s7860_s22 + $0xf8] sm:$0xff] %v3855_v42  ;;  %v3854_v61 = vsel %vm3823_vm11, %v3821_v8, 0.0 }
 0x660   : > { %3886 = vst [vmem:[%s7860_s22 + $0xf0] sm:$0xff] %v3854_v61 }
 0x662   : > { %v3753_v20 = vpop.permute.xlu1 %3752 }
 0x663   : > { %v3820_v46 = vsel %vm3790_vm1, %v1674_v9, %v3753_v20 }
 0x664   : > { %v3853_v6 = vsel %vm3823_vm11, %v3820_v46, 0.0 }
 0x665   : > { %3885 = vst [vmem:[%s7860_s22 + $0xe8] sm:$0xff] %v3853_v6 }
 0x666   : > { %4451 = shalt.err (!%p4448_p3)
}
 0x667   : > { %s4491_s18 = smov 128   ;;  %s4492_s22 = smov 8  }
 0x668   : > { %4098 = dma.vmem_to_hbm [thread:$0]  (%p4614_p5), %s3902_s26, 4096, %s3904_s27, %s3889_s14, %s4491_s18, %s4491_s18, %s4492_s22  }
 0x669 PF: > { %p4104_p4 = scmp.ge.s32.totalorder %s4486_s23, 2  ;;  %s3918_s24 = sand.u32 1, %s4474_s20  }
 0x66a   : > { %s3919_s0 = scalar_lea.sflag [#allocation4], %s3918_s24 }
 0x66b   : > { %p4101_p7 = pnand %p4104_p4, %p4618_p6 }
 0x66d   : > { %p4102_p8 = pneg %p4101_p7 }
 0x66f   : > { %4469 = dma.done.wait (%p4102_p8), %s3919_s0, 4096  }
 0x670   : > { %4471 = vsyncadd (%p4102_p8), %s3919_s0, 4294963200  ;;  %s8351_s23 = sld [smem:[#allocation7_spill]]  ;;  %s8354_s20 = smov %s4478_s21 }
 0x671   : > { %s8352_s25 = sld [smem:[#allocation6_spill]] }
 0x672   : > { %s8353_s22 = sld [smem:[#allocation8_spill]] }
 0x676   : > { %p27_p9 = scmp.ge.s32.totalorder %s8351_s23, 4  }
 0x677   : > { %s8355_s21 = smov %s8352_s25 }
 0x678   :  { %29 = sbr.rel (!%p27_p9) target bundleno = 6 (0x6), region = 115 }
 0x67d   :  { %3925 = vsyncpa [#allocation4], 1 }
 0x67e   :  { %3927 = vsyncpa [#allocation4 + $0x1], 1 }

</bundles_post_ra>
